<compile_context>
chip_gen: v6e
topology: v6e:2x2x1
jax: 0.10.0
libtpu: 0.0.40
codegen_flags: <defaults>
</compile_context>

<pallas_src>
import jax
import jax.numpy as jnp
from jax.experimental import pallas as pl
from jax.experimental.pallas import tpu as pltpu

H = 20   # LSTM hidden size
IN = 4   # LSTM input size (2 loss features + 2 grad_prep features)


def _round_up(x, m):
    return ((x + m - 1) // m) * m


def meta_learner_kernel(gp_ref, h0_ref, c0_ref, meta_ref, grad_ref,
                        w_gp_ref, w_hh_ref, bias_ref, wfi_ref, wmeta_ref, bfi_ref,
                        hc_out, meta_out):
    """One fused MetaLearner step on a lane block of N learner params.

    Streamed (blocked along lanes):
      gp_ref   : (2, Nb)   grad_prep (transposed)
      h0_ref   : (H, Nb)   previous LSTM h
      c0_ref   : (H, Nb)   previous LSTM c
      meta_ref : (3, Nb)   packed meta state rows [f_prev, i_prev, c_prev]
      grad_ref : (1, Nb)   raw gradients
    Resident weights (constant index_map):
      w_gp_ref : (4H, 2)   W_ih columns for the grad_prep features
      w_hh_ref : (4H, H)
      bias_ref : (4H, 1)   b_ih + b_hh + W_ih[:, :2] @ loss   (loss folded in)
      wfi_ref  : (2, H)    rows [WF[:H].T, WI[:H].T]
      wmeta_ref: (2, 3)    [[WF[H+1], 0, WF[H]], [0, WI[H+1], WI[H]]]
      bfi_ref  : (2, 1)    [bF, bI]
    Outputs:
      hc_out   : (2, H, Nb)  [h_new, c_new]
      meta_out : (3, Nb)     rows [f_next, i_next, c_next]
    """
    f32 = jnp.float32

    # Fused LSTM gate pre-activations: (4H, Nb), gate order i, f, g, o.
    gates = (jnp.dot(w_gp_ref[...], gp_ref[...], preferred_element_type=f32)
             + jnp.dot(w_hh_ref[...], h0_ref[...], preferred_element_type=f32)
             + bias_ref[...])

    i_g = jax.nn.sigmoid(gates[0:H, :])
    f_g = jax.nn.sigmoid(gates[H:2 * H, :])
    g_g = jnp.tanh(gates[2 * H:3 * H, :])
    o_g = jax.nn.sigmoid(gates[3 * H:4 * H, :])

    c_new = f_g * c0_ref[...] + i_g * g_g          # (H, Nb)
    h_new = o_g * jnp.tanh(c_new)                  # (H, Nb)
    hc_out[0, :, :] = h_new
    hc_out[1, :, :] = c_new

    meta_prev = meta_ref[...]                      # (3, Nb): [f_prev, i_prev, c_prev]
    c_prev = meta_prev[2:3, :]

    # MetaLSTM heads: WF/WI matmul fused to a single (2, Nb) lane-dense result.
    fi = (jnp.dot(wfi_ref[...], h_new, preferred_element_type=f32)
          + jnp.dot(wmeta_ref[...], meta_prev, preferred_element_type=f32)
          + bfi_ref[...])                          # (2, Nb)

    f_next = fi[0:1, :]
    i_next = fi[1:2, :]
    c_next = jax.nn.sigmoid(f_next) * c_prev - jax.nn.sigmoid(i_next) * grad_ref[...]

    meta_out[...] = jnp.concatenate([f_next, i_next, c_next], axis=0)


def init_params(key, n_learner_params):
    """Deterministic synthetic init matching the PyTorch parameter shapes/ranges."""
    ks = jax.random.split(key, 9)
    k = 1.0 / jnp.sqrt(jnp.float32(H))
    return dict(
        W_ih=jax.random.uniform(ks[0], (4 * H, IN), jnp.float32, -k, k),
        W_hh=jax.random.uniform(ks[1], (4 * H, H), jnp.float32, -k, k),
        b_ih=jax.random.uniform(ks[2], (4 * H,), jnp.float32, -k, k),
        b_hh=jax.random.uniform(ks[3], (4 * H,), jnp.float32, -k, k),
        WF=jax.random.uniform(ks[4], (H + 2, 1), jnp.float32, -0.01, 0.01),
        WI=jax.random.uniform(ks[5], (H + 2, 1), jnp.float32, -0.01, 0.01),
        cI=jax.random.uniform(ks[6], (n_learner_params, 1), jnp.float32, -0.01, 0.01),
        bF=jax.random.uniform(ks[7], (1, 1), jnp.float32, 4.0, 6.0),
        bI=jax.random.uniform(ks[8], (1, 1), jnp.float32, -5.0, -4.0),
    )


def prepare_weights(params):
    """One-time restructuring of the raw PyTorch-style parameters into the
    fused / transposed layouts the kernel consumes (done once, not per step)."""
    W_ih = params['W_ih'].astype(jnp.float32)                      # (4H, IN)
    w_loss = W_ih[:, 0:2]                                          # (4H, 2)
    w_gp = W_ih[:, 2:4]                                            # (4H, 2)
    w_hh = params['W_hh'].astype(jnp.float32)                      # (4H, H)
    b_sum = (params['b_ih'] + params['b_hh']).astype(jnp.float32).reshape(4 * H, 1)

    wfi = jnp.stack([params['WF'][:H, 0], params['WI'][:H, 0]], axis=0).astype(jnp.float32)  # (2, H)

    wf_c, wf_f = params['WF'][H, 0], params['WF'][H + 1, 0]
    wi_c, wi_i = params['WI'][H, 0], params['WI'][H + 1, 0]
    zero = jnp.zeros((), jnp.float32)
    # Coefficients for the packed meta-state rows [f_prev, i_prev, c_prev].
    w_meta = jnp.stack([jnp.stack([wf_f, zero, wf_c]),
                        jnp.stack([zero, wi_i, wi_c])]).astype(jnp.float32)   # (2, 3)
    b_fi = jnp.stack([params['bF'][0, 0], params['bI'][0, 0]]).astype(jnp.float32).reshape(2, 1)

    return dict(w_loss=w_loss, w_gp=w_gp, w_hh=w_hh, b_sum=b_sum,
                wfi=wfi, w_meta=w_meta, b_fi=b_fi,
                cI=params['cI'].astype(jnp.float32))


def meta_learner_forward(prep, loss, grad_prep, grad, hs=None, block_n=2048):
    """Fused MetaLearner step.

    Returns (flat_learner (N,), states) where states use the kernel-native
    transposed layout: ((h (H,N), c (H,N)), (f_next (1,N), i_next (1,N),
    c_next (1,N))).  Pass the returned `states` back in as `hs` for the next
    recurrence step.
    """
    N = grad_prep.shape[0]

    # Pad N to a lane-block multiple.
    Np = _round_up(N, 128)
    if Np <= block_n:
        bn = Np
    else:
        bn = block_n
        Np = _round_up(Np, bn)
    pad = Np - N

    gp = jnp.pad(grad_prep.astype(jnp.float32).T, ((0, 0), (0, pad)))   # (2, Np)
    gr = jnp.pad(grad.astype(jnp.float32).T, ((0, 0), (0, pad)))        # (1, Np)

    if hs is None:
        h0 = jnp.zeros((H, Np), jnp.float32)
        c0 = jnp.zeros((H, Np), jnp.float32)
        meta_prev = jnp.concatenate(
            [jnp.zeros((2, Np), jnp.float32),
             jnp.pad(prep['cI'].T, ((0, 0), (0, pad)))], axis=0)        # (3, Np)
    else:
        (h_in, c_in), (f_in, i_in, cprev_in) = hs
        h0 = jnp.pad(h_in.astype(jnp.float32), ((0, 0), (0, pad)))
        c0 = jnp.pad(c_in.astype(jnp.float32), ((0, 0), (0, pad)))
        meta_prev = jnp.pad(
            jnp.concatenate([f_in, i_in, cprev_in], axis=0).astype(jnp.float32),
            ((0, 0), (0, pad)))

    # Fold the (constant-over-N) loss features into the gate bias: no N x 2
    # broadcast array ever touches HBM.
    bias_eff = prep['b_sum'] + prep['w_loss'] @ loss.astype(jnp.float32).reshape(2, 1)  # (4H, 1)

    grid = (Np // bn,)

    def nmap2(i):    # streamed 2-D blocks along lanes
        return (0, i)

    def nmap3(i):    # streamed 3-D output block
        return (0, 0, i)

    def wmap(i):     # resident weights
        return (0, 0)

    in_specs = [
        pl.BlockSpec((2, bn), nmap2),          # gp
        pl.BlockSpec((H, bn), nmap2),          # h0
        pl.BlockSpec((H, bn), nmap2),          # c0
        pl.BlockSpec((3, bn), nmap2),          # meta_prev
        pl.BlockSpec((1, bn), nmap2),          # grad
        pl.BlockSpec((4 * H, 2), wmap),        # w_gp
        pl.BlockSpec((4 * H, H), wmap),        # w_hh
        pl.BlockSpec((4 * H, 1), wmap),        # bias_eff
        pl.BlockSpec((2, H), wmap),            # wfi
        pl.BlockSpec((2, 3), wmap),            # w_meta
        pl.BlockSpec((2, 1), wmap),            # b_fi
    ]
    out_specs = (
        pl.BlockSpec((2, H, bn), nmap3),       # packed [h_new, c_new]
        pl.BlockSpec((3, bn), nmap2),          # packed [f_next, i_next, c_next]
    )
    out_shapes = (
        jax.ShapeDtypeStruct((2, H, Np), jnp.float32),
        jax.ShapeDtypeStruct((3, Np), jnp.float32),
    )

    hc, meta_next = pl.pallas_call(
        meta_learner_kernel,
        out_shape=out_shapes,
        grid=grid,
        in_specs=in_specs,
        out_specs=out_specs,
        compiler_params=pltpu.CompilerParams(
            dimension_semantics=("parallel",)),
    )(gp, h0, c0, meta_prev, gr,
      prep['w_gp'], prep['w_hh'], bias_eff, prep['wfi'], prep['w_meta'], prep['b_fi'])

    h_new = hc[0, :, :N]                # (H, N)
    c_new = hc[1, :, :N]                # (H, N)
    f_next = meta_next[0:1, :N]         # (1, N)
    i_next = meta_next[1:2, :N]
    c_next = meta_next[2:3, :N]
    flat_learner = meta_next[2, :N]     # (N,)

    return flat_learner, ((h_new, c_new), (f_next, i_next, c_next))


def reference_forward(params, loss, grad_prep, grad, hs=None):
    """Pure-JAX reference replicating the PyTorch forward (PyTorch layout)."""
    N = grad_prep.shape[0]
    x = jnp.concatenate([jnp.broadcast_to(loss, (N, 2)), grad_prep], axis=1)
    if hs is None:
        h0 = jnp.zeros((N, H), jnp.float32)
        c0 = jnp.zeros((N, H), jnp.float32)
        f_prev = jnp.zeros((N, 1), jnp.float32)
        i_prev = jnp.zeros((N, 1), jnp.float32)
        c_prev = params['cI']
    else:
        (h0, c0), (f_prev, i_prev, c_prev) = hs
    gates = x @ params['W_ih'].T + params['b_ih'] + h0 @ params['W_hh'].T + params['b_hh']
    i = jax.nn.sigmoid(gates[:, 0:H])
    f = jax.nn.sigmoid(gates[:, H:2 * H])
    g = jnp.tanh(gates[:, 2 * H:3 * H])
    o = jax.nn.sigmoid(gates[:, 3 * H:4 * H])
    c = f * c0 + i * g
    h = o * jnp.tanh(c)
    f_next = jnp.concatenate([h, c_prev, f_prev], axis=1) @ params['WF'] + params['bF']
    i_next = jnp.concatenate([h, c_prev, i_prev], axis=1) @ params['WI'] + params['bI']
    c_next = jax.nn.sigmoid(f_next) * c_prev - jax.nn.sigmoid(i_next) * grad
    return c_next[:, 0], ((h, c), (f_next, i_next, c_next))


if __name__ == "__main__":
    key = jax.random.PRNGKey(0)
    kp, k1, k2, k3, k4, k5, k6 = jax.random.split(key, 7)

    N = 2560          # n_learner_params (multi-block grid with block_n=1024)
    BLOCK_N = 1024

    params = init_params(kp, N)
    prep = prepare_weights(params)

    def tol_close(a, b):
        return bool(jnp.allclose(a, b, atol=1e-5, rtol=1e-5))

    # ---- step 1 (hs=None path) ----
    loss1 = jax.random.normal(k1, (1, 2), jnp.float32)
    gp1 = jax.random.normal(k2, (N, 2), jnp.float32)
    g1 = jax.random.normal(k3, (N, 1), jnp.float32)

    flat1, st1 = meta_learner_forward(prep, loss1, gp1, g1, hs=None, block_n=BLOCK_N)
    jax.block_until_ready(flat1)

    rflat1, rst1 = reference_forward(params, loss1, gp1, g1, hs=None)
    (h1, c1), (f1, i1, cn1) = st1
    (rh1, rc1), (rf1, ri1, rcn1) = rst1

    assert flat1.shape == (N,)
    assert tol_close(flat1, rflat1), "step1: flat learner mismatch"
    assert tol_close(h1.T, rh1), "step1: lstm h mismatch"
    assert tol_close(c1.T, rc1), "step1: lstm c mismatch"
    assert tol_close(f1.T, rf1), "step1: meta f mismatch"
    assert tol_close(i1.T, ri1), "step1: meta i mismatch"
    assert tol_close(cn1.T, rcn1), "step1: meta c mismatch"

    # ---- step 2 (hs != None path: nonzero f_prev/i_prev exercised) ----
    loss2 = jax.random.normal(k4, (1, 2), jnp.float32)
    gp2 = jax.random.normal(k5, (N, 2), jnp.float32)
    g2 = jax.random.normal(k6, (N, 1), jnp.float32)

    flat2, st2 = meta_learner_forward(prep, loss2, gp2, g2, hs=st1, block_n=BLOCK_N)
    jax.block_until_ready(flat2)

    rflat2, rst2 = reference_forward(params, loss2, gp2, g2, hs=rst1)
    assert tol_close(flat2, rflat2), "step2: flat learner mismatch"
    assert tol_close(st2[0][0].T, rst2[0][0]), "step2: lstm h mismatch"
    assert tol_close(st2[1][2].T, rst2[1][2]), "step2: meta c mismatch"

    print("KERNEL_OK")
</pallas_src>

<mosaic_0001>
module attributes {stable_mosaic.version = 11 : i64} {
  func.func @meta_learner_kernel(%arg0: i32, %arg1: memref<2x1024xf32, #tpu.memory_space<vmem>>, %arg2: memref<20x1024xf32, #tpu.memory_space<vmem>>, %arg3: memref<20x1024xf32, #tpu.memory_space<vmem>>, %arg4: memref<3x1024xf32, #tpu.memory_space<vmem>>, %arg5: memref<1x1024xf32, #tpu.memory_space<vmem>>, %arg6: memref<80x2xf32, #tpu.memory_space<vmem>>, %arg7: memref<80x20xf32, #tpu.memory_space<vmem>>, %arg8: memref<80x1xf32, #tpu.memory_space<vmem>>, %arg9: memref<2x20xf32, #tpu.memory_space<vmem>>, %arg10: memref<2x3xf32, #tpu.memory_space<vmem>>, %arg11: memref<2x1xf32, #tpu.memory_space<vmem>>, %arg12: memref<2x20x1024xf32, #tpu.memory_space<vmem>>, %arg13: memref<3x1024xf32, #tpu.memory_space<vmem>>) attributes {dimension_semantics = [#tpu.dimension_semantics<parallel>], iteration_bounds = array<i64: 3>, scalar_prefetch = 0 : i64, scratch_operands = 0 : i64, tpu.core_type = #tpu.core_type<tc>, window_params = [{transform_indices = @transform_0, window_bounds = array<i64: 2, 1024>}, {transform_indices = @transform_1, window_bounds = array<i64: 20, 1024>}, {transform_indices = @transform_2, window_bounds = array<i64: 20, 1024>}, {transform_indices = @transform_3, window_bounds = array<i64: 3, 1024>}, {transform_indices = @transform_4, window_bounds = array<i64: 1, 1024>}, {pipeline_mode = #tpu.pipeline_mode<synchronous>, transform_indices = @transform_5, window_bounds = array<i64: 80, 2>}, {pipeline_mode = #tpu.pipeline_mode<synchronous>, transform_indices = @transform_6, window_bounds = array<i64: 80, 20>}, {pipeline_mode = #tpu.pipeline_mode<synchronous>, transform_indices = @transform_7, window_bounds = array<i64: 80, 1>}, {pipeline_mode = #tpu.pipeline_mode<synchronous>, transform_indices = @transform_8, window_bounds = array<i64: 2, 20>}, {pipeline_mode = #tpu.pipeline_mode<synchronous>, transform_indices = @transform_9, window_bounds = array<i64: 2, 3>}, {pipeline_mode = #tpu.pipeline_mode<synchronous>, transform_indices = @transform_10, window_bounds = array<i64: 2, 1>}, {transform_indices = @transform_11, window_bounds = array<i64: 2, 20, 1024>}, {transform_indices = @transform_12, window_bounds = array<i64: 3, 1024>}]} {
    %c0 = arith.constant 0 : index
    %c0_0 = arith.constant 0 : index
    %0 = vector.load %arg6[%c0, %c0_0] : memref<80x2xf32, #tpu.memory_space<vmem>>, vector<80x2xf32>
    %c0_1 = arith.constant 0 : index
    %c0_2 = arith.constant 0 : index
    %1 = vector.load %arg1[%c0_1, %c0_2] : memref<2x1024xf32, #tpu.memory_space<vmem>>, vector<2x1024xf32>
    %cst = arith.constant dense<0.000000e+00> : vector<80x1024xf32>
    %2 = tpu.matmul %0, %1, %cst {dimension_numbers = #tpu.dot_dimension_numbers<[1], [0], [0], [1], [0, 0, 1, 1], [], []>} : vector<80x2xf32>, vector<2x1024xf32>, vector<80x1024xf32> -> vector<80x1024xf32>
    %c0_3 = arith.constant 0 : index
    %c0_4 = arith.constant 0 : index
    %3 = vector.load %arg7[%c0_3, %c0_4] : memref<80x20xf32, #tpu.memory_space<vmem>>, vector<80x20xf32>
    %c0_5 = arith.constant 0 : index
    %c0_6 = arith.constant 0 : index
    %4 = vector.load %arg2[%c0_5, %c0_6] : memref<20x1024xf32, #tpu.memory_space<vmem>>, vector<20x1024xf32>
    %cst_7 = arith.constant dense<0.000000e+00> : vector<80x1024xf32>
    %5 = tpu.matmul %3, %4, %cst_7 {dimension_numbers = #tpu.dot_dimension_numbers<[1], [0], [0], [1], [0, 0, 1, 1], [], []>} : vector<80x20xf32>, vector<20x1024xf32>, vector<80x1024xf32> -> vector<80x1024xf32>
    %6 = arith.addf %2, %5 : vector<80x1024xf32>
    %c0_8 = arith.constant 0 : index
    %c0_9 = arith.constant 0 : index
    %7 = vector.load %arg8[%c0_8, %c0_9] : memref<80x1xf32, #tpu.memory_space<vmem>>, vector<80x1xf32>
    %8 = vector.broadcast %7 : vector<80x1xf32> to vector<80x1024xf32>
    %9 = arith.addf %6, %8 : vector<80x1024xf32>
    %10 = vector.extract_strided_slice %9 {offsets = [0, 0], sizes = [20, 1024], strides = [1, 1]} : vector<80x1024xf32> to vector<20x1024xf32>
    %11 = arith.negf %10 : vector<20x1024xf32>
    %12 = math.exp %11 : vector<20x1024xf32>
    %cst_10 = arith.constant 1.000000e+00 : f32
    %13 = vector.broadcast %cst_10 : f32 to vector<20x1024xf32>
    %14 = arith.addf %13, %12 : vector<20x1024xf32>
    %15 = arith.divf %13, %14 : vector<20x1024xf32>
    %16 = vector.extract_strided_slice %9 {offsets = [20, 0], sizes = [20, 1024], strides = [1, 1]} : vector<80x1024xf32> to vector<20x1024xf32>
    %17 = arith.negf %16 : vector<20x1024xf32>
    %18 = math.exp %17 : vector<20x1024xf32>
    %cst_11 = arith.constant 1.000000e+00 : f32
    %19 = vector.broadcast %cst_11 : f32 to vector<20x1024xf32>
    %20 = arith.addf %19, %18 : vector<20x1024xf32>
    %21 = arith.divf %19, %20 : vector<20x1024xf32>
    %22 = vector.extract_strided_slice %9 {offsets = [40, 0], sizes = [20, 1024], strides = [1, 1]} : vector<80x1024xf32> to vector<20x1024xf32>
    %23 = math.tanh %22 : vector<20x1024xf32>
    %24 = vector.extract_strided_slice %9 {offsets = [60, 0], sizes = [20, 1024], strides = [1, 1]} : vector<80x1024xf32> to vector<20x1024xf32>
    %25 = arith.negf %24 : vector<20x1024xf32>
    %26 = math.exp %25 : vector<20x1024xf32>
    %cst_12 = arith.constant 1.000000e+00 : f32
    %27 = vector.broadcast %cst_12 : f32 to vector<20x1024xf32>
    %28 = arith.addf %27, %26 : vector<20x1024xf32>
    %29 = arith.divf %27, %28 : vector<20x1024xf32>
    %c0_13 = arith.constant 0 : index
    %c0_14 = arith.constant 0 : index
    %30 = vector.load %arg3[%c0_13, %c0_14] : memref<20x1024xf32, #tpu.memory_space<vmem>>, vector<20x1024xf32>
    %31 = arith.mulf %21, %30 : vector<20x1024xf32>
    %32 = arith.mulf %15, %23 : vector<20x1024xf32>
    %33 = arith.addf %31, %32 : vector<20x1024xf32>
    %34 = math.tanh %33 : vector<20x1024xf32>
    %35 = arith.mulf %29, %34 : vector<20x1024xf32>
    %c0_15 = arith.constant 0 : index
    %c0_16 = arith.constant 0 : index
    %c0_17 = arith.constant 0 : index
    %36 = vector.load %arg12[%c0_15, %c0_16, %c0_17] : memref<2x20x1024xf32, #tpu.memory_space<vmem>>, vector<1x20x1024xf32>
    %37 = vector.shape_cast %36 : vector<1x20x1024xf32> to vector<20x1024xf32>
    %38 = vector.shape_cast %35 : vector<20x1024xf32> to vector<1x20x1024xf32>
    tpu.vector_store %arg12[%c0_15, %c0_16, %c0_17], %38 {strides = array<i32>} : memref<2x20x1024xf32, #tpu.memory_space<vmem>>, vector<1x20x1024xf32>,
    %c1 = arith.constant 1 : index
    %c0_18 = arith.constant 0 : index
    %c0_19 = arith.constant 0 : index
    %39 = vector.load %arg12[%c1, %c0_18, %c0_19] : memref<2x20x1024xf32, #tpu.memory_space<vmem>>, vector<1x20x1024xf32>
    %40 = vector.shape_cast %39 : vector<1x20x1024xf32> to vector<20x1024xf32>
    %41 = vector.shape_cast %33 : vector<20x1024xf32> to vector<1x20x1024xf32>
    tpu.vector_store %arg12[%c1, %c0_18, %c0_19], %41 {strides = array<i32>} : memref<2x20x1024xf32, #tpu.memory_space<vmem>>, vector<1x20x1024xf32>,
    %c0_20 = arith.constant 0 : index
    %c0_21 = arith.constant 0 : index
    %42 = vector.load %arg4[%c0_20, %c0_21] : memref<3x1024xf32, #tpu.memory_space<vmem>>, vector<3x1024xf32>
    %43 = vector.extract_strided_slice %42 {offsets = [2, 0], sizes = [1, 1024], strides = [1, 1]} : vector<3x1024xf32> to vector<1x1024xf32>
    %c0_22 = arith.constant 0 : index
    %c0_23 = arith.constant 0 : index
    %44 = vector.load %arg9[%c0_22, %c0_23] : memref<2x20xf32, #tpu.memory_space<vmem>>, vector<2x20xf32>
    %cst_24 = arith.constant dense<0.000000e+00> : vector<2x1024xf32>
    %45 = tpu.matmul %44, %35, %cst_24 {dimension_numbers = #tpu.dot_dimension_numbers<[1], [0], [0], [1], [0, 0, 1, 1], [], []>} : vector<2x20xf32>, vector<20x1024xf32>, vector<2x1024xf32> -> vector<2x1024xf32>
    %c0_25 = arith.constant 0 : index
    %c0_26 = arith.constant 0 : index
    %46 = vector.load %arg10[%c0_25, %c0_26] : memref<2x3xf32, #tpu.memory_space<vmem>>, vector<2x3xf32>
    %cst_27 = arith.constant dense<0.000000e+00> : vector<2x1024xf32>
    %47 = tpu.matmul %46, %42, %cst_27 {dimension_numbers = #tpu.dot_dimension_numbers<[1], [0], [0], [1], [0, 0, 1, 1], [], []>} : vector<2x3xf32>, vector<3x1024xf32>, vector<2x1024xf32> -> vector<2x1024xf32>
    %48 = arith.addf %45, %47 : vector<2x1024xf32>
    %c0_28 = arith.constant 0 : index
    %c0_29 = arith.constant 0 : index
    %49 = vector.load %arg11[%c0_28, %c0_29] : memref<2x1xf32, #tpu.memory_space<vmem>>, vector<2x1xf32>
    %50 = vector.broadcast %49 : vector<2x1xf32> to vector<2x1024xf32>
    %51 = arith.addf %48, %50 : vector<2x1024xf32>
    %52 = vector.extract_strided_slice %51 {offsets = [0, 0], sizes = [1, 1024], strides = [1, 1]} : vector<2x1024xf32> to vector<1x1024xf32>
    %53 = vector.extract_strided_slice %51 {offsets = [1, 0], sizes = [1, 1024], strides = [1, 1]} : vector<2x1024xf32> to vector<1x1024xf32>
    %54 = arith.negf %52 : vector<1x1024xf32>
    %55 = math.exp %54 : vector<1x1024xf32>
    %cst_30 = arith.constant 1.000000e+00 : f32
    %56 = vector.broadcast %cst_30 : f32 to vector<1x1024xf32>
    %57 = arith.addf %56, %55 : vector<1x1024xf32>
    %58 = arith.divf %56, %57 : vector<1x1024xf32>
    %59 = arith.mulf %58, %43 : vector<1x1024xf32>
    %60 = arith.negf %53 : vector<1x1024xf32>
    %61 = math.exp %60 : vector<1x1024xf32>
    %cst_31 = arith.constant 1.000000e+00 : f32
    %62 = vector.broadcast %cst_31 : f32 to vector<1x1024xf32>
    %63 = arith.addf %62, %61 : vector<1x1024xf32>
    %64 = arith.divf %62, %63 : vector<1x1024xf32>
    %c0_32 = arith.constant 0 : index
    %c0_33 = arith.constant 0 : index
    %65 = vector.load %arg5[%c0_32, %c0_33] : memref<1x1024xf32, #tpu.memory_space<vmem>>, vector<1x1024xf32>
    %66 = arith.mulf %64, %65 : vector<1x1024xf32>
    %67 = arith.subf %59, %66 : vector<1x1024xf32>
    %68 = tpu.concatenate %52, %53, %67 in 0 : vector<1x1024xf32>, vector<1x1024xf32>, vector<1x1024xf32> -> vector<3x1024xf32>
    %c0_34 = arith.constant 0 : index
    %c0_35 = arith.constant 0 : index
    %69 = vector.load %arg13[%c0_34, %c0_35] : memref<3x1024xf32, #tpu.memory_space<vmem>>, vector<3x1024xf32>
    tpu.vector_store %arg13[%c0_34, %c0_35], %68 {strides = array<i32>} : memref<3x1024xf32, #tpu.memory_space<vmem>>, vector<3x1024xf32>,
    return
  }
  func.func @transform_0(%arg0: i32) -> (i32, i32) {
    %c0_i32 = arith.constant 0 : i32
    %c0_i32_0 = arith.constant 0 : i32
    return %c0_i32, %arg0 : i32, i32
  }
  func.func @transform_1(%arg0: i32) -> (i32, i32) {
    %c0_i32 = arith.constant 0 : i32
    %c0_i32_0 = arith.constant 0 : i32
    return %c0_i32, %arg0 : i32, i32
  }
  func.func @transform_2(%arg0: i32) -> (i32, i32) {
    %c0_i32 = arith.constant 0 : i32
    %c0_i32_0 = arith.constant 0 : i32
    return %c0_i32, %arg0 : i32, i32
  }
  func.func @transform_3(%arg0: i32) -> (i32, i32) {
    %c0_i32 = arith.constant 0 : i32
    %c0_i32_0 = arith.constant 0 : i32
    return %c0_i32, %arg0 : i32, i32
  }
  func.func @transform_4(%arg0: i32) -> (i32, i32) {
    %c0_i32 = arith.constant 0 : i32
    %c0_i32_0 = arith.constant 0 : i32
    return %c0_i32, %arg0 : i32, i32
  }
  func.func @transform_5(%arg0: i32) -> (i32, i32) {
    %c0_i32 = arith.constant 0 : i32
    %c0_i32_0 = arith.constant 0 : i32
    %c0_i32_1 = arith.constant 0 : i32
    return %c0_i32, %c0_i32_0 : i32, i32
  }
  func.func @transform_6(%arg0: i32) -> (i32, i32) {
    %c0_i32 = arith.constant 0 : i32
    %c0_i32_0 = arith.constant 0 : i32
    %c0_i32_1 = arith.constant 0 : i32
    return %c0_i32, %c0_i32_0 : i32, i32
  }
  func.func @transform_7(%arg0: i32) -> (i32, i32) {
    %c0_i32 = arith.constant 0 : i32
    %c0_i32_0 = arith.constant 0 : i32
    %c0_i32_1 = arith.constant 0 : i32
    return %c0_i32, %c0_i32_0 : i32, i32
  }
  func.func @transform_8(%arg0: i32) -> (i32, i32) {
    %c0_i32 = arith.constant 0 : i32
    %c0_i32_0 = arith.constant 0 : i32
    %c0_i32_1 = arith.constant 0 : i32
    return %c0_i32, %c0_i32_0 : i32, i32
  }
  func.func @transform_9(%arg0: i32) -> (i32, i32) {
    %c0_i32 = arith.constant 0 : i32
    %c0_i32_0 = arith.constant 0 : i32
    %c0_i32_1 = arith.constant 0 : i32
    return %c0_i32, %c0_i32_0 : i32, i32
  }
  func.func @transform_10(%arg0: i32) -> (i32, i32) {
    %c0_i32 = arith.constant 0 : i32
    %c0_i32_0 = arith.constant 0 : i32
    %c0_i32_1 = arith.constant 0 : i32
    return %c0_i32, %c0_i32_0 : i32, i32
  }
  func.func @transform_11(%arg0: i32) -> (i32, i32, i32) {
    %c0_i32 = arith.constant 0 : i32
    %c0_i32_0 = arith.constant 0 : i32
    %c0_i32_1 = arith.constant 0 : i32
    return %c0_i32, %c0_i32_0, %arg0 : i32, i32, i32
  }
  func.func @transform_12(%arg0: i32) -> (i32, i32) {
    %c0_i32 = arith.constant 0 : i32
    %c0_i32_0 = arith.constant 0 : i32
    return %c0_i32, %arg0 : i32, i32
  }
}

</mosaic_0001>

<bundles_post_ra>
// kernel: tpu_custom_call.1
= control target key start
LH: loop header
LB: loop body
LE: loop exit
PB: predicated region body
PF: predicated region fallthrough
CT: control target
= control target key end

     0   :  { %s6982_s0 = inlined_call_operand.vmem [shape: f32[2,3072], index: 0, kind: input, shape index: {}]   ;;  %s6983_s1 = inlined_call_operand.hbm [shape: f32[20,3072], index: 1, kind: input, shape index: {}]   ;;  %s6984_s2 = inlined_call_operand.hbm [shape: f32[20,3072], index: 2, kind: input, shape index: {}]   ;;  %s6985_s3 = inlined_call_operand.vmem [shape: f32[3,3072], index: 3, kind: input, shape index: {}]   ;;  %s6986_s4 = inlined_call_operand.vmem [shape: f32[1,3072], index: 4, kind: input, shape index: {}]   ;;  %s6987_s5 = inlined_call_operand.vmem [shape: f32[80,2], index: 5, kind: input, shape index: {}]   ;;  %s6988_s6 = inlined_call_operand.vmem [shape: f32[80,20], index: 6, kind: input, shape index: {}]   ;;  %s6989_s7 = inlined_call_operand.vmem [shape: f32[80,1], index: 7, kind: input, shape index: {}]   ;;  %s6990_s8 = inlined_call_operand.vmem [shape: f32[2,20], index: 8, kind: input, shape index: {}]   ;;  %s6991_s9 = inlined_call_operand.vmem [shape: f32[2,3], index: 9, kind: input, shape index: {}]   ;;  %s6992_s10 = inlined_call_operand.vmem [shape: f32[2,1], index: 10, kind: input, shape index: {}]   ;;  %s6993_s11 = inlined_call_operand.vmem [shape: f32[2,20,3072], index: 11, kind: output, shape index: {0}]   ;;  %s6994_s12 = inlined_call_operand.hbm [shape: f32[3,3072], index: 12, kind: output, shape index: {1}]  }
   0x1   :  { %7045 = sst [smem:[#allocation86_spill]] %s6983_s1 }
   0x2   :  { %7046 = sst [smem:[#allocation87_spill]] %s6993_s11 }
   0x3   :  { %7047 = sst [smem:[#allocation88_spill]] %s6994_s12 }
   0x4   :  { %18 = vsyncpa [#allocation3], 0 }
   0x5   :  { %20 = vsyncpa [#allocation3 + $0x1], 0 }
   0x6   :  { %21 = vsyncpa [#allocation6], 0 }
   0x7   :  { %23 = vsyncpa [#allocation6 + $0x1], 0 }
   0x8   :  { %24 = vsyncpa [#allocation4], 0 }
   0x9   :  { %26 = vsyncpa [#allocation4 + $0x1], 0  ;;  %s4879_s21 = smov 0   ;;  %s4881_s22 = smov 0  }
   0xa   :  { %s4883_s23 = smov 0   ;;  %s4885_s24 = smov 0  }
   0xb LB: > { %7048 = sst [smem:[#allocation12_spill]] %s4791_s21  ;;  %s4900_s25 = sadd.s32 4294967295, %s4803_s24   ;;  %s4803_s24 = sphi %s4885_s24, %s7281_s24   ;;  %s4799_s23 = sphi %s4883_s23, %s7283_s23   ;;  %s4795_s22 = sphi %s4881_s22, %s7285_s22   ;;  %s4791_s21 = sphi %s4879_s21, %s7284_s21  }
   0xc   : > { %7049 = sst [smem:[#allocation13_spill]] %s4799_s23  ;;  %s3981_s26 = sadd.s32 4294967294, %s4803_s24  }
   0xd   : > { %s4904_s27 = sadd.s32 1, %s4803_s24   ;;  %s65_s28 = sadd.s32 1, %s4799_s23 }
   0xe   : > { %7050 = sst [smem:[#allocation14_spill]] %s4904_s27  ;;  %s62_s29 = ssub.s32 %s4803_s24, %s4904_s27 }
   0xf   : > { %p72_p0 = scmp.ne.s32.totalorder %s4799_s23, %s4795_s22  ;;  %p63_p1 = scmp.eq.s32.totalorder %s62_s29, 0 }
  0x10   : > { %p73_p2 = scmp.eq.s32.totalorder %s4803_s24, 0  ;;  %p78_p3 = scmp.ne.s32.totalorder %s4795_s22, %s4791_s21 }
  0x11   : > { %p79_p4 = scmp.eq.s32.totalorder %s4900_s25, 0  ;;  %p306_p7 = scmp.eq.s32.totalorder %s4900_s25, 2 }
  0x12   : > { %s4916_s30 = scalar_select %p63_p1, %s4799_s23, %s65_s28  }
  0x13   : > { %p74_p5 = por %p73_p2, %p72_p0  ;;  %p4918_p6 = por %p79_p4, %p78_p3 }
  0x14   : > { %7051 = sst [smem:[#allocation15_spill]] %s4916_s30  ;;  %p338_p8 = scmp.eq.s32.totalorder %s3981_s26, 2 }
  0x15   : > { %s7052_s13 = scalar_select %p4918_p6, 1, 0 }
  0x16   : > { %p4243_p9 = scmp.lt.s32.totalorder %s4803_s24, 3  ;;  %p4924_p10 = por %p306_p7, %p72_p0 }
  0x17   : > { %p4928_p11 = por %p338_p8, %p78_p3  ;;  %s4933_s16 = sand.u32 1, %s4799_s23  }
  0x18   : > { %s7053_s14 = scalar_select %p4924_p10, 1, 0 }
  0x19   : > { %s7054_s15 = scalar_select %p4928_p11, 1, 0 }
  0x1a   : > { %s6998_s17 = sshll.u32 %s4803_s24, 10  ;;  %s7001_s18 = smul.u32 192, %s4933_s16 }
  0x1b   : > { %7055 = sst [smem:[#allocation16_spill]] %s7054_s15  ;;  %p4944_p12 = pnand %p4243_p9, %p74_p5 }
  0x1c   : > { %s7056_s1 = sld [smem:[#allocation86_spill]]  ;;  %s389_s29 = scalar_lea.vmem [#allocation2], %s7001_s18 }
  0x1d   : > { %s396_s30 = sshll.u32 %s389_s29, 4  ;;  %s386_s23 = scalar_lea.sflag [#allocation3], %s4933_s16  ;;  %s4950_s30 = int_to_ptr.vmem [resolvable:$true] %s396_s30 }
  0x1e   : > { %p4681_p1 = pneg %p4944_p12 }
  0x22   : > { %s4942_s26 = scalar_lea.hbm %s7056_s1, %s6998_s17  ;;  %s4684_s17 = scalar_lea.hbm %s7056_s1, 9216 }
  0x23   : > { %s4679_s27 = scalar_lea.hbm %s4942_s26, 3072  ;;  %p4685_p4 = scmp.lt.s32.totalorder %s4942_s26, %s7056_s1 }
  0x24   : > { %p4680_p0 = scmp.ne.s32.totalorder %s4942_s26, %s4679_s27  ;;  %p4686_p5 = scmp.lt.s32.totalorder %s4684_s17, %s4679_s27 }
  0x26   : > { %p4682_p2 = pnand %p4681_p1, %p4680_p0  ;;  %p4687_p7 = por %p4686_p5, %p4685_p4 }
  0x28   : > { %p4683_p3 = pneg %p4682_p2 }
  0x2a   : > { %p4688_p8 = pnand %p4687_p7, %p4683_p3 }
  0x2c   : > { %4691 = shalt.err (!%p4688_p8)
}
  0x2d   : > { %s4692_s29 = scalar_lea.vmem %s4950_s30, 3072  ;;  %s4805_s19 = smov [#allocation2]  }
  0x2e   : > { %p4693_p9 = scmp.ne.s32.totalorder %s4950_s30, %s4692_s29  ;;  %s4697_s20 = sshll.u32 %s4805_s19, 4  ;;  %s4698_s20 = int_to_ptr.vmem [resolvable:$false] %s4697_s20 }
  0x2f   : > { %s4699_s18 = scalar_lea.vmem %s4698_s20, 6144  ;;  %p4700_p13 = scmp.lt.s32.totalorder %s4950_s30, %s4698_s20 }
  0x30   : > { %p4695_p0 = pnand %p4693_p9, %p4681_p1  ;;  %p4701_p11 = scmp.lt.s32.totalorder %s4699_s18, %s4692_s29 }
  0x32   : > { %p4696_p2 = pneg %p4695_p0  ;;  %p4702_p10 = por %p4701_p11, %p4700_p13 }
  0x34   : > { %p4703_p4 = pnand %p4702_p10, %p4696_p2 }
  0x36   : > { %4706 = shalt.err (!%p4703_p4)
}
  0x37   : > { %s7004_s21 = smov 3072   ;;  %s4807_s27 = smov 1024  }
  0x38   : > { %s4808_s15 = smov 64   ;;  %p442_p10 = scmp.lt.s32.totalorder %s4803_s24, 4 }
  0x39   : > { %4235 = dma.hbm_to_vmem [thread:$0]  (!%p4944_p12), %s4942_s26, 3072, %s4950_s30, %s386_s23, %s7004_s21, %s4807_s27, %s4808_s15  }
  0x3a   : > { %s7058_s17 = sshll.u32 %s4803_s24, 10  ;;  %p7059_p11 = scmp.ge.s32.totalorder %s4803_s24, 1 }
  0x3b   : > { %s4989_s19 = scalar_lea.hbm %s6984_s2, %s7058_s17  ;;  %s7061_s1 = smul.u32 192, %s4933_s16 }
  0x3c   : > { %p4993_p13 = pnand %p7059_p11, %p442_p10  ;;  %s407_s23 = scalar_lea.sflag [#allocation6], %s4933_s16 }
  0x3d   : > { %s410_s12 = scalar_lea.vmem [#allocation5], %s7061_s1  ;;  %s4707_s30 = scalar_lea.hbm %s4989_s19, 3072 }
  0x3e   : > { %s417_s11 = sshll.u32 %s410_s12, 4  ;;  %p4708_p3 = scmp.ne.s32.totalorder %s4989_s19, %s4707_s30  ;;  %s4999_s11 = int_to_ptr.vmem [resolvable:$true] %s417_s11 }
  0x3f   : > { %s4712_s18 = scalar_lea.hbm %s6984_s2, 9216  ;;  %p4713_p8 = scmp.lt.s32.totalorder %s4989_s19, %s6984_s2 }
  0x40   : > { %p4710_p5 = pnand %p4708_p3, %p4681_p1  ;;  %p4714_p9 = scmp.lt.s32.totalorder %s4712_s18, %s4707_s30 }
  0x42   : > { %p4711_p7 = pneg %p4710_p5  ;;  %p4715_p0 = por %p4714_p9, %p4713_p8 }
  0x44   : > { %p4716_p2 = pnand %p4715_p0, %p4711_p7 }
  0x46   : > { %4719 = shalt.err (!%p4716_p2)
}
  0x47   : > { %s4720_s1 = scalar_lea.vmem %s4999_s11, 3072  ;;  %s4809_s12 = smov [#allocation5]  }
  0x48   : > { %p4721_p4 = scmp.ne.s32.totalorder %s4999_s11, %s4720_s1  ;;  %s4725_s16 = sshll.u32 %s4809_s12, 4  ;;  %s4726_s16 = int_to_ptr.vmem [resolvable:$false] %s4725_s16 }
  0x49   : > { %s4727_s26 = scalar_lea.vmem %s4726_s16, 6144  ;;  %p4728_p3 = scmp.lt.s32.totalorder %s4999_s11, %s4726_s16 }
  0x4a   : > { %p4723_p10 = pnand %p4721_p4, %p4681_p1  ;;  %p4729_p5 = scmp.lt.s32.totalorder %s4727_s26, %s4720_s1 }
  0x4c   : > { %p4724_p11 = pneg %p4723_p10  ;;  %p4730_p6 = por %p4729_p5, %p4728_p3 }
  0x4e   : > { %p4731_p8 = pnand %p4730_p6, %p4724_p11 }
  0x50   : > { %4734 = shalt.err (!%p4731_p8)
}
  0x51   : > { %s7062_s21 = smov 3072   ;;  %446 = sbr.rel (%p4993_p13) target bundleno = 861 (0x35d), region = 64 }
  0x52   : > { %4238 = dma.hbm_to_vmem [thread:$0]  (!%p4944_p12), %s4989_s19, 3072, %s4999_s11, %s407_s23, %s7062_s21, %s4807_s27, %s4808_s15  }
  0x56   : > { %s5030_s30 = sand.u32 1, %s4795_s22   ;;  %p7063_p6 = scmp.ne.s32.totalorder %s7052_s13, 0 }
  0x57   : > { %s4224_s17 = smul.u32 192, %s5030_s30  ;;  %s449_s18 = scalar_lea.sflag [#allocation3], %s5030_s30 }
  0x59   : > { %s5034_s29 = scalar_lea.vmem [#allocation2], %s4224_s17 }
  0x5a   : > { %4778 = dma.done.wait (%p7063_p6), %s449_s18, 3072  }
  0x5b   : > { %4780 = vsyncadd (%p7063_p6), %s449_s18, 4294964224  ;;  %s458_s11 = scalar_lea.sflag [#allocation6], %s5030_s30  ;;  %s5041_s28 = scalar_lea.vmem [#allocation5], %s4224_s17 }
  0x5c   : > { %4782 = dma.done.wait (%p7063_p6), %s458_s11, 3072  }
  0x5d   : > { %4784 = vsyncadd (%p7063_p6), %s458_s11, 4294964224  ;;  %v7006_v0 = vmov 0.0   ;;  %s3990_s27 = sshll.u32 %s4900_s25, 3  ;;  %vm623_vm0 = vcmask 1043456   ;;  %v585_v1 = vld [vmem:[%s5034_s29 + $0x88] sm:$0xf]  ;;  %v1154_v9 = vlaneseq }
  0x5e   : > { %712 = vmatprep.mubr.f32.mxu0 %v7006_v0  ;;  %837 = vmatprep.mubr.f32.mxu1 %v7006_v0  ;;  %p526_p12 = scmp.lt.s32.totalorder %s3990_s27, 23  ;;  %v587_v2 = vld [vmem:[%s5034_s29 + $0x98] sm:$0xf]  ;;  %v584_v3 = vld [vmem:[%s5034_s29 + $0x80] sm:$0xf]  ;;  %v577_v5 = vld [vmem:[%s5034_s29 + $0x48] sm:$0xff] }
  0x5f   : > { %3995 = vmatprep.subr.msk.mxu0 %vm623_vm0, %v585_v1  ;;  %4007 = vmatprep.subr.msk.mxu1 %vm623_vm0, %v587_v2  ;;  %v586_v4 = vld [vmem:[%s5034_s29 + $0x90] sm:$0xf]  ;;  %v579_v6 = vld [vmem:[%s5034_s29 + $0x58] sm:$0xff]  ;;  %v4811_v7 = vmov 1983009808   ;;  %v576_v10 = vld [vmem:[%s5034_s29 + $0x40] sm:$0xff] }
  0x60   : > { %s7287_s27 = smov (!%p526_p12, %s3990_s27), 23  ;;  %v1152_v8 = vunpack.c.l.s4 %v4811_v7  ;;  %3996 = vmatpush1.msk.msra.mxu0 %vm623_vm0, %v584_v3  ;;  %4008 = vmatpush1.msk.msra.mxu1 %vm623_vm0, %v586_v4  ;;  %v578_v11 = vld [vmem:[%s5034_s29 + $0x50] sm:$0xff]  ;;  %v569_v12 = vld [vmem:[%s5034_s29 + $0x8] sm:$0xff]  ;;  %v571_v13 = vld [vmem:[%s5034_s29 + $0x18] sm:$0xff]  ;;  %vm592_vm1 = vcmask 162816   ;;  %v5076_v20 = vshrl.u32 %v1154_v9, 7 }
  0x61   : > { %676 = vmatprep.subr.mxu0 %v577_v5  ;;  %801 = vmatprep.subr.mxu1 %v579_v6  ;;  %v568_v14 = vld [vmem:[%s5034_s29] sm:$0xff]  ;;  %v570_v15 = vld [vmem:[%s5034_s29 + $0x10] sm:$0xff]  ;;  %v589_v17 = vld [vmem:[%s5034_s29 + $0xa8] sm:$0xf]  ;;  %s3991_s19 = sshll.u32 %s7287_s27, 1  ;;  %vm1215_vm2 = vcmask 1041408   ;;  %s542_s26 = scalar_lea.vmem %s6986_s4, %s7287_s27 }
  0x62   : > { %677 = vmatpush1.msra.mxu0 %v576_v10  ;;  %802 = vmatpush1.msra.mxu1 %v578_v11  ;;  %v5071_v16 = vld [vmem:[%s6988_s6] sm:$0xff]  ;;  %v591_v18 = vld [vmem:[%s5034_s29 + $0xb8] sm:$0xf]  ;;  %v1153_v19 = vunpack.c.0.s8 %v1152_v8  ;;  %7064 = vst [vmem:[#allocation17_spill] sm:$0xff] %v5076_v20  ;;  %v590_v22 = vld [vmem:[%s5034_s29 + $0xb0] sm:$0xf]  ;;  %s5094_s16 = scalar_lea.vmem %s6982_s0, %s3991_s19 }
  0x63   : > { %678 = vmatprep.subr.mxu0 %v569_v12  ;;  %803 = vmatprep.subr.mxu1 %v571_v13  ;;  %v588_v21 = vld [vmem:[%s5034_s29 + $0xa0] sm:$0xf]  ;;  %v5089_v23 = vld [vmem:[%s6988_s6 + $0x8] sm:$0xff]  ;;  %v583_v26 = vld [vmem:[%s5034_s29 + $0x78] sm:$0xff]  ;;  %v4812_v45 = vmov 0   ;;  %vm1184_vm3 = vcmask 15360  }
  0x64   : > { %679 = vmatpush1.msra.mxu0 %v568_v14  ;;  %804 = vmatpush1.msra.mxu1 %v570_v15  ;;  %v5099_v24 = vsub.s32 %v1153_v19, %v5076_v20  ;;  %v581_v25 = vld [vmem:[%s5034_s29 + $0x68] sm:$0xff]  ;;  %v580_v27 = vld [vmem:[%s5034_s29 + $0x60] sm:$0xff]  ;;  %v582_v28 = vld [vmem:[%s5034_s29 + $0x70] sm:$0xff]  ;;  %s3993_s18 = sshll.u32 %s7287_s27, 2  ;;  %vm2843_vm4 = vcmask 1042432   ;;  %vm2839_vm5 = vcmask 23552  }
  0x65   : > { %3997 = vmatmul.mubr.msk.f32.vlgmr.msra.gmra.mxu0 %vm592_vm1, %v5071_v16  ;;  %4009 = vmatmul.mubr.msk.f32.vlgmr.msra.gmra.mxu1 %vm592_vm1, %v5071_v16  ;;  %v556_v29 = vld [vmem:[%s5094_s16] sm:$0xff]  ;;  %v5117_v30 = vld [vmem:[%s6988_s6 + $0x10] sm:$0xff]  ;;  %v573_v33 = vld [vmem:[%s5034_s29 + $0x28] sm:$0xff]  ;;  %s6159_s13 = scalar_lea.vmem %s6985_s3, %s3993_s18  ;;  %s4225_s19 = smul.u32 384, %s5030_s30 }
  0x66   : > { %4019 = vmatprep.subr.msk.mxu0 %vm623_vm0, %v589_v17  ;;  %4031 = vmatprep.subr.msk.mxu1 %vm623_vm0, %v591_v18  ;;  %v1150_v31 = vcombine.high %v556_v29, %v556_v29  ;;  %v5120_v32 = vrot.slane %v556_v29, %v5099_v24  ;;  %v575_v34 = vld [vmem:[%s5034_s29 + $0x38] sm:$0xff]  ;;  %v572_v36 = vld [vmem:[%s5034_s29 + $0x20] sm:$0xff]  ;;  %v574_v37 = vld [vmem:[%s5034_s29 + $0x30] sm:$0xff]  ;;  %s3989_s27 = sshll.u32 %s5030_s30, 5  ;;  %s3696_s17 = scalar_lea.sflag [#allocation4], %s5030_s30 }
  0x67   : > { %4020 = vmatpush1.msk.msra.mxu0 %vm623_vm0, %v588_v21  ;;  %4032 = vmatpush1.msk.msra.mxu1 %vm623_vm0, %v590_v22  ;;  %v5138_v38 = vld [vmem:[%s6988_s6 + $0x18] sm:$0xff]  ;;  %v5153_v41 = vld [vmem:[%s6988_s6 + $0x20] sm:$0xff]  ;;  %v5166_v42 = vld [vmem:[%s6988_s6 + $0x28] sm:$0xff]  ;;  %s6823_s21 = scalar_lea.vmem [#allocation8], %s3989_s27  ;;  %p7274_p1 = scmp.ne.s32.totalorder %s7053_s14, 0 }
  0x68   : > { %718 = vmatprep.mubr.f32.mxu0 %v7006_v0  ;;  %843 = vmatprep.mubr.f32.mxu1 %v7006_v0  ;;  %v5125_v35 = vrot.slane %v1150_v31, %v5099_v24  ;;  %v1165_v39 = vcombine.high %v5120_v32, %v5120_v32  ;;  %v1732_v43 = vld [vmem:[%s6989_s7] sm:$0xff]  ;;  %v5180_v44 = vld [vmem:[%s6988_s6 + $0x30] sm:$0xff]  ;;  %v1733_v46 = vld [vmem:[%s6989_s7 + $0x8] sm:$0xff]  ;;  %s4220_s18 = sshll.u32 (%p7274_p1), %s4900_s25, 6 }
  0x69   : > { %3998 = vmatmul.mubr.msk.f32.gmra.mxu0 %vm592_vm1, %v5089_v23  ;;  %4010 = vmatmul.mubr.msk.f32.gmra.mxu1 %vm592_vm1, %v5089_v23  ;;  %v5194_v47 = vld [vmem:[%s6988_s6 + $0x38] sm:$0xff]  ;;  %v557_v48 = vld [vmem:[%s5094_s16 + $0x8] sm:$0xff]  ;;  %v1734_v49 = vld [vmem:[%s6989_s7 + $0x10] sm:$0xff]  ;;  %s6363_s16 = scalar_lea.vmem [#allocation7], %s4225_s19 }
  0x6a   : > { %724 = vmatprep.mubr.f32.mxu0 %v7006_v0  ;;  %849 = vmatprep.mubr.f32.mxu1 %v7006_v0  ;;  %v1166_v40 = vcombine.high %v5125_v35, %v5125_v35  ;;  %v1736_v50 = vld [vmem:[%s6989_s7 + $0x20] sm:$0xff]  ;;  %v1167_v52 = vcombine.high %v557_v48, %v557_v48  ;;  %v1735_v53 = vld [vmem:[%s6989_s7 + $0x18] sm:$0xff]  ;;  %v1738_v54 = vld [vmem:[%s6989_s7 + $0x30] sm:$0xff]  ;;  %v5230_v56 = vrot.slane %v557_v48, %v5099_v24 }
  0x6b   : > { %926 = vmatprep.subr.mxu0 %v581_v25  ;;  %1051 = vmatprep.subr.mxu1 %v583_v26  ;;  %v5212_v51 = vld [vmem:[%s6988_s6 + $0x40] sm:$0xff]  ;;  %v567_v55 = vld [vmem:[%s6988_s6 + $0x48] sm:$0xff]  ;;  %v1739_v59 = vld [vmem:[%s6989_s7 + $0x38] sm:$0xff] }
  0x6c   : > { %927 = vmatpush1.msra.mxu0 %v580_v27  ;;  %1052 = vmatpush1.msra.mxu1 %v582_v28  ;;  %v5233_v57 = vrot.slane %v1167_v52, %v5099_v24  ;;  %v1737_v58 = vld [vmem:[%s6989_s7 + $0x28] sm:$0xff]  ;;  %v1182_v60 = vcombine.high %v5230_v56, %v5230_v56  ;;  %v1740_v62 = vld [vmem:[%s6989_s7 + $0x40] sm:$0xff]  ;;  %v548_v4 = vld [vmem:[%s6987_s5 + $0x10] sm:$0xff] }
  0x6d   : > { %3999 = vmatmul.mubr.msk.f32.gmra.mxu0 %vm592_vm1, %v5117_v30  ;;  %4011 = vmatmul.mubr.msk.f32.gmra.mxu1 %vm592_vm1, %v5117_v30  ;;  %v1741_v63 = vld [vmem:[%s6989_s7 + $0x48] sm:$0xff]  ;;  %v3447_v1 = vld [vmem:[%s6992_s10] sm:$0x3]  ;;  %v549_v5 = vld [vmem:[%s6987_s5 + $0x18] sm:$0xff] }
  0x6e   : > { %730 = vmatprep.mubr.f32.mxu0 %v7006_v0  ;;  %855 = vmatprep.mubr.f32.mxu1 %v7006_v0  ;;  %v1183_v61 = vcombine.high %v5233_v57, %v5233_v57  ;;  %v546_v2 = vld [vmem:[%s6987_s5] sm:$0xff]  ;;  %v547_v3 = vld [vmem:[%s6987_s5 + $0x8] sm:$0xff]  ;;  %v552_v8 = vld [vmem:[%s6987_s5 + $0x30] sm:$0xff] }
  0x6f   : > { %928 = vmatprep.subr.mxu0 %v573_v33  ;;  %1053 = vmatprep.subr.mxu1 %v575_v34  ;;  %v550_v6 = vld [vmem:[%s6987_s5 + $0x20] sm:$0xff]  ;;  %v551_v7 = vld [vmem:[%s6987_s5 + $0x28] sm:$0xff]  ;;  %v553_v9 = vld [vmem:[%s6987_s5 + $0x38] sm:$0xff] }
  0x70   : > { %929 = vmatpush1.msra.mxu0 %v572_v36  ;;  %1054 = vmatpush1.msra.mxu1 %v574_v37  ;;  %v554_v10 = vld [vmem:[%s6987_s5 + $0x40] sm:$0xff]  ;;  %v555_v11 = vld [vmem:[%s6987_s5 + $0x48] sm:$0xff] }
  0x71   : > { %4000 = vmatmul.mubr.msk.f32.gmra.mxu0 %vm592_vm1, %v5138_v38  ;;  %4012 = vmatmul.mubr.msk.f32.gmra.mxu1 %vm592_vm1, %v5138_v38 }
  0x72   : > { %736 = vmatprep.mubr.f32.mxu0 %v7006_v0  ;;  %861 = vmatprep.mubr.f32.mxu1 %v7006_v0 }
  0x73   : > { %4043 = vmatprep.subr.msk.mxu0 %vm1215_vm2, %v1165_v39  ;;  %4055 = vmatprep.subr.msk.mxu1 %vm1215_vm2, %v1166_v40 }
  0x74   : > { %4284 = vset.pattern.permute.xlu1 %v4812_v45  ;;  %4283 = vset.pattern.permute.xlu0 %v4812_v45 }
  0x75   : > { %4001 = vmatmul.mubr.msk.f32.gmra.mxu0 %vm592_vm1, %v5153_v41  ;;  %4013 = vmatmul.mubr.msk.f32.gmra.mxu1 %vm592_vm1, %v5153_v41 }
  0x76   : > { %742 = vmatprep.mubr.f32.mxu0 %v7006_v0  ;;  %867 = vmatprep.mubr.f32.mxu1 %v7006_v0 }
  0x77   : > { %1744 = vperm.xlu1 %4284, %v1732_v43   ;;  %1749 = vperm.xlu0 %4283, %v1733_v46  }
  0x79   : > { %4002 = vmatmul.mubr.msk.f32.gmra.mxu0 %vm592_vm1, %v5166_v42  ;;  %4014 = vmatmul.mubr.msk.f32.gmra.mxu1 %vm592_vm1, %v5166_v42 }
  0x7a   : > { %748 = vmatprep.mubr.f32.mxu0 %v7006_v0  ;;  %873 = vmatprep.mubr.f32.mxu1 %v7006_v0 }
  0x7b   : > { %1754 = vperm.xlu0 %4283, %v1734_v49   ;;  %1764 = vperm.xlu1 %4284, %v1736_v50  }
  0x7d   : > { %4003 = vmatmul.mubr.msk.f32.gmra.mxu0 %vm592_vm1, %v5180_v44  ;;  %4015 = vmatmul.mubr.msk.f32.gmra.mxu1 %vm592_vm1, %v5180_v44 }
  0x7e   : > { %754 = vmatprep.mubr.f32.mxu0 %v7006_v0  ;;  %879 = vmatprep.mubr.f32.mxu1 %v7006_v0 }
  0x7f   : > { %1759 = vperm.xlu0 %4283, %v1735_v53   ;;  %1774 = vperm.xlu1 %4284, %v1738_v54  }
  0x81   : > { %4004 = vmatmul.mubr.msk.f32.gmra.mxu0 %vm592_vm1, %v5194_v47  ;;  %4016 = vmatmul.mubr.msk.f32.gmra.mxu1 %vm592_vm1, %v5194_v47 }
  0x82   : > { %760 = vmatprep.mubr.f32.mxu0 %v7006_v0  ;;  %885 = vmatprep.mubr.f32.mxu1 %v7006_v0 }
  0x83   : > { %1769 = vperm.xlu1 %4284, %v1737_v58   ;;  %1779 = vperm.xlu0 %4283, %v1739_v59  }
  0x85   : > { %4005 = vmatmul.mubr.msk.f32.gmra.mxu0 %vm592_vm1, %v5212_v51  ;;  %4017 = vmatmul.mubr.msk.f32.gmra.mxu1 %vm592_vm1, %v5212_v51 }
  0x86   : > { %766 = vmatprep.mubr.f32.mxu0 %v7006_v0  ;;  %891 = vmatprep.mubr.f32.mxu1 %v7006_v0 }
  0x87   : > { %1784 = vperm.xlu1 %4284, %v1740_v62   ;;  %1789 = vperm.xlu0 %4283, %v1741_v63  }
  0x89   : > { %4006 = vmatmul.mubr.msk.f32.gmra.mxu0 %vm592_vm1, %v567_v55  ;;  %4018 = vmatmul.mubr.msk.f32.gmra.mxu1 %vm592_vm1, %v567_v55 }
  0x8a   : > { %962 = vmatprep.mubr.f32.mxu0 %v7006_v0  ;;  %1087 = vmatprep.mubr.f32.mxu1 %v7006_v0 }
  0x8b   : > { %3450 = vperm.xlu0 %4283, %v3447_v1  }
  0x8d   : > { %4021 = vmatmul.mubr.msk.f32.vlgmr.msra.gmra.mxu0 %vm592_vm1, %v5071_v16  ;;  %4033 = vmatmul.mubr.msk.f32.vlgmr.msra.gmra.mxu1 %vm592_vm1, %v5071_v16 }
  0x8e   : > { %4044 = vmatpush1.msk.msra.mxu0 %vm1215_vm2, %v5120_v32  ;;  %4056 = vmatpush1.msk.msra.mxu1 %vm1215_vm2, %v5125_v35 }
  0x8f   : > { %968 = vmatprep.mubr.f32.mxu0 %v7006_v0  ;;  %1093 = vmatprep.mubr.f32.mxu1 %v7006_v0 }
  0x90   : > { %4067 = vmatprep.subr.msk.mxu0 %vm1215_vm2, %v1182_v60  ;;  %4079 = vmatprep.subr.msk.mxu1 %vm1215_vm2, %v1183_v61 }
  0x91   : > { %4022 = vmatmul.mubr.msk.f32.gmra.mxu0 %vm592_vm1, %v5089_v23  ;;  %4034 = vmatmul.mubr.msk.f32.gmra.mxu1 %vm592_vm1, %v5089_v23 }
  0x92   : > { %974 = vmatprep.mubr.f32.mxu0 %v7006_v0  ;;  %1099 = vmatprep.mubr.f32.mxu1 %v7006_v0 }
  0x95   : > { %4023 = vmatmul.mubr.msk.f32.gmra.mxu0 %vm592_vm1, %v5117_v30  ;;  %4035 = vmatmul.mubr.msk.f32.gmra.mxu1 %vm592_vm1, %v5117_v30 }
  0x96   : > { %980 = vmatprep.mubr.f32.mxu0 %v7006_v0  ;;  %1105 = vmatprep.mubr.f32.mxu1 %v7006_v0 }
  0x99   : > { %4024 = vmatmul.mubr.msk.f32.gmra.mxu0 %vm592_vm1, %v5138_v38  ;;  %4036 = vmatmul.mubr.msk.f32.gmra.mxu1 %vm592_vm1, %v5138_v38 }
  0x9a   : > { %986 = vmatprep.mubr.f32.mxu0 %v7006_v0  ;;  %1111 = vmatprep.mubr.f32.mxu1 %v7006_v0 }
  0x9d   : > { %4025 = vmatmul.mubr.msk.f32.gmra.mxu0 %vm592_vm1, %v5153_v41  ;;  %4037 = vmatmul.mubr.msk.f32.gmra.mxu1 %vm592_vm1, %v5153_v41 }
  0x9e   : > { %992 = vmatprep.mubr.f32.mxu0 %v7006_v0  ;;  %1117 = vmatprep.mubr.f32.mxu1 %v7006_v0 }
  0xa1   : > { %4026 = vmatmul.mubr.msk.f32.gmra.mxu0 %vm592_vm1, %v5166_v42  ;;  %4038 = vmatmul.mubr.msk.f32.gmra.mxu1 %vm592_vm1, %v5166_v42 }
  0xa2   : > { %998 = vmatprep.mubr.f32.mxu0 %v7006_v0  ;;  %1123 = vmatprep.mubr.f32.mxu1 %v7006_v0 }
  0xa5   : > { %4027 = vmatmul.mubr.msk.f32.gmra.mxu0 %vm592_vm1, %v5180_v44  ;;  %4039 = vmatmul.mubr.msk.f32.gmra.mxu1 %vm592_vm1, %v5180_v44 }
  0xa6   : > { %1004 = vmatprep.mubr.f32.mxu0 %v7006_v0  ;;  %1129 = vmatprep.mubr.f32.mxu1 %v7006_v0 }
  0xa9   : > { %4028 = vmatmul.mubr.msk.f32.gmra.mxu0 %vm592_vm1, %v5194_v47  ;;  %4040 = vmatmul.mubr.msk.f32.gmra.mxu1 %vm592_vm1, %v5194_v47 }
  0xaa   : > { %1010 = vmatprep.mubr.f32.mxu0 %v7006_v0  ;;  %1135 = vmatprep.mubr.f32.mxu1 %v7006_v0 }
  0xad   : > { %4029 = vmatmul.mubr.msk.f32.gmra.mxu0 %vm592_vm1, %v5212_v51  ;;  %4041 = vmatmul.mubr.msk.f32.gmra.mxu1 %vm592_vm1, %v5212_v51 }
  0xae   : > { %1016 = vmatprep.mubr.f32.mxu0 %v7006_v0  ;;  %1141 = vmatprep.mubr.f32.mxu1 %v7006_v0 }
  0xb1   : > { %4030 = vmatmul.mubr.msk.f32.gmra.mxu0 %vm592_vm1, %v567_v55  ;;  %4042 = vmatmul.mubr.msk.f32.gmra.mxu1 %vm592_vm1, %v567_v55 }
  0xb2   : > { %1296 = vmatprep.mubr.f32.mxu0 %v7006_v0  ;;  %1421 = vmatprep.mubr.f32.mxu1 %v7006_v0 }
  0xb5   : > { %4045 = vmatmul.mubr.msk.f32.vlgmr.msra.gmra.mxu0 %vm1184_vm3, %v546_v2  ;;  %4057 = vmatmul.mubr.msk.f32.vlgmr.msra.gmra.mxu1 %vm1184_vm3, %v546_v2 }
  0xb6   : > { %4068 = vmatpush1.msk.msra.mxu0 %vm1215_vm2, %v5230_v56  ;;  %4080 = vmatpush1.msk.msra.mxu1 %vm1215_vm2, %v5233_v57 }
  0xb7   : > { %1302 = vmatprep.mubr.f32.mxu0 %v7006_v0  ;;  %1427 = vmatprep.mubr.f32.mxu1 %v7006_v0 }
  0xb9   : > { %4046 = vmatmul.mubr.msk.f32.gmra.mxu0 %vm1184_vm3, %v547_v3  ;;  %4058 = vmatmul.mubr.msk.f32.gmra.mxu1 %vm1184_vm3, %v547_v3 }
  0xba   : > { %1308 = vmatprep.mubr.f32.mxu0 %v7006_v0  ;;  %1433 = vmatprep.mubr.f32.mxu1 %v7006_v0 }
  0xbd   : > { %4047 = vmatmul.mubr.msk.f32.gmra.mxu0 %vm1184_vm3, %v548_v4  ;;  %4059 = vmatmul.mubr.msk.f32.gmra.mxu1 %vm1184_vm3, %v548_v4 }
  0xbe   : > { %1314 = vmatprep.mubr.f32.mxu0 %v7006_v0  ;;  %1439 = vmatprep.mubr.f32.mxu1 %v7006_v0 }
  0xc1   : > { %4048 = vmatmul.mubr.msk.f32.gmra.mxu0 %vm1184_vm3, %v549_v5  ;;  %4060 = vmatmul.mubr.msk.f32.gmra.mxu1 %vm1184_vm3, %v549_v5 }
  0xc2   : > { %1320 = vmatprep.mubr.f32.mxu0 %v7006_v0  ;;  %1445 = vmatprep.mubr.f32.mxu1 %v7006_v0 }
  0xc5   : > { %4049 = vmatmul.mubr.msk.f32.gmra.mxu0 %vm1184_vm3, %v550_v6  ;;  %4061 = vmatmul.mubr.msk.f32.gmra.mxu1 %vm1184_vm3, %v550_v6 }
  0xc6   : > { %1326 = vmatprep.mubr.f32.mxu0 %v7006_v0  ;;  %1451 = vmatprep.mubr.f32.mxu1 %v7006_v0 }
  0xc9   : > { %4050 = vmatmul.mubr.msk.f32.gmra.mxu0 %vm1184_vm3, %v551_v7  ;;  %4062 = vmatmul.mubr.msk.f32.gmra.mxu1 %vm1184_vm3, %v551_v7 }
  0xca   : > { %1332 = vmatprep.mubr.f32.mxu0 %v7006_v0  ;;  %1457 = vmatprep.mubr.f32.mxu1 %v7006_v0 }
  0xcd   : > { %4051 = vmatmul.mubr.msk.f32.gmra.mxu0 %vm1184_vm3, %v552_v8  ;;  %4063 = vmatmul.mubr.msk.f32.gmra.mxu1 %vm1184_vm3, %v552_v8 }
  0xce   : > { %1338 = vmatprep.mubr.f32.mxu0 %v7006_v0  ;;  %1463 = vmatprep.mubr.f32.mxu1 %v7006_v0 }
  0xd1   : > { %4052 = vmatmul.mubr.msk.f32.gmra.mxu0 %vm1184_vm3, %v553_v9  ;;  %4064 = vmatmul.mubr.msk.f32.gmra.mxu1 %vm1184_vm3, %v553_v9 }
  0xd2   : > { %1344 = vmatprep.mubr.f32.mxu0 %v7006_v0  ;;  %1469 = vmatprep.mubr.f32.mxu1 %v7006_v0 }
  0xd5   : > { %4053 = vmatmul.mubr.msk.f32.gmra.mxu0 %vm1184_vm3, %v554_v10  ;;  %4065 = vmatmul.mubr.msk.f32.gmra.mxu1 %vm1184_vm3, %v554_v10 }
  0xd6   : > { %1350 = vmatprep.mubr.f32.mxu0 %v7006_v0  ;;  %1475 = vmatprep.mubr.f32.mxu1 %v7006_v0 }
  0xd9   : > { %4054 = vmatmul.mubr.msk.f32.gmra.mxu0 %vm1184_vm3, %v555_v11  ;;  %4066 = vmatmul.mubr.msk.f32.gmra.mxu1 %vm1184_vm3, %v555_v11 }
  0xda   : > { %1546 = vmatprep.mubr.f32.mxu0 %v7006_v0  ;;  %1671 = vmatprep.mubr.f32.mxu1 %v7006_v0 }
  0xdd   : > { %4069 = vmatmul.mubr.msk.f32.vlgmr.msra.gmra.mxu0 %vm1184_vm3, %v546_v2  ;;  %4081 = vmatmul.mubr.msk.f32.vlgmr.msra.gmra.mxu1 %vm1184_vm3, %v546_v2 }
  0xde   : > { %1552 = vmatprep.mubr.f32.mxu0 %v7006_v0  ;;  %1677 = vmatprep.mubr.f32.mxu1 %v7006_v0 }
  0xe1   : > { %4070 = vmatmul.mubr.msk.f32.gmra.mxu0 %vm1184_vm3, %v547_v3  ;;  %4082 = vmatmul.mubr.msk.f32.gmra.mxu1 %vm1184_vm3, %v547_v3 }
  0xe2   : > { %1558 = vmatprep.mubr.f32.mxu0 %v7006_v0  ;;  %1683 = vmatprep.mubr.f32.mxu1 %v7006_v0 }
  0xe5   : > { %4071 = vmatmul.mubr.msk.f32.gmra.mxu0 %vm1184_vm3, %v548_v4  ;;  %4083 = vmatmul.mubr.msk.f32.gmra.mxu1 %vm1184_vm3, %v548_v4 }
  0xe6   : > { %1564 = vmatprep.mubr.f32.mxu0 %v7006_v0  ;;  %1689 = vmatprep.mubr.f32.mxu1 %v7006_v0 }
  0xe9   : > { %4072 = vmatmul.mubr.msk.f32.gmra.mxu0 %vm1184_vm3, %v549_v5  ;;  %4084 = vmatmul.mubr.msk.f32.gmra.mxu1 %vm1184_vm3, %v549_v5 }
  0xea   : > { %1570 = vmatprep.mubr.f32.mxu0 %v7006_v0  ;;  %1695 = vmatprep.mubr.f32.mxu1 %v7006_v0 }
  0xed   : > { %4073 = vmatmul.mubr.msk.f32.gmra.mxu0 %vm1184_vm3, %v550_v6  ;;  %4085 = vmatmul.mubr.msk.f32.gmra.mxu1 %vm1184_vm3, %v550_v6 }
  0xee   : > { %1576 = vmatprep.mubr.f32.mxu0 %v7006_v0  ;;  %1701 = vmatprep.mubr.f32.mxu1 %v7006_v0 }
  0xf1   : > { %4074 = vmatmul.mubr.msk.f32.gmra.mxu0 %vm1184_vm3, %v551_v7  ;;  %4086 = vmatmul.mubr.msk.f32.gmra.mxu1 %vm1184_vm3, %v551_v7 }
  0xf2   : > { %1582 = vmatprep.mubr.f32.mxu0 %v7006_v0  ;;  %1707 = vmatprep.mubr.f32.mxu1 %v7006_v0 }
  0xf5   : > { %4075 = vmatmul.mubr.msk.f32.gmra.mxu0 %vm1184_vm3, %v552_v8  ;;  %4087 = vmatmul.mubr.msk.f32.gmra.mxu1 %vm1184_vm3, %v552_v8 }
  0xf6   : > { %1588 = vmatprep.mubr.f32.mxu0 %v7006_v0  ;;  %1713 = vmatprep.mubr.f32.mxu1 %v7006_v0 }
  0xf9   : > { %4076 = vmatmul.mubr.msk.f32.gmra.mxu0 %vm1184_vm3, %v553_v9  ;;  %4088 = vmatmul.mubr.msk.f32.gmra.mxu1 %vm1184_vm3, %v553_v9 }
  0xfa   : > { %1594 = vmatprep.mubr.f32.mxu0 %v7006_v0  ;;  %1719 = vmatprep.mubr.f32.mxu1 %v7006_v0 }
  0xfd   : > { %4077 = vmatmul.mubr.msk.f32.gmra.mxu0 %vm1184_vm3, %v554_v10  ;;  %4089 = vmatmul.mubr.msk.f32.gmra.mxu1 %vm1184_vm3, %v554_v10 }
  0xfe   : > { %1600 = vmatprep.mubr.f32.mxu0 %v7006_v0  ;;  %1725 = vmatprep.mubr.f32.mxu1 %v7006_v0 }
 0x101   : > { %4078 = vmatmul.mubr.msk.f32.gmra.mxu0 %vm1184_vm3, %v555_v11  ;;  %4090 = vmatmul.mubr.msk.f32.gmra.mxu1 %vm1184_vm3, %v555_v11 }
 0x102   : > { %2924 = vmatprep.mubr.f32.mxu0 %v7006_v0  ;;  %2995 = vmatprep.mubr.f32.mxu1 %v7006_v0 }
 0x125   : > { %v5436_v12 = vpop.f32.mrf.mxu0  ;;  %v5438_v13 = vpop.f32.mrf.mxu1 }
 0x127   : > { %v5440_v14 = vpop.f32.mrf.mxu0  ;;  %v5442_v15 = vpop.f32.mrf.mxu1 }
 0x129   : > { %v5444_v16 = vpop.f32.mrf.mxu0  ;;  %v5446_v17 = vpop.f32.mrf.mxu1 }
 0x12b   : > { %v5448_v18 = vpop.f32.mrf.mxu0  ;;  %v5450_v19 = vpop.f32.mrf.mxu1 }
 0x12d   : > { %v5452_v21 = vpop.f32.mrf.mxu0  ;;  %v5454_v22 = vpop.f32.mrf.mxu1 }
 0x12f   : > { %v5456_v23 = vpop.f32.mrf.mxu0  ;;  %v5458_v24 = vpop.f32.mrf.mxu1 }
 0x131   : > { %v5460_v25 = vpop.f32.mrf.mxu0  ;;  %v5462_v26 = vpop.f32.mrf.mxu1 }
 0x133   : > { %v5464_v27 = vpop.f32.mrf.mxu0  ;;  %v5466_v28 = vpop.f32.mrf.mxu1 }
 0x135   : > { %v5468_v29 = vpop.f32.mrf.mxu0  ;;  %v5470_v30 = vpop.f32.mrf.mxu1 }
 0x137   : > { %v5472_v31 = vpop.f32.mrf.mxu0  ;;  %v5474_v32 = vpop.f32.mrf.mxu1 }
 0x139   : > { %v5476_v33 = vpop.f32.mrf.mxu0  ;;  %v5478_v34 = vpop.f32.mrf.mxu1 }
 0x13b   : > { %v5480_v35 = vpop.f32.mrf.mxu0  ;;  %v5482_v36 = vpop.f32.mrf.mxu1 }
 0x13d   : > { %v5484_v37 = vpop.f32.mrf.mxu0  ;;  %v5486_v38 = vpop.f32.mrf.mxu1 }
 0x13f   : > { %v5488_v39 = vpop.f32.mrf.mxu0  ;;  %v5490_v40 = vpop.f32.mrf.mxu1 }
 0x141   : > { %v5492_v41 = vpop.f32.mrf.mxu0  ;;  %v5494_v42 = vpop.f32.mrf.mxu1 }
 0x143   : > { %v5496_v43 = vpop.f32.mrf.mxu0  ;;  %v5498_v44 = vpop.f32.mrf.mxu1 }
 0x145   : > { %v5500_v45 = vpop.f32.mrf.mxu0  ;;  %v5502_v46 = vpop.f32.mrf.mxu1 }
 0x147   : > { %v5504_v47 = vpop.f32.mrf.mxu0  ;;  %v5506_v48 = vpop.f32.mrf.mxu1 }
 0x149   : > { %v5508_v49 = vpop.f32.mrf.mxu0  ;;  %v5510_v50 = vpop.f32.mrf.mxu1 }
 0x14b   : > { %v5512_v51 = vpop.f32.mrf.mxu0  ;;  %v5514_v52 = vpop.f32.mrf.mxu1 }
 0x14d   : > { %v5516_v53 = vpop.f32.mrf.mxu0  ;;  %v5518_v54 = vpop.f32.mrf.mxu1 }
 0x14e   : > { %7065 = vst [vmem:[#allocation18_spill] sm:$0xff] %v5518_v54 }
 0x14f   : > { %v5520_v55 = vpop.f32.mrf.mxu0  ;;  %v5522_v56 = vpop.f32.mrf.mxu1 }
 0x150   : > { %7066 = vst [vmem:[#allocation19_spill] sm:$0xff] %v5520_v55  ;;  %7067 = vst [vmem:[#allocation20_spill] sm:$0xff] %v5522_v56 }
 0x151   : > { %v5524_v57 = vpop.f32.mrf.mxu0  ;;  %v5526_v58 = vpop.f32.mrf.mxu1 }
 0x152   : > { %7068 = vst [vmem:[#allocation21_spill] sm:$0xff] %v5524_v57  ;;  %7069 = vst [vmem:[#allocation22_spill] sm:$0xff] %v5526_v58 }
 0x153   : > { %v5528_v59 = vpop.f32.mrf.mxu0  ;;  %v5530_v60 = vpop.f32.mrf.mxu1 }
 0x154   : > { %7070 = vst [vmem:[#allocation23_spill] sm:$0xff] %v5528_v59  ;;  %7071 = vst [vmem:[#allocation24_spill] sm:$0xff] %v5530_v60 }
 0x155   : > { %v5532_v61 = vpop.f32.mrf.mxu0  ;;  %v5534_v62 = vpop.f32.mrf.mxu1 }
 0x156   : > { %7072 = vst [vmem:[#allocation25_spill] sm:$0xff] %v5532_v61  ;;  %7073 = vst [vmem:[#allocation26_spill] sm:$0xff] %v5534_v62 }
 0x157   : > { %v5536_v63 = vpop.f32.mrf.mxu0  ;;  %v5538_v1 = vpop.f32.mrf.mxu1 }
 0x158   : > { %7074 = vst [vmem:[#allocation27_spill] sm:$0xff] %v5536_v63  ;;  %7075 = vst [vmem:[#allocation28_spill] sm:$0xff] %v5538_v1 }
 0x159   : > { %v5540_v2 = vpop.f32.mrf.mxu0  ;;  %v5542_v3 = vpop.f32.mrf.mxu1 }
 0x15a   : > { %7076 = vst [vmem:[#allocation29_spill] sm:$0xff] %v5540_v2  ;;  %7077 = vst [vmem:[#allocation30_spill] sm:$0xff] %v5542_v3  ;;  %v5600_v2 = vpop.permute.xlu0 %1749 }
 0x15b   : > { %v5544_v4 = vpop.f32.mrf.mxu0  ;;  %v5546_v5 = vpop.f32.mrf.mxu1  ;;  %7105 = vst [vmem:[#allocation58_spill] sm:$0xff] %v5600_v2 }
 0x15c   : > { %7078 = vst [vmem:[#allocation31_spill] sm:$0xff] %v5544_v4  ;;  %7079 = vst [vmem:[#allocation32_spill] sm:$0xff] %v5546_v5 }
 0x15d   : > { %v5548_v6 = vpop.f32.mrf.mxu0  ;;  %v5550_v7 = vpop.f32.mrf.mxu1 }
 0x15e   : > { %7080 = vst [vmem:[#allocation33_spill] sm:$0xff] %v5548_v6  ;;  %7081 = vst [vmem:[#allocation34_spill] sm:$0xff] %v5550_v7 }
 0x15f   : > { %v5552_v8 = vpop.f32.mrf.mxu0  ;;  %v5554_v9 = vpop.f32.mrf.mxu1 }
 0x160   : > { %7082 = vst [vmem:[#allocation35_spill] sm:$0xff] %v5552_v8  ;;  %7083 = vst [vmem:[#allocation36_spill] sm:$0xff] %v5554_v9 }
 0x161   : > { %v5556_v10 = vpop.f32.mrf.mxu0  ;;  %v5558_v11 = vpop.f32.mrf.mxu1 }
 0x162   : > { %7084 = vst [vmem:[#allocation37_spill] sm:$0xff] %v5556_v10  ;;  %7085 = vst [vmem:[#allocation38_spill] sm:$0xff] %v5558_v11 }
 0x163   : > { %v5560_v0 = vpop.f32.mrf.mxu0  ;;  %v5562_v20 = vpop.f32.mrf.mxu1 }
 0x164   : > { %7086 = vst [vmem:[#allocation39_spill] sm:$0xff] %v5560_v0  ;;  %7087 = vst [vmem:[#allocation40_spill] sm:$0xff] %v5562_v20 }
 0x165   : > { %v5564_v3 = vpop.f32.mrf.mxu0  ;;  %v5566_v4 = vpop.f32.mrf.mxu1 }
 0x166   : > { %7088 = vst [vmem:[#allocation41_spill] sm:$0xff] %v5564_v3  ;;  %7089 = vst [vmem:[#allocation42_spill] sm:$0xff] %v5566_v4 }
 0x167   : > { %v5568_v5 = vpop.f32.mrf.mxu0  ;;  %v5570_v6 = vpop.f32.mrf.mxu1 }
 0x168   : > { %7090 = vst [vmem:[#allocation43_spill] sm:$0xff] %v5568_v5  ;;  %7091 = vst [vmem:[#allocation44_spill] sm:$0xff] %v5570_v6 }
 0x169   : > { %v5572_v7 = vpop.f32.mrf.mxu0  ;;  %v5574_v8 = vpop.f32.mrf.mxu1 }
 0x16a   : > { %7092 = vst [vmem:[#allocation45_spill] sm:$0xff] %v5572_v7  ;;  %7093 = vst [vmem:[#allocation46_spill] sm:$0xff] %v5574_v8  ;;  %v5596_v8 = vpop.permute.xlu1 %1744 }
 0x16b   : > { %v5576_v9 = vpop.f32.mrf.mxu0  ;;  %v5578_v10 = vpop.f32.mrf.mxu1  ;;  %7104 = vst [vmem:[#allocation57_spill] sm:$0xff] %v5596_v8 }
 0x16c   : > { %7094 = vst [vmem:[#allocation47_spill] sm:$0xff] %v5576_v9  ;;  %7095 = vst [vmem:[#allocation48_spill] sm:$0xff] %v5578_v10 }
 0x16d   : > { %v5580_v11 = vpop.f32.mrf.mxu0  ;;  %v5582_v0 = vpop.f32.mrf.mxu1 }
 0x16e   : > { %7096 = vst [vmem:[#allocation49_spill] sm:$0xff] %v5580_v11  ;;  %7097 = vst [vmem:[#allocation50_spill] sm:$0xff] %v5582_v0  ;;  %v5682_v56 = vpop.permute.xlu1 %1764 }
 0x16f   : > { %v5584_v20 = vpop.f32.mrf.mxu0  ;;  %v5586_v3 = vpop.f32.mrf.mxu1  ;;  %7112 = vst [vmem:[#allocation65_spill] sm:$0xff] %v5682_v56 }
 0x170   : > { %7098 = vst [vmem:[#allocation51_spill] sm:$0xff] %v5584_v20  ;;  %7099 = vst [vmem:[#allocation52_spill] sm:$0xff] %v5586_v3 }
 0x171   : > { %v5588_v4 = vpop.f32.mrf.mxu0  ;;  %v5590_v5 = vpop.f32.mrf.mxu1 }
 0x172   : > { %7100 = vst [vmem:[#allocation53_spill] sm:$0xff] %v5588_v4  ;;  %7101 = vst [vmem:[#allocation54_spill] sm:$0xff] %v5590_v5 }
 0x173   : > { %v5592_v6 = vpop.f32.mrf.mxu0  ;;  %v5594_v7 = vpop.f32.mrf.mxu1 }
 0x174   : > { %7102 = vst [vmem:[#allocation55_spill] sm:$0xff] %v5592_v6  ;;  %7103 = vst [vmem:[#allocation56_spill] sm:$0xff] %v5594_v7 }
 0x175   : > { %v1298_v9 = vpop.f32.mrf.mxu0  ;;  %v1423_v10 = vpop.f32.mrf.mxu1 }
 0x176   : > { %v1299_v11 = vadd.f32 %v1298_v9, %v5436_v12  ;;  %v1424_v0 = vadd.f32 %v1423_v10, %v5438_v13 }
 0x177   : > { %v1300_v20 = vpop.f32.mrf.mxu0  ;;  %v1425_v3 = vpop.f32.mrf.mxu1 }
 0x178   : > { %v1792_v4 = vadd.f32 %v5596_v8, %v1299_v11  ;;  %v1794_v5 = vadd.f32 %v5596_v8, %v1424_v0  ;;  %v1301_v6 = vadd.f32 %v1300_v20, %v5440_v14  ;;  %v1426_v7 = vadd.f32 %v1425_v3, %v5442_v15  ;;  %v5611_v15 = vpop.permute.xlu0 %1754 }
 0x179   : > { %v1304_v1 = vpop.f32.mrf.mxu0  ;;  %v1429_v63 = vpop.f32.mrf.mxu1  ;;  %7106 = vst [vmem:[#allocation59_spill] sm:$0xff] %v5611_v15 }
 0x17a   : > { %v4091_v62 = vmul.f32 -1.442695, %v1792_v4  ;;  %v4093_v61 = vmul.f32 -1.442695, %v1794_v5  ;;  %v1793_v12 = vadd.f32 %v5596_v8, %v1301_v6  ;;  %v1795_v13 = vadd.f32 %v5596_v8, %v1426_v7  ;;  %v5620_v6 = vld [vmem:[%s5041_s28 + $0x8] sm:$0xff] }
 0x17b   : > { %v1305_v9 = vadd.f32 %v1304_v1, %v5444_v16  ;;  %v1430_v10 = vadd.f32 %v1429_v63, %v5446_v17  ;;  %v1306_v60 = vpop.f32.mrf.mxu0  ;;  %v1431_v11 = vpop.f32.mrf.mxu1  ;;  %7107 = vst [vmem:[#allocation60_spill] sm:$0xff] %v5620_v6 }
 0x17c   : > { %4291 = vpow2.f32 %v4091_v62  ;;  %v4092_v0 = vmul.f32 -1.442695, %v1793_v12  ;;  %v4094_v20 = vmul.f32 -1.442695, %v1795_v13  ;;  %v1307_v14 = vadd.f32 %v1306_v60, %v5448_v18 }
 0x17d   : > { %4293 = vpow2.f32 %v4093_v61  ;;  %v1800_v3 = vadd.f32 %v5600_v2, %v1305_v9  ;;  %v1802_v4 = vadd.f32 %v5600_v2, %v1430_v10  ;;  %v1432_v5 = vadd.f32 %v1431_v11, %v5450_v19  ;;  %v1310_v16 = vpop.f32.mrf.mxu0  ;;  %v1435_v1 = vpop.f32.mrf.mxu1 }
 0x17e   : > { %4295 = vpow2.f32 %v4092_v0  ;;  %v1801_v17 = vadd.f32 %v5600_v2, %v1307_v14  ;;  %v1311_v62 = vadd.f32 %v1310_v16, %v5452_v21  ;;  %v1436_v63 = vadd.f32 %v1435_v1, %v5454_v22 }
 0x17f   : > { %4297 = vpow2.f32 %v4094_v20  ;;  %v4099_v18 = vmul.f32 -1.442695, %v1800_v3  ;;  %v4101_v60 = vmul.f32 -1.442695, %v1802_v4  ;;  %v1803_v61 = vadd.f32 %v5600_v2, %v1432_v5  ;;  %v1312_v7 = vpop.f32.mrf.mxu0  ;;  %v1437_v12 = vpop.f32.mrf.mxu1 }
 0x180   : > { %v4100_v13 = vmul.f32 -1.442695, %v1801_v17  ;;  %v1808_v19 = vadd.f32 %v5611_v15, %v1311_v62  ;;  %v1810_v9 = vadd.f32 %v5611_v15, %v1436_v63  ;;  %v1313_v10 = vadd.f32 %v1312_v7, %v5456_v23  ;;  %v5629_v5 = vpop.permute.xlu0 %1759  ;;  %v5635_v17 = vld [vmem:[%s5041_s28 + $0x48] sm:$0xff]  ;;  %v5638_v63 = vld [vmem:[%s5041_s28 + $0x18] sm:$0xff] }
 0x181   : > { %4299 = vpow2.f32 %v4099_v18  ;;  %v4102_v21 = vmul.f32 -1.442695, %v1803_v61  ;;  %v1438_v22 = vadd.f32 %v1437_v12, %v5458_v24  ;;  %v1316_v11 = vpop.f32.mrf.mxu0  ;;  %v1441_v0 = vpop.f32.mrf.mxu1  ;;  %7108 = vst [vmem:[#allocation61_spill] sm:$0xff] %v5629_v5  ;;  %7109 = vst [vmem:[#allocation62_spill] sm:$0xff] %v5638_v63  ;;  %v5645_v12 = vld [vmem:[%s5041_s28 + $0x58] sm:$0xff] }
 0x182   : > { %4301 = vpow2.f32 %v4101_v60  ;;  %v4107_v14 = vmul.f32 -1.442695, %v1808_v19  ;;  %v4109_v3 = vmul.f32 -1.442695, %v1810_v9  ;;  %v1809_v4 = vadd.f32 %v5611_v15, %v1313_v10  ;;  %v2288_v10 = vld [vmem:[%s5041_s28 + $0x40] sm:$0xff] }
 0x183   : > { %4303 = vpow2.f32 %v4100_v13  ;;  %v1811_v23 = vadd.f32 %v5611_v15, %v1438_v22  ;;  %v1317_v16 = vadd.f32 %v1316_v11, %v5460_v25  ;;  %v1442_v24 = vadd.f32 %v1441_v0, %v5462_v26  ;;  %v1318_v1 = vpop.f32.mrf.mxu0  ;;  %v1443_v62 = vpop.f32.mrf.mxu1  ;;  %v2290_v22 = vld [vmem:[%s5041_s28 + $0x50] sm:$0xff] }
 0x184   : > { %4305 = vpow2.f32 %v4102_v21  ;;  %v4108_v18 = vmul.f32 -1.442695, %v1809_v4  ;;  %v1319_v60 = vadd.f32 %v1318_v1, %v5464_v27  ;;  %v1444_v61 = vadd.f32 %v1443_v62, %v5466_v28  ;;  %v2296_v21 = vld [vmem:[%s5041_s28 + $0x80] sm:$0xf]  ;;  %v2298_v1 = vld [vmem:[%s5041_s28 + $0x90] sm:$0xf] }
 0x185   : > { %4307 = vpow2.f32 %v4107_v14  ;;  %v4110_v7 = vmul.f32 -1.442695, %v1811_v23  ;;  %v1816_v25 = vadd.f32 %v5629_v5, %v1317_v16  ;;  %v1818_v26 = vadd.f32 %v5629_v5, %v1442_v24  ;;  %v5647_v13 = vpop.f32.mrf.mxu0  ;;  %v5649_v19 = vpop.f32.mrf.mxu1  ;;  %v5665_v23 = vld [vmem:[%s5041_s28 + $0x10] sm:$0xff] }
 0x186   : > { %4309 = vpow2.f32 %v4109_v3  ;;  %v1817_v9 = vadd.f32 %v5629_v5, %v1319_v60  ;;  %v2338_v27 = vrot.slane %v5635_v17, 4  ;;  %v5662_v3 = vld [vmem:[%s5041_s28] sm:$0xff]  ;;  %7111 = vst [vmem:[#allocation64_spill] sm:$0xff] %v5665_v23  ;;  %v1819_v24 = vadd.f32 %v5629_v5, %v1444_v61  ;;  %v2297_v17 = vld [vmem:[%s5041_s28 + $0x88] sm:$0xf] }
 0x187   : > { %4311 = vpow2.f32 %v4108_v18  ;;  %v4115_v11 = vmul.f32 -1.442695, %v1816_v25  ;;  %v4117_v0 = vmul.f32 -1.442695, %v1818_v26  ;;  %v5657_v14 = vpop.f32.mrf.mxu0  ;;  %v5659_v4 = vpop.f32.mrf.mxu1  ;;  %7110 = vst [vmem:[#allocation63_spill] sm:$0xff] %v5662_v3  ;;  %v2342_v18 = vrot.slane %v5645_v12, 4 }
 0x188   : > { %4313 = vpow2.f32 %v4110_v7  ;;  %v4116_v16 = vmul.f32 -1.442695, %v1817_v9  ;;  %v2336_v60 = vrot.slane %v2288_v10, 4  ;;  %v2352_v25 = vrot.slane %v2296_v21, 4  ;;  %v2299_v26 = vld [vmem:[%s5041_s28 + $0x98] sm:$0xf] }
 0x189   : > { %v4292_v62 = vpop.eup %4291  ;;  %4315 = vpow2.f32 %v4115_v11  ;;  %v5672_v28 = vpop.f32.mrf.mxu0  ;;  %v2340_v7 = vrot.slane %v2290_v22, 4  ;;  %v2356_v59 = vrot.slane %v2298_v1, 4  ;;  %v2354_v58 = vrot.slane %v2297_v17, 4 }
 0x18a   : > { %v5674_v20 = vpop.f32.mrf.mxu1  ;;  %v4294_v15 = vpop.eup %4293  ;;  %v1944_v2 = vadd.f32 1.0, %v4292_v62  ;;  %4317 = vpow2.f32 %v4117_v0  ;;  %v4118_v0 = vmul.f32 -1.442695, %v1819_v24  ;;  %v2358_v22 = vrot.slane %v2299_v26, 4 }
 0x18b   : > { %v4296_v61 = vpop.eup %4295  ;;  %v1946_v5 = vadd.f32 1.0, %v4294_v15  ;;  %v5677_v11 = vpop.f32.mrf.mxu0  ;;  %4319 = vpow2.f32 %v4116_v16  ;;  %v7113_v15 = vrot.slane %v5620_v6, 4  ;;  %v7115_v17 = vrot.slane %v5638_v63, 4  ;;  %v5777_v6 = vld [vmem:[%s5041_s28 + $0x38] sm:$0xff] }
 0x18c   : > { %v5679_v12 = vpop.f32.mrf.mxu1  ;;  %v4298_v21 = vpop.eup %4297  ;;  %v1945_v57 = vadd.f32 1.0, %v4296_v61  ;;  %4321 = vrcp.f32 %v1944_v2  ;;  %v5699_v2 = vsel %vm623_vm0, %v2336_v60, %v2352_v25  ;;  %v7118_v24 = vrot.slane %v5662_v3, 4  ;;  %7129 = vst [vmem:[#allocation78_spill] sm:$0xff] %v5777_v6 }
 0x18d   : > { %v1947_v62 = vadd.f32 1.0, %v4298_v21  ;;  %v5687_v1 = vsel %vm623_vm0, %v7113_v15, %v2338_v27  ;;  %v5692_v9 = vsel %vm623_vm0, %v7115_v17, %v2342_v18  ;;  %v5694_v61 = vpop.f32.mrf.mxu0  ;;  %4323 = vrcp.f32 %v1946_v5  ;;  %7117 = vst [vmem:[#allocation68_spill] sm:$0xff] %v5699_v2  ;;  %v5712_v17 = vld [vmem:[%s5041_s28 + $0x20] sm:$0xff]  ;;  %v5761_v2 = vld [vmem:[%s5041_s28 + $0x68] sm:$0xff] }
 0x18e   : > { %7114 = vst [vmem:[#allocation66_spill] sm:$0xff] %v5687_v1  ;;  %7116 = vst [vmem:[#allocation67_spill] sm:$0xff] %v5692_v9  ;;  %v5696_v10 = vpop.f32.mrf.mxu1  ;;  %v4300_v16 = vpop.eup %4299  ;;  %v5704_v26 = vsel %vm623_vm0, %v7118_v24, %v2336_v60  ;;  %v7120_v21 = vrot.slane %v5665_v23, 4  ;;  %4325 = vrcp.f32 %v1945_v57  ;;  %v5715_v5 = vsel %vm623_vm0, %v2340_v7, %v2356_v59  ;;  %v5725_v24 = vld [vmem:[%s5041_s28 + $0x60] sm:$0xff]  ;;  %v5733_v59 = vld [vmem:[%s5041_s28 + $0x30] sm:$0xff] }
 0x18f   : > { %7119 = vst [vmem:[#allocation69_spill] sm:$0xff] %v5704_v26  ;;  %7122 = vst [vmem:[#allocation71_spill] sm:$0xff] %v5712_v17  ;;  %v4302_v9 = vpop.eup %4301  ;;  %v1952_v1 = vadd.f32 1.0, %v4300_v16  ;;  %v5718_v25 = vsel %vm623_vm0, %v2338_v27, %v2354_v58  ;;  %v5720_v3 = vpop.f32.mrf.mxu0  ;;  %4327 = vpow2.f32 %v4118_v0  ;;  %v1323_v57 = vadd.f32 %v5647_v13, %v5468_v29  ;;  %v5743_v29 = vld [vmem:[%s5041_s28 + $0x28] sm:$0xff] }
 0x190   : > { %v5709_v15 = vsel %vm623_vm0, %v7120_v21, %v2340_v7  ;;  %7123 = vst [vmem:[#allocation72_spill] sm:$0xff] %v5715_v5  ;;  %7124 = vst [vmem:[#allocation73_spill] sm:$0xff] %v5718_v25  ;;  %v5722_v60 = vpop.f32.mrf.mxu1  ;;  %v4304_v21 = vpop.eup %4303  ;;  %v1954_v23 = vadd.f32 1.0, %v4302_v9  ;;  %v5730_v16 = vsel %vm623_vm0, %v2342_v18, %v2358_v22  ;;  %4329 = vrcp.f32 %v1947_v62 }
 0x191   : > { %7121 = vst [vmem:[#allocation70_spill] sm:$0xff] %v5709_v15  ;;  %7125 = vst [vmem:[#allocation74_spill] sm:$0xff] %v5730_v16  ;;  %v4306_v58 = vpop.eup %4305  ;;  %v1953_v27 = vadd.f32 1.0, %v4304_v21  ;;  %v1448_v7 = vadd.f32 %v5649_v19, %v5470_v30  ;;  %v5737_v25 = vpop.f32.mrf.mxu0  ;;  %4331 = vrcp.f32 %v1952_v1  ;;  %v1325_v22 = vadd.f32 %v5657_v14, %v5472_v31  ;;  %v5751_v19 = vld [vmem:[%s5041_s28 + $0x70] sm:$0xff] }
 0x192   : > { %7126 = vst [vmem:[#allocation75_spill] sm:$0xff] %v5733_v59  ;;  %v5739_v5 = vpop.f32.mrf.mxu1  ;;  %7127 = vst [vmem:[#allocation76_spill] sm:$0xff] %v5743_v29  ;;  %v4308_v13 = vpop.eup %4307  ;;  %v1955_v18 = vadd.f32 1.0, %v4306_v58  ;;  %4333 = vrcp.f32 %v1954_v23  ;;  %v1450_v9 = vadd.f32 %v5659_v4, %v5474_v32  ;;  %v1824_v30 = vadd.f32 %v5682_v56, %v1323_v57 }
 0x193   : > { %v5745_v0 = vpop.permute.xlu1 %1774  ;;  %v4310_v62 = vpop.eup %4309  ;;  %v1960_v21 = vadd.f32 1.0, %v4308_v13  ;;  %4335 = vrcp.f32 %v1953_v27  ;;  %v5766_v13 = vld [vmem:[%s5041_s28 + $0x78] sm:$0xff]  ;;  %v1826_v4 = vadd.f32 %v5682_v56, %v1448_v7  ;;  %v1825_v57 = vadd.f32 %v5682_v56, %v1325_v22 }
 0x194   : > { %v5755_v16 = vpop.f32.mrf.mxu0  ;;  %v5757_v1 = vpop.f32.mrf.mxu1  ;;  %v1962_v14 = vadd.f32 1.0, %v4310_v62  ;;  %7128 = vst [vmem:[#allocation77_spill] sm:$0xff] %v5766_v13  ;;  %4337 = vrcp.f32 %v1955_v18  ;;  %v1827_v7 = vadd.f32 %v5682_v56, %v1450_v9  ;;  %v1329_v22 = vadd.f32 %v5672_v28, %v5476_v33 }
 0x195   : > { %v4312_v31 = vpop.eup %4311  ;;  %4339 = vrcp.f32 %v1960_v21  ;;  %v1454_v9 = vadd.f32 %v5674_v20, %v5478_v34  ;;  %v7130_v33 = vrot.slane %v5725_v24, 4  ;;  %v7131_v28 = vrot.slane %v5712_v17, 4 }
 0x196   : > { %v4314_v15 = vpop.eup %4313  ;;  %v1961_v32 = vadd.f32 1.0, %v4312_v31  ;;  %v5769_v26 = vpop.f32.mrf.mxu0  ;;  %4341 = vrcp.f32 %v1962_v14  ;;  %v4125_v14 = vmul.f32 -1.442695, %v1826_v4  ;;  %v7133_v4 = vrot.slane %v5751_v19, 4 }
 0x197   : > { %v5771_v58 = vpop.f32.mrf.mxu1  ;;  %v4316_v27 = vpop.eup %4315  ;;  %v1963_v62 = vadd.f32 1.0, %v4314_v15  ;;  %v4123_v15 = vmul.f32 -1.442695, %v1824_v30  ;;  %v5803_v30 = vsel %vm623_vm0, %v7131_v28, %v7130_v33  ;;  %v7134_v34 = vrot.slane %v5733_v59, 4 }
 0x198   : > { %v4318_v55 = vpop.eup %4317  ;;  %v2064_v18 = vadd.f32 1.0, %v4316_v27  ;;  %v5780_v31 = vpop.f32.mrf.mxu0  ;;  %4343 = vrcp.f32 %v1961_v32  ;;  %7132 = vst [vmem:[#allocation79_spill] sm:$0xff] %v5803_v30  ;;  %v4126_v63 = vmul.f32 -1.442695, %v1827_v7  ;;  %v7139_v33 = vrot.slane %v5766_v13, 4 }
 0x199   : > { %v5782_v8 = vpop.f32.mrf.mxu1  ;;  %v2066_v21 = vadd.f32 1.0, %v4318_v55  ;;  %v5787_v23 = vpop.permute.xlu1 %1769  ;;  %4345 = vrcp.f32 %v1963_v62  ;;  %v4124_v55 = vmul.f32 -1.442695, %v1825_v57  ;;  %v5810_v20 = vsel %vm623_vm0, %v7134_v34, %v7133_v4 }
 0x19a   : > { %v4320_v54 = vpop.eup %4319  ;;  %v5791_v27 = vpop.f32.mrf.mxu0  ;;  %4347 = vrcp.f32 %v2064_v18  ;;  %7135 = vst [vmem:[#allocation80_spill] sm:$0xff] %v5810_v20  ;;  %v7136_v57 = vrot.slane %v5761_v2, 4  ;;  %v7137_v18 = vrot.slane %v5743_v29, 4  ;;  %v7140_v28 = vrot.slane %v5777_v6, 4 }
 0x19b   : > { %v5793_v56 = vpop.f32.mrf.mxu1  ;;  %v5796_v32 = vpop.eup %4321  ;;  %4349 = vrcp.f32 %v2066_v21  ;;  %v2065_v34 = vadd.f32 1.0, %v4320_v54  ;;  %v1832_v7 = vadd.f32 %v5787_v23, %v1329_v22  ;;  %v1331_v21 = vadd.f32 %v5677_v11, %v5480_v35 }
 0x19c   : > { %v5812_v62 = vpop.eup %4323  ;;  %v5819_v17 = vsel %vm623_vm0, %v7137_v18, %v7136_v57  ;;  %v5826_v30 = vsel %vm623_vm0, %v7140_v28, %v7139_v33  ;;  %4351 = vpow2.f32 %v4123_v15  ;;  %v5833_v20 = vpop.f32.mrf.mxu0  ;;  %v1834_v18 = vadd.f32 %v5787_v23, %v1454_v9 }
 0x19d   : > { %7138 = vst [vmem:[#allocation81_spill] sm:$0xff] %v5819_v17  ;;  %7141 = vst [vmem:[#allocation82_spill] sm:$0xff] %v5826_v30  ;;  %v5828_v4 = vpop.eup %4325  ;;  %4353 = vpow2.f32 %v4125_v14  ;;  %v1456_v17 = vadd.f32 %v5679_v12, %v5482_v36  ;;  %v1335_v33 = vadd.f32 %v5694_v61, %v5484_v37  ;;  %v5840_v28 = vpop.f32.mrf.mxu1  ;;  %v1341_v35 = vadd.f32 %v5737_v25, %v5492_v41 }
 0x19e   : > { %v4328_v57 = vpop.eup %4327  ;;  %4355 = vpow2.f32 %v4124_v55  ;;  %v1466_v11 = vadd.f32 %v5739_v5, %v5494_v42  ;;  %v1460_v36 = vadd.f32 %v5696_v10, %v5486_v38  ;;  %v5852_v12 = vpop.permute.xlu0 %1779  ;;  %v1343_v37 = vadd.f32 %v5755_v16, %v5496_v43 }
 0x19f   : > { %v5842_v54 = vpop.eup %4329  ;;  %v2067_v15 = vadd.f32 1.0, %v4328_v57  ;;  %4357 = vpow2.f32 %v4126_v63  ;;  %v1468_v61 = vadd.f32 %v5757_v1, %v5498_v44  ;;  %v1833_v41 = vadd.f32 %v5787_v23, %v1331_v21  ;;  %v1548_v63 = vpop.f32.mrf.mxu0 }
 0x1a0   : > { %v5848_v22 = vpop.eup %4331  ;;  %4359 = vrcp.f32 %v2065_v34  ;;  %v1337_v42 = vadd.f32 %v5720_v3, %v5488_v39  ;;  %v1347_v38 = vadd.f32 %v5769_v26, %v5500_v45  ;;  %v1835_v43 = vadd.f32 %v5787_v23, %v1456_v17  ;;  %v5871_v25 = vpop.permute.xlu1 %1784  ;;  %v5880_v26 = vld [vmem:[%s5041_s28 + $0xa0] sm:$0xf] }
 0x1a1   : > { %v5858_v14 = vpop.eup %4333  ;;  %4361 = vrcp.f32 %v2067_v15  ;;  %v1840_v44 = vadd.f32 %v5745_v0, %v1335_v33  ;;  %v1462_v5 = vadd.f32 %v5722_v60, %v5490_v40  ;;  %7142 = vst [vmem:[#allocation83_spill] sm:$0xff] %v5871_v25  ;;  %v1673_v16 = vpop.f32.mrf.mxu1  ;;  %v1848_v39 = vadd.f32 %v5852_v12, %v1341_v35 }
 0x1a2   : > { %v5865_v10 = vpop.eup %4335  ;;  %4363 = vtanh.f32 %v1832_v7  ;;  %v1850_v45 = vadd.f32 %v5852_v12, %v1466_v11  ;;  %v1472_v3 = vadd.f32 %v5771_v58, %v5502_v46  ;;  %v1842_v40 = vadd.f32 %v5745_v0, %v1460_v36  ;;  %v1550_v7 = vpop.f32.mrf.mxu0 }
 0x1a3   : > { %v5873_v1 = vpop.eup %4337  ;;  %4365 = vtanh.f32 %v1834_v18  ;;  %v5886_v60 = vadd.f32 %v5852_v12, %v1343_v37  ;;  %v5889_v9 = vadd.f32 %v5852_v12, %v1468_v61  ;;  %v1841_v34 = vadd.f32 %v5745_v0, %v1337_v42  ;;  %v1675_v33 = vpop.f32.mrf.mxu1 }
 0x1a4   : > { %v5882_v17 = vpop.eup %4339  ;;  %4367 = vtanh.f32 %v1833_v41  ;;  %v1856_v46 = vadd.f32 %v5871_v25, %v1347_v38  ;;  %v1349_v58 = vadd.f32 %v5780_v31, %v5504_v47  ;;  %v1843_v57 = vadd.f32 %v5745_v0, %v1462_v5 }
 0x1a5   : > { %v5891_v55 = vpop.eup %4341  ;;  %4369 = vtanh.f32 %v1835_v43  ;;  %v1474_v18 = vadd.f32 %v5782_v8, %v5506_v48  ;;  %v4131_v11 = vmul.f32 -1.442695, %v1848_v39  ;;  %v4133_v36 = vmul.f32 -1.442695, %v1850_v45  ;;  %v5921_v43 = vpop.permute.xlu0 %1789 }
 0x1a6   : > { %7143 = vst [vmem:[#allocation84_spill] sm:$0xff] %v5891_v55  ;;  %v5897_v21 = vpop.eup %4343  ;;  %4371 = vtanh.f32 %v1840_v44  ;;  %v1858_v37 = vadd.f32 %v5871_v25, %v1472_v3  ;;  %v4132_v31 = vmul.f32 -1.442695, %v5886_v60  ;;  %v5910_v61 = vmul.f32 -1.442695, %v5889_v9  ;;  %7144 = vst [vmem:[#allocation85_spill] sm:$0xff] %v5921_v43  ;;  %v1554_v44 = vpop.f32.mrf.mxu0 }
 0x1a7   : > { %v5903_v35 = vpop.eup %4345  ;;  %4373 = vtanh.f32 %v1842_v40  ;;  %v1353_v48 = vadd.f32 %v5791_v27, %v5508_v49  ;;  %v5916_v41 = vmul.f32 -1.442695, %v1856_v46  ;;  %v1857_v42 = vadd.f32 %v5871_v25, %v1349_v58  ;;  %v1679_v40 = vpop.f32.mrf.mxu1 }
 0x1a8   : > { %v5906_v47 = vpop.eup %4347  ;;  %4375 = vtanh.f32 %v1841_v34  ;;  %v1478_v38 = vadd.f32 %v5793_v56, %v5510_v50  ;;  %v1859_v3 = vadd.f32 %v5871_v25, %v1474_v18  ;;  %v1355_v49 = vadd.f32 %v5833_v20, %v5512_v51  ;;  %v7145_v18 = vld [vmem:[#allocation18_spill] sm:$0xff] }
 0x1a9   : > { %v5914_v8 = vpop.eup %4349  ;;  %4377 = vtanh.f32 %v1843_v57  ;;  %v1480_v27 = vadd.f32 %v5840_v28, %v5514_v52  ;;  %v5928_v58 = vmul.f32 -1.442695, %v1858_v37  ;;  %v1549_v50 = vadd.f32 %v1548_v63, %v5516_v53  ;;  %v1556_v28 = vpop.f32.mrf.mxu0 }
 0x1aa   : > { %v4352_v5 = vpop.eup %4351  ;;  %4379 = vtanh.f32 %v1848_v39  ;;  %v1864_v57 = vadd.f32 %v5921_v43, %v1353_v48  ;;  %v1674_v30 = vadd.f32 %v1673_v16, %v7145_v18  ;;  %v4140_v20 = vmul.f32 -1.442695, %v1857_v42  ;;  %v1681_v63 = vpop.f32.mrf.mxu1  ;;  %v7146_v48 = vld [vmem:[#allocation57_spill] sm:$0xff] }
 0x1ab   : > { %v4354_v34 = vpop.eup %4353  ;;  %v2072_v46 = vadd.f32 1.0, %v4352_v5  ;;  %4381 = vtanh.f32 %v1850_v45  ;;  %v1866_v52 = vadd.f32 %v5921_v43, %v1478_v38  ;;  %v1865_v37 = vadd.f32 %v5921_v43, %v1355_v49  ;;  %v1560_v25 = vpop.f32.mrf.mxu0 }
 0x1ac   : > { %v4356_v56 = vpop.eup %4355  ;;  %v2074_v15 = vadd.f32 1.0, %v4354_v34  ;;  %4383 = vpow2.f32 %v4131_v11  ;;  %v1867_v53 = vadd.f32 %v5921_v43, %v1480_v27  ;;  %v1796_v16 = vadd.f32 %v7146_v48, %v1549_v50  ;;  %v7147_v34 = vld [vmem:[#allocation19_spill] sm:$0xff]  ;;  %v7148_v11 = vld [vmem:[#allocation20_spill] sm:$0xff]  ;;  %v7149_v27 = vld [vmem:[#allocation21_spill] sm:$0xff] }
 0x1ad   : > { %v4358_v6 = vpop.eup %4357  ;;  %v2073_v51 = vadd.f32 1.0, %v4356_v56  ;;  %4385 = vrcp.f32 %v2072_v46  ;;  %v1551_v56 = vadd.f32 %v1550_v7, %v7147_v34  ;;  %v1676_v42 = vadd.f32 %v1675_v33, %v7148_v11  ;;  %v7150_v43 = vld [vmem:[#allocation22_spill] sm:$0xff]  ;;  %v7151_v33 = vld [vmem:[#allocation23_spill] sm:$0xff]  ;;  %v7152_v11 = vld [vmem:[#allocation60_spill] sm:$0xff] }
 0x1ae   : > { %v4360_v5 = vpop.eup %4359  ;;  %v2075_v39 = vadd.f32 1.0, %v4358_v6  ;;  %4387 = vrcp.f32 %v2074_v15  ;;  %v4142_v38 = vmul.f32 -1.442695, %v1859_v3  ;;  %v4147_v29 = vmul.f32 -1.442695, %v1864_v57  ;;  %v1685_v3 = vpop.f32.mrf.mxu1 }
 0x1af   : > { %v5936_v45 = vpop.eup %4361  ;;  %4389 = vrcp.f32 %v2073_v51  ;;  %v1798_v6 = vadd.f32 %v7146_v48, %v1674_v30  ;;  %v4149_v49 = vmul.f32 -1.442695, %v1866_v52  ;;  %v1555_v13 = vadd.f32 %v1554_v44, %v7149_v27  ;;  %v1562_v27 = vpop.f32.mrf.mxu0 }
 0x1b0   : > { %v4364_v18 = vpop.eup %4363  ;;  %4391 = vrcp.f32 %v2075_v39  ;;  %v1680_v15 = vadd.f32 %v1679_v40, %v7150_v43  ;;  %v4148_v7 = vmul.f32 -1.442695, %v1865_v37  ;;  %v5946_v34 = vmul.f32 -1.442695, %v1867_v53 }
 0x1b1   : > { %v5942_v46 = vpop.eup %4365  ;;  %4393 = vpow2.f32 %v4133_v36  ;;  %v1557_v51 = vadd.f32 %v1556_v28, %v7151_v33  ;;  %v5949_v30 = vmul.f32 -1.442695, %v1796_v16  ;;  %v1797_v39 = vadd.f32 %v7146_v48, %v1551_v56  ;;  %v7154_v28 = vld [vmem:[#allocation24_spill] sm:$0xff] }
 0x1b2   : > { %v4368_v50 = vpop.eup %4367  ;;  %4395 = vpow2.f32 %v4132_v31  ;;  %v1799_v52 = vadd.f32 %v7146_v48, %v1676_v42  ;;  %v7153_v43 = vrot.slane %v7152_v11, 4  ;;  %v5959_v36 = vmul.f32 -1.442695, %v1798_v6  ;;  %v7155_v31 = vld [vmem:[#allocation58_spill] sm:$0xff]  ;;  %v7156_v48 = vld [vmem:[#allocation25_spill] sm:$0xff] }
 0x1b3   : > { %v4370_v57 = vpop.eup %4369  ;;  %4397 = vtanh.f32 %v5886_v60  ;;  %v1682_v37 = vadd.f32 %v1681_v63, %v7154_v28  ;;  %v1804_v16 = vadd.f32 %v7155_v31, %v1555_v13  ;;  %v1806_v56 = vadd.f32 %v7155_v31, %v1680_v15  ;;  %v7157_v11 = vld [vmem:[#allocation62_spill] sm:$0xff]  ;;  %v7159_v60 = vld [vmem:[#allocation69_spill] sm:$0xff]  ;;  %v1687_v63 = vpop.f32.mrf.mxu1 }
 0x1b4   : > { %v4372_v44 = vpop.eup %4371  ;;  %v5956_v40 = vmul.f32 %v5897_v21, %v7153_v43  ;;  %4399 = vpow2.f32 %v5910_v61  ;;  %v1561_v42 = vadd.f32 %v1560_v25, %v7156_v48  ;;  %v7158_v43 = vrot.slane %v7157_v11, 4  ;;  %v7160_v28 = vld [vmem:[#allocation70_spill] sm:$0xff] }
 0x1b5   : > { %v4374_v53 = vpop.eup %4373  ;;  %v5971_v6 = vmul.f32 %v5906_v47, %v7159_v60  ;;  %4401 = vpow2.f32 %v5916_v41  ;;  %v1805_v61 = vadd.f32 %v7155_v31, %v1557_v51  ;;  %v5977_v15 = vmul.f32 %v5914_v8, %v7160_v28  ;;  %v7163_v41 = vld [vmem:[#allocation26_spill] sm:$0xff] }
 0x1b6   : > { %v4376_v33 = vpop.eup %4375  ;;  %v2395_v59 = vmul.f32 %v5903_v35, %v7158_v43  ;;  %4403 = vpow2.f32 %v5928_v58  ;;  %v4096_v25 = vmul.f32 -1.442695, %v1797_v39  ;;  %v4098_v48 = vmul.f32 -1.442695, %v1799_v52  ;;  %v7162_v43 = vld [vmem:[#allocation66_spill] sm:$0xff]  ;;  %v7164_v58 = vld [vmem:[#allocation59_spill] sm:$0xff]  ;;  %v5995_v52 = vpop.f32.mrf.mxu0 }
 0x1b7   : > { %v4378_v13 = vpop.eup %4377  ;;  %v5983_v55 = vmul.f32 %v4360_v5, %v7162_v43  ;;  %4405 = vpow2.f32 %v4140_v20  ;;  %v1807_v47 = vadd.f32 %v7155_v31, %v1682_v37  ;;  %v1686_v51 = vadd.f32 %v1685_v3, %v7163_v41  ;;  %v7166_v31 = vld [vmem:[#allocation67_spill] sm:$0xff] }
 0x1b8   : > { %v5980_v11 = vpop.eup %4379  ;;  %4407 = vtanh.f32 %v5889_v9  ;;  %v5990_v8 = vmul.f32 -1.442695, %v1804_v16  ;;  %v5992_v28 = vmul.f32 -1.442695, %v1806_v56  ;;  %v1812_v39 = vadd.f32 %v7164_v58, %v1561_v42  ;;  %v6007_v9 = vpop.f32.mrf.mxu1 }
 0x1b9   : > { %7161 = vst [vmem:[#allocation18_spill] sm:$0xff] %v5980_v11  ;;  %v5987_v60 = vpop.eup %4381  ;;  %v6000_v20 = vmul.f32 %v4368_v50, %v5828_v4  ;;  %v6003_v5 = vmul.f32 %v4364_v18, %v5796_v32  ;;  %4409 = vpow2.f32 %v4142_v38  ;;  %v6005_v3 = vmul.f32 -1.442695, %v1805_v61  ;;  %v7167_v4 = vld [vmem:[#allocation27_spill] sm:$0xff] }
 0x1ba   : > { %v5997_v11 = vpop.eup %4383  ;;  %v6013_v16 = vmul.f32 %v5936_v45, %v7166_v31  ;;  %v6016_v56 = vmul.f32 %v4370_v57, %v5842_v54  ;;  %4411 = vpow2.f32 %v4147_v29  ;;  %v1563_v50 = vadd.f32 %v1562_v27, %v7167_v4  ;;  %v7168_v54 = vld [vmem:[#allocation28_spill] sm:$0xff]  ;;  %v6036_v27 = vpop.f32.mrf.mxu0 }
 0x1bb   : > { %7165 = vst [vmem:[#allocation57_spill] sm:$0xff] %v5997_v11  ;;  %v6009_v37 = vpop.eup %4385  ;;  %v6022_v32 = vmul.f32 %v4372_v44, %v5848_v22  ;;  %4413 = vpow2.f32 %v4149_v49  ;;  %v6024_v18 = vmul.f32 -1.442695, %v1807_v47  ;;  %v1814_v38 = vadd.f32 %v7164_v58, %v1686_v51 }
 0x1bc   : > { %v6019_v42 = vpop.eup %4387  ;;  %v6031_v45 = vmul.f32 %v5942_v46, %v5812_v62  ;;  %4415 = vpow2.f32 %v4148_v7  ;;  %v6033_v29 = vmul.f32 -1.442695, %v1812_v39  ;;  %v1688_v57 = vadd.f32 %v1687_v63, %v7168_v54  ;;  %v6046_v62 = vpop.f32.mrf.mxu1 }
 0x1bd   : > { %v6027_v61 = vpop.eup %4389  ;;  %v2465_v49 = vrot.slane %v6000_v20, 4  ;;  %v7034_v44 = vrot.slane %v6003_v5, 4  ;;  %v6043_v43 = vmul.f32 %v4374_v53, %v5858_v14  ;;  %4417 = vpow2.f32 %v5946_v34 }
 0x1be   : > { %v6038_v22 = vpop.eup %4391  ;;  %v2467_v7 = vrot.slane %v6016_v56, 4  ;;  %v6052_v63 = vmul.f32 %v4376_v33, %v5865_v10  ;;  %4419 = vpow2.f32 %v5949_v30  ;;  %v1813_v47 = vadd.f32 %v7164_v58, %v1563_v50  ;;  %v6068_v30 = vpop.f32.mrf.mxu0 }
 0x1bf   : > { %v6048_v46 = vpop.eup %4393  ;;  %v6057_v51 = vadd.f32 %v2465_v49, %v5956_v40  ;;  %v7037_v14 = vrot.slane %v6022_v32, 4  ;;  %4421 = vpow2.f32 %v5959_v36  ;;  %v6061_v34 = vmul.f32 -1.442695, %v1814_v38  ;;  %v6075_v56 = vpop.f32.mrf.mxu1 }
 0x1c0   : > { %7169 = vst [vmem:[#allocation19_spill] sm:$0xff] %v6048_v46  ;;  %v4396_v41 = vpop.eup %4395  ;;  %v6065_v39 = vadd.f32 %v2467_v7, %v2395_v59  ;;  %v7035_v10 = vrot.slane %v6031_v45, 4  ;;  %4423 = vpow2.f32 %v4096_v25  ;;  %v7036_v40 = vrot.slane %v6043_v43, 4 }
 0x1c1   : > { %v6063_v53 = vpop.eup %4397  ;;  %v2209_v33 = vadd.f32 1.0, %v4396_v41  ;;  %v6072_v31 = vmul.f32 %v4378_v13, %v5873_v1  ;;  %4425 = vpow2.f32 %v4098_v48  ;;  %v1815_v36 = vadd.f32 %v7164_v58, %v1688_v57  ;;  %v6091_v41 = vpop.f32.mrf.mxu0 }
 0x1c2   : > { %v4400_v20 = vpop.eup %4399  ;;  %v7038_v59 = vrot.slane %v6052_v63, 4  ;;  %v6078_v38 = vmul.f32 -1.442695, %v1813_v47  ;;  %v2473_v1 = vsel %vm623_vm0, %v7034_v44, %v7037_v14  ;;  %v6099_v44 = vpop.f32.mrf.mxu1 }
 0x1c3   : > { %v4402_v4 = vpop.eup %4401  ;;  %4427 = vrcp.f32 %v2209_v33  ;;  %v2211_v50 = vadd.f32 1.0, %v4400_v20  ;;  %v6089_v57 = vadd.f32 %v2473_v1, %v5971_v6  ;;  %v2477_v20 = vsel %vm623_vm0, %v7035_v10, %v7036_v40  ;;  %v7170_v10 = vld [vmem:[#allocation68_spill] sm:$0xff] }
 0x1c4   : > { %v4404_v25 = vpop.eup %4403  ;;  %v2216_v13 = vadd.f32 1.0, %v4402_v4  ;;  %4429 = vpow2.f32 %v5990_v8  ;;  %v7039_v4 = vrot.slane %v6072_v31, 4  ;;  %v6102_v6 = vadd.f32 %v2477_v20, %v5977_v15 }
 0x1c5   : > { %v4406_v48 = vpop.eup %4405  ;;  %4431 = vrcp.f32 %v2211_v50  ;;  %v2218_v47 = vadd.f32 1.0, %v4404_v25  ;;  %v6107_v50 = vsel %vm623_vm0, %v2465_v49, %v7038_v59  ;;  %v6109_v25 = vmul.f32 -1.442695, %v1815_v36  ;;  %v7172_v49 = vld [vmem:[#allocation30_spill] sm:$0xff] }
 0x1c6   : > { %v4408_v33 = vpop.eup %4407  ;;  %4433 = vrcp.f32 %v2216_v13  ;;  %v2217_v8 = vadd.f32 1.0, %v4406_v48  ;;  %v6113_v54 = vmul.f32 %v6009_v37, %v7170_v10  ;;  %v7171_v48 = vld [vmem:[#allocation29_spill] sm:$0xff]  ;;  %v1692_v36 = vadd.f32 %v6007_v9, %v7172_v49  ;;  %v7173_v10 = vld [vmem:[#allocation31_spill] sm:$0xff]  ;;  %v7175_v49 = vld [vmem:[#allocation32_spill] sm:$0xff] }
 0x1c7   : > { %v4410_v58 = vpop.eup %4409  ;;  %4435 = vrcp.f32 %v2218_v47  ;;  %v1567_v40 = vadd.f32 %v5995_v52, %v7171_v48  ;;  %v6121_v47 = vpop.f32.mrf.mxu0  ;;  %v6126_v37 = vsel %vm623_vm0, %v2467_v7, %v7039_v4  ;;  %v1694_v20 = vadd.f32 %v6046_v62, %v7175_v49  ;;  %v7177_v62 = vld [vmem:[#allocation73_spill] sm:$0xff] }
 0x1c8   : > { %v4412_v1 = vpop.eup %4411  ;;  %4437 = vrcp.f32 %v2217_v8  ;;  %v2219_v13 = vadd.f32 1.0, %v4410_v58  ;;  %v1569_v58 = vadd.f32 %v6036_v27, %v7173_v10  ;;  %v6130_v8 = vpop.f32.mrf.mxu1  ;;  %v2433_v10 = vmul.f32 %v6063_v53, %v5897_v21  ;;  %v7178_v53 = vld [vmem:[#allocation33_spill] sm:$0xff] }
 0x1c9   : > { %v4414_v15 = vpop.eup %4413  ;;  %v2224_v14 = vadd.f32 1.0, %v4412_v1  ;;  %4439 = vpow2.f32 %v5992_v28  ;;  %v7174_v1 = vld [vmem:[#allocation72_spill] sm:$0xff]  ;;  %v6148_v49 = vmul.f32 %v6027_v61, %v7177_v62 }
 0x1ca   : > { %v4416_v59 = vpop.eup %4415  ;;  %4441 = vrcp.f32 %v2219_v13  ;;  %v2226_v52 = vadd.f32 1.0, %v4414_v15  ;;  %v6134_v9 = vmul.f32 %v6019_v42, %v7174_v1  ;;  %v7176_v15 = vld [vmem:[#allocation61_spill] sm:$0xff] }
 0x1cb   : > { %v4418_v28 = vpop.eup %4417  ;;  %4443 = vrcp.f32 %v2224_v14  ;;  %v2225_v48 = vadd.f32 1.0, %v4416_v59  ;;  %v1820_v4 = vadd.f32 %v7176_v15, %v1567_v40  ;;  %v1822_v14 = vadd.f32 %v7176_v15, %v1692_v36  ;;  %v6144_v59 = vpop.f32.mrf.mxu0 }
 0x1cc   : > { %v4420_v46 = vpop.eup %4419  ;;  %4445 = vrcp.f32 %v2226_v52  ;;  %v2227_v13 = vadd.f32 1.0, %v4418_v28  ;;  %v1821_v40 = vadd.f32 %v7176_v15, %v1569_v58  ;;  %v6151_v28 = vpop.f32.mrf.mxu1  ;;  %v1573_v36 = vadd.f32 %v6068_v30, %v7178_v53 }
 0x1cd   : > { %v4422_v27 = vpop.eup %4421  ;;  %4447 = vrcp.f32 %v2225_v48  ;;  %v1948_v42 = vadd.f32 1.0, %v4420_v46  ;;  %v1823_v46 = vadd.f32 %v7176_v15, %v1694_v20  ;;  %v7180_v48 = vld [vmem:[#allocation74_spill] sm:$0xff]  ;;  %v2302_v20 = vld [vmem:[%s5041_s28 + $0xb0] sm:$0xf]  ;;  %v4119_v30 = vmul.f32 -1.442695, %v1820_v4  ;;  %v1584_v62 = vpop.f32.mrf.mxu0 }
 0x1ce   : > { %v4424_v1 = vpop.eup %4423  ;;  %4449 = vrcp.f32 %v2227_v13  ;;  %v1950_v52 = vadd.f32 1.0, %v4422_v27  ;;  %v6165_v58 = vmul.f32 %v6038_v22, %v7180_v48  ;;  %v2435_v13 = vmul.f32 %v4408_v33, %v5903_v35  ;;  %v7182_v48 = vld [vmem:[#allocation34_spill] sm:$0xff]  ;;  %v6177_v33 = vpop.f32.mrf.mxu1 }
 0x1cf   : > { %v4426_v7 = vpop.eup %4425  ;;  %4451 = vrcp.f32 %v1948_v42  ;;  %v1949_v21 = vadd.f32 1.0, %v4424_v1  ;;  %v2490_v42 = vrot.slane %v2433_v10, 4  ;;  %v6169_v1 = vmul.f32 -1.442695, %v1822_v14  ;;  %v7184_v10 = vld [vmem:[#allocation65_spill] sm:$0xff] }
 0x1d0   : > { %v6161_v61 = vpop.eup %4427  ;;  %4453 = vrcp.f32 %v1950_v52  ;;  %v1951_v27 = vadd.f32 1.0, %v4426_v7  ;;  %v6173_v22 = vmul.f32 -1.442695, %v1821_v40  ;;  %v1698_v35 = vadd.f32 %v6075_v56, %v7182_v48  ;;  %v2825_v7 = vld [vmem:[%s6159_s13] sm:$0x77]  ;;  %v7187_v48 = vld [vmem:[#allocation36_spill] sm:$0xff] }
 0x1d1   : > { %7179 = vst [vmem:[#allocation20_spill] sm:$0xff] %v6161_v61  ;;  %v4430_v15 = vpop.eup %4429  ;;  %4455 = vrcp.f32 %v1949_v21  ;;  %v6183_v4 = vmul.f32 -1.442695, %v1823_v46  ;;  %v1828_v14 = vadd.f32 %v7184_v10, %v1573_v36  ;;  %v7185_v21 = vld [vmem:[#allocation35_spill] sm:$0xff]  ;;  %v2364_v56 = vrot.slane %v2302_v20, 4 }
 0x1d2   : > { %v6171_v53 = vpop.eup %4431  ;;  %4457 = vrcp.f32 %v1951_v27  ;;  %v1956_v61 = vadd.f32 1.0, %v4430_v15  ;;  %v1575_v27 = vadd.f32 %v6091_v41, %v7185_v21  ;;  %v2301_v15 = vld [vmem:[%s5041_s28 + $0xa8] sm:$0xf]  ;;  %v1700_v11 = vadd.f32 %v6099_v44, %v7187_v48  ;;  %v1711_v48 = vpop.f32.mrf.mxu1 }
 0x1d3   : > { %7181 = vst [vmem:[#allocation21_spill] sm:$0xff] %v6171_v53  ;;  %v6180_v52 = vpop.eup %4433  ;;  %4459 = vpow2.f32 %v6005_v3  ;;  %v2494_v53 = vrot.slane %v2435_v13, 4  ;;  %v7189_v3 = vrot.slane %v6052_v63, 4  ;;  %v7190_v41 = vrot.slane %v5880_v26, 4 }
 0x1d4   : > { %7183 = vst [vmem:[#allocation22_spill] sm:$0xff] %v6180_v52  ;;  %v6189_v40 = vpop.eup %4435  ;;  %4461 = vrcp.f32 %v1956_v61  ;;  %v7191_v36 = vrot.slane %v5725_v24, 4  ;;  %v1586_v61 = vpop.f32.mrf.mxu0  ;;  %v2835_v20 = vcombine.high %v2825_v7, %v2825_v7  ;;  %v1830_v44 = vadd.f32 %v7184_v10, %v1698_v35 }
 0x1d5   : > { %7186 = vst [vmem:[#allocation23_spill] sm:$0xff] %v6189_v40  ;;  %v6193_v52 = vpop.eup %4437  ;;  %v6198_v46 = vsel %vm623_vm0, %v7189_v3, %v2490_v42  ;;  %4463 = vpow2.f32 %v6024_v18  ;;  %v2362_v63 = vrot.slane %v2301_v15, 4  ;;  %v2826_v42 = vld [vmem:[%s6159_s13 + $0x8] sm:$0x77]  ;;  %v4127_v24 = vmul.f32 -1.442695, %v1828_v14 }
 0x1d6   : > { %7188 = vst [vmem:[#allocation60_spill] sm:$0xff] %v6193_v52  ;;  %v6206_v13 = vsel %vm623_vm0, %v7191_v36, %v7190_v41  ;;  %v4440_v21 = vpop.eup %4439  ;;  %4465 = vpow2.f32 %v6033_v29  ;;  %v1829_v3 = vadd.f32 %v7184_v10, %v1575_v27  ;;  %4179 = vmatprep.subr.msk.mxu0 %vm2843_vm4, %v2835_v20  ;;  %v7194_v29 = vrot.slane %v6072_v31, 4  ;;  %v6234_v27 = vld [vmem:[%s5041_s28 + $0xb8] sm:$0xf]  ;;  %v7197_v31 = vld [vmem:[#allocation37_spill] sm:$0xff]  ;;  %v7198_v20 = vld [vmem:[#allocation38_spill] sm:$0xff] }
 0x1d7   : > { %v6211_v18 = vpop.eup %4441  ;;  %v1958_v26 = vadd.f32 1.0, %v4440_v21  ;;  %4467 = vpow2.f32 %v6061_v34  ;;  %v7195_v15 = vrot.slane %v5751_v19, 4  ;;  %v1831_v34 = vadd.f32 %v7184_v10, %v1700_v11  ;;  %4180 = vmatpush1.msk.msra.mxu0 %vm2843_vm4, %v2825_v7  ;;  %v1590_v21 = vpop.f32.mrf.mxu0  ;;  %v7204_v40 = vld [vmem:[#allocation41_spill] sm:$0xff] }
 0x1d8   : > { %7192 = vst [vmem:[#allocation24_spill] sm:$0xff] %v6211_v18  ;;  %v6216_v41 = vpop.eup %4443  ;;  %v6221_v35 = vsel %vm623_vm0, %v7194_v29, %v2494_v53  ;;  %4469 = vpow2.f32 %v6078_v38  ;;  %v1579_v53 = vadd.f32 %v6121_v47, %v7197_v31  ;;  %v1704_v38 = vadd.f32 %v6130_v8, %v7198_v20  ;;  %v7203_v31 = vld [vmem:[#allocation40_spill] sm:$0xff] }
 0x1d9   : > { %7193 = vst [vmem:[#allocation58_spill] sm:$0xff] %v6216_v41  ;;  %v6227_v36 = vsel %vm623_vm0, %v7195_v15, %v2364_v56  ;;  %v6231_v14 = vpop.eup %4445  ;;  %4471 = vrcp.f32 %v1958_v26  ;;  %v2836_v19 = vcombine.high %v2826_v42, %v2826_v42  ;;  %v4129_v11 = vmul.f32 -1.442695, %v1830_v44  ;;  %v7201_v56 = vld [vmem:[#allocation39_spill] sm:$0xff]  ;;  %v1715_v15 = vpop.f32.mrf.mxu1 }
 0x1da   : > { %7196 = vst [vmem:[#allocation25_spill] sm:$0xff] %v6231_v14  ;;  %v6240_v29 = vpop.eup %4447  ;;  %4473 = vpow2.f32 %v6109_v25  ;;  %v7200_v7 = vrot.slane %v5761_v2, 4  ;;  %v1581_v26 = vadd.f32 %v6144_v59, %v7201_v56  ;;  %v4128_v8 = vmul.f32 -1.442695, %v1829_v3  ;;  %v7205_v59 = vld [vmem:[#allocation45_spill] sm:$0xff]  ;;  %v1592_v3 = vpop.f32.mrf.mxu0 }
 0x1db   : > { %7199 = vst [vmem:[#allocation62_spill] sm:$0xff] %v6240_v29  ;;  %v6250_v47 = vpop.eup %4449  ;;  %4475 = vpow2.f32 %v4119_v30  ;;  %v1706_v20 = vadd.f32 %v6151_v28, %v7203_v31  ;;  %v1585_v18 = vadd.f32 %v1584_v62, %v7204_v40  ;;  %4182 = vmatprep.subr.msk.mxu1 %vm2843_vm4, %v2836_v19  ;;  %v4130_v2 = vmul.f32 -1.442695, %v1831_v34  ;;  %v7206_v40 = vld [vmem:[#allocation42_spill] sm:$0xff] }
 0x1dc   : > { %v6246_v10 = vsel %vm623_vm0, %v7200_v7, %v2362_v63  ;;  %7202 = vst [vmem:[#allocation69_spill] sm:$0xff] %v6250_v47  ;;  %v6256_v25 = vpop.eup %4451  ;;  %4477 = vpow2.f32 %v6169_v1  ;;  %v1591_v63 = vadd.f32 %v1590_v21, %v7205_v59  ;;  %4183 = vmatpush1.msk.msra.mxu1 %vm2843_vm4, %v2826_v42  ;;  %v1836_v28 = vadd.f32 %v5787_v23, %v1579_v53  ;;  %v7207_v21 = vld [vmem:[#allocation43_spill] sm:$0xff]  ;;  %v7208_v19 = vld [vmem:[#allocation46_spill] sm:$0xff]  ;;  %v1717_v7 = vpop.f32.mrf.mxu1 }
 0x1dd   : > { %v6262_v30 = vpop.eup %4453  ;;  %4479 = vpow2.f32 %v6173_v22  ;;  %v6267_v62 = vadd.f32 %v5787_v23, %v1704_v38  ;;  %v1710_v1 = vadd.f32 %v6177_v33, %v7206_v40  ;;  %v6275_v42 = vadd.f32 %v5787_v23, %v1581_v26  ;;  %v2830_v38 = vld [vmem:[%s6991_s9] sm:$0x3]  ;;  %v7209_v26 = vld [vmem:[#allocation44_spill] sm:$0xff]  ;;  %v2827_v59 = vld [vmem:[%s6159_s13 + $0x10] sm:$0x77] }
 0x1de   : > { %v6271_v34 = vpop.eup %4455  ;;  %4481 = vpow2.f32 %v6183_v4  ;;  %v1587_v22 = vadd.f32 %v1586_v61, %v7207_v21  ;;  %v1716_v53 = vadd.f32 %v1715_v15, %v7208_v19  ;;  %v6285_v33 = vadd.f32 %v5787_v23, %v1706_v20  ;;  %v7210_v40 = vld [vmem:[#allocation47_spill] sm:$0xff]  ;;  %v2828_v19 = vld [vmem:[%s6159_s13 + $0x18] sm:$0x77]  ;;  %4181 = vmatmul.mubr.msk.f32.vlgmr.msra.gmra.mxu0 %vm2839_vm5, %v2830_v38  ;;  %4184 = vmatmul.mubr.msk.f32.vlgmr.msra.gmra.mxu1 %vm2839_vm5, %v2830_v38 }
 0x1df   : > { %v6282_v56 = vpop.eup %4457  ;;  %4483 = vpow2.f32 %v4127_v24  ;;  %v6288_v4 = vadd.f32 %v5745_v0, %v1585_v18  ;;  %v1712_v31 = vadd.f32 %v1711_v48, %v7209_v26  ;;  %v6293_v15 = vadd.f32 %v5852_v12, %v1591_v63  ;;  %v7211_v18 = vld [vmem:[#allocation48_spill] sm:$0xff] }
 0x1e0   : > { %v4460_v61 = vpop.eup %4459  ;;  %4485 = vpow2.f32 %v4129_v11  ;;  %v1593_v21 = vadd.f32 %v1592_v3, %v7210_v40  ;;  %v6300_v23 = vadd.f32 %v5745_v0, %v1710_v1  ;;  %v1718_v20 = vadd.f32 %v1717_v7, %v7211_v18  ;;  %v1596_v3 = vpop.f32.mrf.mxu0 }
 0x1e1   : > { %v6297_v44 = vpop.eup %4461  ;;  %v1957_v24 = vadd.f32 1.0, %v4460_v61  ;;  %4487 = vpow2.f32 %v4128_v8  ;;  %v6306_v11 = vadd.f32 %v5745_v0, %v1587_v22  ;;  %v6309_v63 = vadd.f32 %v5852_v12, %v1716_v53 }
 0x1e2   : > { %v4464_v48 = vpop.eup %4463  ;;  %4489 = vpow2.f32 %v4130_v2  ;;  %v2837_v8 = vcombine.high %v2827_v59, %v2827_v59  ;;  %v7212_v26 = vmov 0.0   ;;  %v6314_v61 = vadd.f32 %v5745_v0, %v1712_v31  ;;  %v1721_v0 = vpop.f32.mrf.mxu1 }
 0x1e3   : > { %3066 = vmatprep.mubr.f32.mxu0 %v7212_v26  ;;  %3137 = vmatprep.mubr.f32.mxu1 %v7212_v26  ;;  %v4466_v1 = vpop.eup %4465  ;;  %4491 = vrcp.f32 %v1957_v24  ;;  %v1959_v7 = vadd.f32 1.0, %v4464_v48  ;;  %v2838_v40 = vcombine.high %v2828_v19, %v2828_v19  ;;  %v6318_v22 = vmul.f32 -1.442695, %v6293_v15 }
 0x1e4   : > { %v4468_v2 = vpop.eup %4467  ;;  %v1964_v18 = vadd.f32 1.0, %v4466_v1  ;;  %4493 = vtanh.f32 %v1836_v28  ;;  %v6321_v53 = vadd.f32 %v5852_v12, %v1593_v21  ;;  %4185 = vmatprep.subr.msk.mxu0 %vm2843_vm4, %v2837_v8  ;;  %v6325_v48 = vadd.f32 %v5852_v12, %v1718_v20  ;;  %v1598_v1 = vpop.f32.mrf.mxu0  ;;  %v7214_v20 = vld [vmem:[#allocation18_spill] sm:$0xff] }
 0x1e5   : > { %v4470_v52 = vpop.eup %4469  ;;  %4495 = vrcp.f32 %v1959_v7  ;;  %v1966_v24 = vadd.f32 1.0, %v4468_v2  ;;  %4188 = vmatprep.subr.msk.mxu1 %vm2843_vm4, %v2838_v40  ;;  %4186 = vmatpush1.msk.msra.mxu0 %vm2843_vm4, %v2827_v59  ;;  %v6331_v28 = vadd.f32 %v6198_v46, %v6148_v49  ;;  %v6336_v8 = vmul.f32 -1.442695, %v6309_v63  ;;  %v7213_v49 = vld [vmem:[#allocation49_spill] sm:$0xff] }
 0x1e6   : > { %v6333_v31 = vpop.eup %4471  ;;  %4497 = vrcp.f32 %v1964_v18  ;;  %v1965_v21 = vadd.f32 1.0, %v4470_v52  ;;  %4189 = vmatpush1.msk.msra.mxu1 %vm2843_vm4, %v2828_v19  ;;  %v6341_v12 = vadd.f32 %v6221_v35, %v6165_v58  ;;  %4187 = vmatmul.mubr.msk.f32.vlgmr.msra.gmra.mxu0 %vm2839_vm5, %v2830_v38  ;;  %v6345_v46 = vadd.f32 %v1596_v3, %v7213_v49  ;;  %v7215_v35 = vld [vmem:[#allocation50_spill] sm:$0xff]  ;;  %v7217_v49 = vld [vmem:[#allocation84_spill] sm:$0xff] }
 0x1e7   : > { %v4474_v59 = vpop.eup %4473  ;;  %4499 = vrcp.f32 %v1966_v24  ;;  %v2762_v52 = vrot.slane %v6331_v28, 4  ;;  %4190 = vmatmul.mubr.msk.f32.vlgmr.msra.gmra.mxu1 %vm2839_vm5, %v2830_v38  ;;  %v2432_v7 = vmul.f32 %v7214_v20, %v5882_v17  ;;  %3227 = vmatprep.mubr.f32.mxu0 %v7212_v26  ;;  %v6353_v40 = vadd.f32 %v1721_v0, %v7215_v35  ;;  %v7216_v38 = vld [vmem:[#allocation51_spill] sm:$0xff]  ;;  %v1723_v35 = vpop.f32.mrf.mxu1 }
 0x1e8   : > { %v4476_v19 = vpop.eup %4475  ;;  %4501 = vrcp.f32 %v1965_v21  ;;  %v1967_v58 = vadd.f32 1.0, %v4474_v59  ;;  %v2766_v2 = vrot.slane %v6341_v12, 4  ;;  %3298 = vmatprep.mubr.f32.mxu1 %v7212_v26  ;;  %v6359_v24 = vadd.f32 %v1598_v1, %v7216_v38 }
 0x1e9   : > { %v4478_v3 = vpop.eup %4477  ;;  %v2068_v18 = vadd.f32 1.0, %v4476_v19  ;;  %4503 = vtanh.f32 %v6267_v62  ;;  %4172 = vst [vmem:[%s6363_s16 + $0x148] sm:$0xf] %v2762_v52  ;;  %v2488_v21 = vrot.slane %v2432_v7, 4  ;;  %v2434_v20 = vmul.f32 %v5987_v60, %v7217_v49 }
 0x1ea   : > { %v4480_v0 = vpop.eup %4479  ;;  %4505 = vrcp.f32 %v1967_v58  ;;  %v2070_v59 = vadd.f32 1.0, %v4478_v3  ;;  %4174 = vst [vmem:[%s6363_s16 + $0x158] sm:$0xf] %v2766_v2  ;;  %v6371_v62 = vadd.f32 %v6107_v50, %v5983_v55  ;;  %v7218_v38 = vrot.slane %v6022_v32, 4 }
 0x1eb   : > { %v4482_v1 = vpop.eup %4481  ;;  %4507 = vrcp.f32 %v2068_v18  ;;  %v2069_v19 = vadd.f32 1.0, %v4480_v0  ;;  %v6378_v7 = vadd.f32 %v6126_v37, %v6013_v16  ;;  %v2492_v55 = vrot.slane %v2434_v20, 4  ;;  %v1602_v16 = vpop.f32.mrf.mxu0 }
 0x1ec   : > { %v2489_v26 = vsel %vm623_vm0, %v7218_v38, %v2488_v21  ;;  %v4484_v58 = vpop.eup %4483  ;;  %4509 = vrcp.f32 %v2070_v59  ;;  %v2071_v3 = vadd.f32 1.0, %v4482_v1  ;;  %v2740_v0 = vrot.slane %v6371_v62, 4  ;;  %v1727_v1 = vpop.f32.mrf.mxu1 }
 0x1ed   : > { %v6381_v60 = vadd.f32 %v2489_v26, %v6113_v54  ;;  %v4486_v50 = vpop.eup %4485  ;;  %4511 = vrcp.f32 %v2069_v19  ;;  %v2076_v18 = vadd.f32 1.0, %v4484_v58  ;;  %v2746_v32 = vrot.slane %v6378_v7, 4 }
 0x1ee   : > { %v4488_v14 = vpop.eup %4487  ;;  %4513 = vrcp.f32 %v2071_v3  ;;  %v2078_v21 = vadd.f32 1.0, %v4486_v50  ;;  %v7219_v59 = vrot.slane %v6043_v43, 4  ;;  %v7220_v38 = vrot.slane %v6057_v51, 4 }
 0x1ef   : > { %v2760_v37 = vrot.slane %v6381_v60, 4  ;;  %v4490_v26 = vpop.eup %4489  ;;  %4515 = vrcp.f32 %v2076_v18  ;;  %v2077_v20 = vadd.f32 1.0, %v4488_v14  ;;  %v7221_v43 = vrot.slane %v6089_v57, 4 }
 0x1f0   : > { %v2493_v54 = vsel %vm623_vm0, %v7219_v59, %v2492_v55  ;;  %v2741_v58 = vsel %vm623_vm0, %v7220_v38, %v2740_v0  ;;  %v6395_v3 = vpop.eup %4491  ;;  %4517 = vrcp.f32 %v2078_v21  ;;  %v2079_v50 = vadd.f32 1.0, %v4490_v26  ;;  %v7224_v38 = vld [vmem:[#allocation63_spill] sm:$0xff] }
 0x1f1   : > { %v6390_v19 = vadd.f32 %v2493_v54, %v6134_v9  ;;  %v2761_v55 = vsel %vm623_vm0, %v7221_v43, %v2760_v37  ;;  %4171 = vst [vmem:[%s6363_s16 + $0x140] sm:$0xf] %v2760_v37  ;;  %v2763_v14 = vsel %vm623_vm0, %v2740_v0, %v2762_v52  ;;  %4156 = vst [vmem:[%s6363_s16 + $0xc8] sm:$0xff] %v2741_v58  ;;  %v4494_v9 = vpop.eup %4493  ;;  %4519 = vrcp.f32 %v2077_v20  ;;  %v7223_v52 = vld [vmem:[#allocation52_spill] sm:$0xff]  ;;  %v1604_v20 = vpop.f32.mrf.mxu0 }
 0x1f2   : > { %4163 = vst [vmem:[%s6363_s16 + $0x100] sm:$0xff] %v2761_v55  ;;  %4164 = vst [vmem:[%s6363_s16 + $0x108] sm:$0xff] %v2763_v14  ;;  %v7222_v59 = vrot.slane %v6065_v39, 4  ;;  %v2767_v54 = vsel %vm623_vm0, %v2746_v32, %v2766_v2  ;;  %v6410_v26 = vpop.eup %4495  ;;  %4521 = vrcp.f32 %v2079_v50  ;;  %v6413_v37 = vmul.f32 %v4494_v9, %v6256_v25  ;;  %v7226_v2 = vld [vmem:[#allocation53_spill] sm:$0xff]  ;;  %v1729_v50 = vpop.f32.mrf.mxu1 }
 0x1f3   : > { %v2764_v18 = vrot.slane %v6390_v19, 4  ;;  %v1724_v0 = vadd.f32 %v1723_v35, %v7223_v52  ;;  %4166 = vst [vmem:[%s6363_s16 + $0x118] sm:$0xff] %v2767_v54  ;;  %v7225_v58 = vrot.slane %v7224_v38, 4  ;;  %v6421_v55 = vpop.eup %4497  ;;  %4523 = vtanh.f32 %v6275_v42  ;;  %v7228_v35 = vld [vmem:[#allocation64_spill] sm:$0xff]  ;;  %v7230_v54 = vld [vmem:[#allocation71_spill] sm:$0xff] }
 0x1f4   : > { %v2747_v21 = vsel %vm623_vm0, %v7222_v59, %v2746_v32  ;;  %v1603_v32 = vadd.f32 %v1602_v16, %v7226_v2  ;;  %v7227_v25 = vrot.slane %v6102_v6, 4  ;;  %v7229_v9 = vrot.slane %v7228_v35, 4  ;;  %v7235_v2 = vld [vmem:[#allocation55_spill] sm:$0xff] }
 0x1f5   : > { %4158 = vst [vmem:[%s6363_s16 + $0xd8] sm:$0xff] %v2747_v21  ;;  %v2392_v43 = vmul.f32 %v5882_v17, %v7225_v58  ;;  %4173 = vst [vmem:[%s6363_s16 + $0x150] sm:$0xf] %v2764_v18  ;;  %v6432_v21 = vpop.eup %4499  ;;  %v7231_v17 = vrot.slane %v7230_v54, 4  ;;  %v7042_v42 = vrot.slane %v6413_v37, 4  ;;  %4525 = vtanh.f32 %v6285_v33 }
 0x1f6   : > { %v2765_v14 = vsel %vm623_vm0, %v7227_v25, %v2764_v18  ;;  %v2394_v59 = vmul.f32 %v7217_v49, %v7229_v9  ;;  %v7232_v16 = vrot.slane %v6003_v5, 4  ;;  %v6444_v18 = vpop.eup %4501  ;;  %4527 = vtanh.f32 %v6288_v4  ;;  %v7234_v49 = vld [vmem:[#allocation54_spill] sm:$0xff]  ;;  %v7238_v5 = vld [vmem:[#allocation56_spill] sm:$0xff] }
 0x1f7   : > { %v2396_v52 = vmul.f32 %v6421_v55, %v7231_v17  ;;  %4165 = vst [vmem:[%s6363_s16 + $0x110] sm:$0xff] %v2765_v14  ;;  %v1728_v58 = vadd.f32 %v1727_v1, %v7234_v49  ;;  %v1605_v25 = vadd.f32 %v1604_v20, %v7235_v2  ;;  %v7236_v35 = vrot.slane %v6031_v45, 4  ;;  %v4504_v54 = vpop.eup %4503  ;;  %v7239_v1 = vld [vmem:[#allocation75_spill] sm:$0xff] }
 0x1f8   : > { %v6442_v38 = vadd.f32 %v7232_v16, %v2392_v43  ;;  %4529 = vtanh.f32 %v6300_v23  ;;  %v1730_v43 = vadd.f32 %v1729_v50, %v7238_v5  ;;  %v6460_v14 = vpop.eup %4505  ;;  %v7240_v20 = vrot.slane %v7239_v1, 4  ;;  %v7241_v23 = vld [vmem:[#allocation83_spill] sm:$0xff]  ;;  %v7244_v1 = vld [vmem:[#allocation85_spill] sm:$0xff] }
 0x1f9   : > { %v6451_v9 = vadd.f32 %v7236_v35, %v2394_v59  ;;  %v6455_v33 = vadd.f32 %v7042_v42, %v2396_v52  ;;  %v6466_v59 = vmul.f32 %v4504_v54, %v6262_v30  ;;  %4531 = vtanh.f32 %v6306_v11  ;;  %v4508_v52 = vpop.eup %4507 }
 0x1fa   : > { %7233 = vst [vmem:[#allocation70_spill] sm:$0xff] %v6442_v38  ;;  %v2736_v4 = vrot.slane %v6442_v38, 4  ;;  %v2398_v45 = vmul.f32 %v6432_v21, %v7240_v20  ;;  %v1860_v50 = vadd.f32 %v7241_v23, %v6345_v46  ;;  %v1862_v16 = vadd.f32 %v7241_v23, %v6353_v40  ;;  %v4510_v30 = vpop.eup %4509 }
 0x1fb   : > { %7237 = vst [vmem:[#allocation66_spill] sm:$0xff] %v6451_v9  ;;  %v2742_v17 = vrot.slane %v6451_v9, 4  ;;  %4533 = vtanh.f32 %v6455_v33  ;;  %v7242_v49 = vrot.slane %v6089_v57, 4  ;;  %v7041_v35 = vrot.slane %v6466_v59, 4  ;;  %v4512_v5 = vpop.eup %4511 }
 0x1fc   : > { %4535 = vtanh.f32 %v6314_v61  ;;  %v1861_v11 = vadd.f32 %v7241_v23, %v6359_v24  ;;  %v7243_v54 = vrot.slane %v6102_v6, 4  ;;  %v1863_v40 = vadd.f32 %v7241_v23, %v1724_v0  ;;  %v7246_v0 = vld [vmem:[#allocation77_spill] sm:$0xff] }
 0x1fd   : > { %v2738_v2 = vsel %vm623_vm0, %v2736_v4, %v7242_v49  ;;  %4537 = vtanh.f32 %v6293_v15  ;;  %v1868_v4 = vadd.f32 %v7244_v1, %v1603_v32  ;;  %v1870_v20 = vadd.f32 %v7244_v1, %v1728_v58  ;;  %v4514_v49 = vpop.eup %4513 }
 0x1fe   : > { %4155 = vst [vmem:[%s6363_s16 + $0xc0] sm:$0xff] %v2738_v2  ;;  %v2744_v46 = vsel %vm623_vm0, %v2742_v17, %v7243_v54  ;;  %v6493_v61 = vadd.f32 %v7041_v35, %v2398_v45  ;;  %4539 = vpow2.f32 %v6318_v22  ;;  %v1869_v24 = vadd.f32 %v7244_v1, %v1605_v25  ;;  %v4516_v2 = vpop.eup %4515 }
 0x1ff   : > { %4157 = vst [vmem:[%s6363_s16 + $0xd0] sm:$0xff] %v2744_v46  ;;  %v1871_v17 = vadd.f32 %v7244_v1, %v1730_v43  ;;  %v7245_v15 = vrot.slane %v6234_v27, 4  ;;  %v7247_v23 = vrot.slane %v7246_v0, 4  ;;  %4541 = vtanh.f32 %v6309_v63  ;;  %v4518_v54 = vpop.eup %4517 }
 0x200   : > { %v4136_v58 = vmul.f32 -1.442695, %v6321_v53  ;;  %v4138_v45 = vmul.f32 -1.442695, %v6325_v48  ;;  %4543 = vtanh.f32 %v6493_v61  ;;  %v4143_v22 = vmul.f32 -1.442695, %v1860_v50  ;;  %v4520_v43 = vpop.eup %4519 }
 0x201   : > { %v2367_v32 = vsel %vm623_vm0, %v7247_v23, %v7245_v15  ;;  %v4145_v25 = vmul.f32 -1.442695, %v1862_v16  ;;  %v4144_v46 = vmul.f32 -1.442695, %v1861_v11  ;;  %4545 = vpow2.f32 %v6336_v8  ;;  %v4522_v15 = vpop.eup %4521  ;;  %v7248_v23 = vld [vmem:[#allocation76_spill] sm:$0xff]  ;;  %v7250_v16 = vld [vmem:[#allocation79_spill] sm:$0xff] }
 0x202   : > { %v4146_v27 = vmul.f32 -1.442695, %v1863_v40  ;;  %v4151_v1 = vmul.f32 -1.442695, %v1868_v4  ;;  %v6508_v0 = vmul.f32 -1.442695, %v1870_v20  ;;  %4547 = vtanh.f32 %v6321_v53  ;;  %v4524_v50 = vpop.eup %4523 }
 0x203   : > { %v7249_v63 = vrot.slane %v7248_v23, 4  ;;  %v6514_v42 = vmul.f32 -1.442695, %v1869_v24  ;;  %v6516_v9 = vmul.f32 -1.442695, %v1871_v17  ;;  %v2404_v11 = vmul.f32 %v4508_v52, %v7250_v16  ;;  %v7251_v40 = vld [vmem:[#allocation78_spill] sm:$0xff]  ;;  %v4526_v41 = vpop.eup %4525 }
 0x204   : > { %v2748_v8 = vrot.slane %v6455_v33, 4  ;;  %v7252_v4 = vrot.slane %v7251_v40, 4  ;;  %4549 = vpow2.f32 %v4136_v58  ;;  %v7253_v23 = vld [vmem:[#allocation80_spill] sm:$0xff]  ;;  %v2421_v53 = vmul.f32 %v4524_v50, %v6271_v34  ;;  %v4528_v24 = vpop.eup %4527  ;;  %v7255_v17 = vld [vmem:[#allocation82_spill] sm:$0xff] }
 0x205   : > { %v2397_v35 = vmul.f32 %v6444_v18, %v7249_v63  ;;  %v2406_v47 = vmul.f32 %v4510_v30, %v7253_v23  ;;  %v7254_v63 = vld [vmem:[#allocation81_spill] sm:$0xff]  ;;  %4551 = vtanh.f32 %v6325_v48  ;;  %v6528_v29 = vmul.f32 %v4514_v49, %v7255_v17  ;;  %v4530_v16 = vpop.eup %4529 }
 0x206   : > { %v2399_v20 = vmul.f32 %v6460_v14, %v7252_v4  ;;  %v2405_v38 = vmul.f32 %v4512_v5, %v7254_v63  ;;  %v2412_v33 = vmul.f32 %v4516_v2, %v6206_v13  ;;  %v2423_v52 = vmul.f32 %v4526_v41, %v6282_v56  ;;  %v4532_v5 = vpop.eup %4531 }
 0x207   : > { %4553 = vpow2.f32 %v4138_v45  ;;  %v2754_v58 = vrot.slane %v6493_v61, 4  ;;  %v2469_v40 = vrot.slane %v2421_v53, 4  ;;  %v2428_v30 = vmul.f32 %v4528_v24, %v6297_v44 }
 0x208   : > { %4555 = vpow2.f32 %v4143_v22  ;;  %v2414_v34 = vmul.f32 %v4518_v54, %v6227_v36  ;;  %v2471_v48 = vrot.slane %v2423_v52, 4  ;;  %v2430_v50 = vmul.f32 %v4530_v16, %v6333_v31  ;;  %v6536_v49 = vpop.eup %4533 }
 0x209   : > { %4557 = vpow2.f32 %v4145_v25  ;;  %v6538_v13 = vadd.f32 %v2469_v40, %v2397_v35  ;;  %v2480_v41 = vrot.slane %v2428_v30, 4  ;;  %v6541_v56 = vmul.f32 %v4532_v5, %v6395_v3  ;;  %v4536_v61 = vpop.eup %4535 }
 0x20a   : > { %4559 = vpow2.f32 %v4144_v46  ;;  %v6544_v44 = vmul.f32 %v4520_v43, %v6246_v10  ;;  %v6546_v2 = vmul.f32 %v4522_v15, %v2367_v32  ;;  %v2484_v36 = vrot.slane %v2430_v50, 4  ;;  %v4538_v45 = vpop.eup %4537 }
 0x20b   : > { %4561 = vpow2.f32 %v4146_v27  ;;  %v6548_v31 = vadd.f32 %v2471_v48, %v2399_v20  ;;  %v7256_v54 = vrot.slane %v6413_v37, 4  ;;  %v2482_v22 = vrot.slane %v6541_v56, 4  ;;  %v4540_v25 = vpop.eup %4539 }
 0x20c   : > { %v6555_v3 = vmul.f32 %v4536_v61, %v6410_v26  ;;  %v2751_v10 = vrot.slane %v6538_v13, 4  ;;  %v7257_v32 = vrot.slane %v6466_v59, 4  ;;  %v2436_v27 = vmul.f32 %v4538_v45, %v6421_v55  ;;  %v4542_v15 = vpop.eup %4541 }
 0x20d   : > { %v2481_v35 = vsel %vm623_vm0, %v7256_v54, %v2480_v41  ;;  %v2483_v4 = vsel %vm623_vm0, %v2469_v40, %v2482_v22  ;;  %v2212_v26 = vadd.f32 1.0, %v4540_v25  ;;  %v6568_v23 = vpop.eup %4543  ;;  %v2438_v59 = vmul.f32 %v4542_v15, %v6432_v21 }
 0x20e   : > { %v6558_v46 = vadd.f32 %v2481_v35, %v2404_v11  ;;  %v2485_v43 = vsel %vm623_vm0, %v7257_v32, %v2484_v36  ;;  %v2486_v20 = vrot.slane %v6555_v3, 4  ;;  %v2496_v63 = vrot.slane %v2436_v27, 4  ;;  %v4546_v53 = vpop.eup %4545 }
 0x20f   : > { %v6564_v37 = vadd.f32 %v2485_v43, %v2406_v47  ;;  %4563 = vpow2.f32 %v4151_v1  ;;  %v6574_v24 = vadd.f32 %v2483_v4, %v2405_v38  ;;  %v4548_v17 = vpop.eup %4547  ;;  %v2214_v40 = vadd.f32 1.0, %v4546_v53 }
 0x210   : > { %v2749_v11 = vrot.slane %v6558_v46, 4  ;;  %v2487_v47 = vsel %vm623_vm0, %v2471_v48, %v2486_v20  ;;  %4565 = vrcp.f32 %v2212_v26  ;;  %v2497_v16 = vsel %vm623_vm0, %v2480_v41, %v2496_v63 }
 0x211   : > { %v2755_v55 = vrot.slane %v6564_v37, 4  ;;  %v2500_v30 = vrot.slane %v2438_v59, 4  ;;  %v4550_v5 = vpop.eup %4549  ;;  %v6580_v1 = vadd.f32 %v2497_v16, %v2412_v33  ;;  %v2437_v50 = vmul.f32 %v4548_v17, %v6444_v18 }
 0x212   : > { %v2750_v52 = vsel %vm623_vm0, %v2748_v8, %v2749_v11  ;;  %4567 = vpow2.f32 %v6508_v0  ;;  %v4552_v48 = vpop.eup %4551  ;;  %v2213_v8 = vadd.f32 1.0, %v4550_v5  ;;  %v2752_v41 = vrot.slane %v6574_v24, 4 }
 0x213   : > { %4159 = vst [vmem:[%s6363_s16 + $0xe0] sm:$0xff] %v2750_v52  ;;  %v2756_v21 = vsel %vm623_vm0, %v2754_v58, %v2755_v55  ;;  %4569 = vrcp.f32 %v2214_v40  ;;  %v2501_v38 = vsel %vm623_vm0, %v2484_v36, %v2500_v30  ;;  %v2768_v61 = vrot.slane %v6580_v1, 4 }
 0x214   : > { %4161 = vst [vmem:[%s6363_s16 + $0xf0] sm:$0xff] %v2756_v21  ;;  %v4554_v56 = vpop.eup %4553  ;;  %v6588_v58 = vadd.f32 %v2501_v38, %v2414_v34  ;;  %v2498_v33 = vrot.slane %v2437_v50, 4  ;;  %v2439_v18 = vmul.f32 %v4552_v48, %v6460_v14  ;;  %4571 = vrcp.f32 %v2213_v8 }
 0x215   : > { %v4556_v0 = vpop.eup %4555  ;;  %v2215_v45 = vadd.f32 1.0, %v4554_v56  ;;  %v2753_v54 = vsel %vm623_vm0, %v2751_v10, %v2752_v41  ;;  %v6593_v36 = vadd.f32 %v2487_v47, %v6528_v29  ;;  %v2769_v3 = vsel %vm623_vm0, %v2749_v11, %v2768_v61  ;;  %4175 = vst [vmem:[%s6363_s16 + $0x160] sm:$0xf] %v2768_v61  ;;  %v7261_v61 = vld [vmem:[#allocation70_spill] sm:$0xff] }
 0x216   : > { %v4558_v35 = vpop.eup %4557  ;;  %v2772_v34 = vrot.slane %v6588_v58, 4  ;;  %v2499_v25 = vsel %vm623_vm0, %v2482_v22, %v2498_v33  ;;  %v2502_v32 = vrot.slane %v2439_v18, 4  ;;  %4160 = vst [vmem:[%s6363_s16 + $0xe8] sm:$0xff] %v2753_v54  ;;  %4167 = vst [vmem:[%s6363_s16 + $0x120] sm:$0xff] %v2769_v3  ;;  %v2220_v43 = vadd.f32 1.0, %v4556_v0  ;;  %v7263_v54 = vld [vmem:[#allocation58_spill] sm:$0xff] }
 0x217   : > { %v4560_v14 = vpop.eup %4559  ;;  %4573 = vrcp.f32 %v2215_v45  ;;  %v2222_v10 = vadd.f32 1.0, %v4558_v35  ;;  %v6602_v29 = vadd.f32 %v2499_v25, %v6544_v44  ;;  %v2757_v63 = vrot.slane %v6548_v31, 4  ;;  %v7264_v3 = vld [vmem:[#allocation66_spill] sm:$0xff] }
 0x218   : > { %v4562_v27 = vpop.eup %4561  ;;  %v2773_v15 = vsel %vm623_vm0, %v2755_v55, %v2772_v34  ;;  %4177 = vst [vmem:[%s6363_s16 + $0x170] sm:$0xf] %v2772_v34  ;;  %v2503_v4 = vsel %vm623_vm0, %v2486_v20, %v2502_v32  ;;  %v2221_v26 = vadd.f32 1.0, %v4560_v14  ;;  %4575 = vpow2.f32 %v6514_v42 }
 0x219   : > { %4169 = vst [vmem:[%s6363_s16 + $0x130] sm:$0xff] %v2773_v15  ;;  %4577 = vrcp.f32 %v2220_v43  ;;  %v2223_v22 = vadd.f32 1.0, %v4562_v27  ;;  %v2770_v11 = vrot.slane %v6602_v29, 4  ;;  %v6611_v44 = vadd.f32 %v2503_v4, %v6546_v2  ;;  %v7265_v43 = vld [vmem:[#allocation25_spill] sm:$0xff]  ;;  %v7266_v15 = vld [vmem:[#allocation60_spill] sm:$0xff] }
 0x21a   : > { %4579 = vrcp.f32 %v2222_v10  ;;  %v2758_v59 = vrot.slane %v6593_v36, 4 }
 0x21b   : > { %4581 = vrcp.f32 %v2221_v26  ;;  %4176 = vst [vmem:[%s6363_s16 + $0x168] sm:$0xf] %v2770_v11  ;;  %v2774_v42 = vrot.slane %v6611_v44, 4  ;;  %v2771_v20 = vsel %vm623_vm0, %v2752_v41, %v2770_v11 }
 0x21c   : > { %v4564_v53 = vpop.eup %4563  ;;  %4583 = vrcp.f32 %v2223_v22  ;;  %4168 = vst [vmem:[%s6363_s16 + $0x128] sm:$0xff] %v2771_v20  ;;  %v2759_v55 = vsel %vm623_vm0, %v2757_v63, %v2758_v59  ;;  %v7267_v22 = vld [vmem:[#allocation24_spill] sm:$0xff] }
 0x21d   : > { %v6620_v2 = vpop.eup %4565  ;;  %v2228_v47 = vadd.f32 1.0, %v4564_v53  ;;  %4585 = vpow2.f32 %v6516_v9  ;;  %4178 = vst [vmem:[%s6363_s16 + $0x178] sm:$0xf] %v2774_v42  ;;  %v2775_v17 = vsel %vm623_vm0, %v2758_v59, %v2774_v42  ;;  %4162 = vst [vmem:[%s6363_s16 + $0xf8] sm:$0xff] %v2759_v55  ;;  %v7268_v59 = vld [vmem:[#allocation22_spill] sm:$0xff]  ;;  %v7269_v53 = vld [vmem:[#allocation23_spill] sm:$0xff] }
 0x21e   : > { %4587 = vtanh.f32 %v6331_v28  ;;  %4170 = vst [vmem:[%s6363_s16 + $0x138] sm:$0xff] %v2775_v17 }
 0x21f   : > { %v4568_v52 = vpop.eup %4567  ;;  %4589 = vrcp.f32 %v2228_v47 }
 0x220   : > { %v6628_v16 = vpop.eup %4569  ;;  %v2230_v40 = vadd.f32 1.0, %v4568_v52  ;;  %4591 = vtanh.f32 %v6341_v12 }
 0x221   : > { %4593 = vtanh.f32 %v6381_v60  ;;  %v6632_v30 = vpop.eup %4571  ;;  %v7258_v60 = vld [vmem:[#allocation57_spill] sm:$0xff] }
 0x222   : > { %4595 = vrcp.f32 %v2230_v40  ;;  %v2208_v50 = vadd.f32 1.0, %v7258_v60 }
 0x223   : > { %4597 = vtanh.f32 %v6390_v19 }
 0x224   : > { %v6635_v9 = vpop.eup %4573  ;;  %4599 = vtanh.f32 %v6371_v62 }
 0x225   : > { %v4576_v28 = vpop.eup %4575  ;;  %4601 = vtanh.f32 %v6378_v7  ;;  %v7259_v7 = vld [vmem:[#allocation19_spill] sm:$0xff] }
 0x226   : > { %v6639_v5 = vpop.eup %4577  ;;  %v2229_v21 = vadd.f32 1.0, %v4576_v28  ;;  %4603 = vtanh.f32 %v6089_v57  ;;  %v2210_v38 = vadd.f32 1.0, %v7259_v7  ;;  %v7270_v28 = vld [vmem:[#allocation20_spill] sm:$0xff] }
 0x227   : > { %v6642_v12 = vpop.eup %4579  ;;  %4605 = vtanh.f32 %v6102_v6  ;;  %v7260_v6 = vld [vmem:[#allocation62_spill] sm:$0xff] }
 0x228   : > { %v6646_v48 = vpop.eup %4581  ;;  %4607 = vrcp.f32 %v2229_v21 }
 0x229   : > { %v6648_v19 = vpop.eup %4583  ;;  %4609 = vtanh.f32 %v6057_v51  ;;  %v7262_v51 = vld [vmem:[#allocation69_spill] sm:$0xff] }
 0x22a   : > { %v4586_v62 = vpop.eup %4585  ;;  %4611 = vtanh.f32 %v6065_v39 }
 0x22b   : > { %v4588_v8 = vpop.eup %4587  ;;  %v2231_v57 = vadd.f32 1.0, %v4586_v62  ;;  %4613 = vrcp.f32 %v2208_v50  ;;  %v7271_v50 = vld [vmem:[#allocation21_spill] sm:$0xff] }
 0x22c   : > { %v6653_v41 = vpop.eup %4589  ;;  %v2593_v56 = vmul.f32 %v4588_v8, %v7260_v6  ;;  %4615 = vtanh.f32 %v7261_v61 }
 0x22d   : > { %v4592_v33 = vpop.eup %4591  ;;  %4617 = vrcp.f32 %v2231_v57 }
 0x22e   : > { %v4594_v18 = vpop.eup %4593  ;;  %v2650_v0 = vrot.slane %v2593_v56, 4  ;;  %v2595_v45 = vmul.f32 %v4592_v33, %v7262_v51  ;;  %4619 = vrcp.f32 %v2210_v38 }
 0x22f   : > { %v6658_v39 = vpop.eup %4595  ;;  %v2592_v35 = vmul.f32 %v4594_v18, %v7263_v54  ;;  %4621 = vtanh.f32 %v7264_v3 }
 0x230   : > { %v4598_v34 = vpop.eup %4597  ;;  %2705 = vst [vmem:[%s6363_s16 + $0x88] sm:$0xf] %v2650_v0  ;;  %4191 = vmatprep.subr.msk.mxu0 %vm623_vm0, %v2650_v0  ;;  %v2654_v25 = vrot.slane %v2595_v45, 4  ;;  %4623 = vtanh.f32 %v6602_v29 }
 0x231   : > { %v4600_v32 = vpop.eup %4599  ;;  %v2648_v14 = vrot.slane %v2592_v35, 4  ;;  %v2594_v10 = vmul.f32 %v4598_v34, %v7265_v43  ;;  %4625 = vtanh.f32 %v6611_v44 }
 0x232   : > { %v4602_v27 = vpop.eup %4601  ;;  %2707 = vst [vmem:[%s6363_s16 + $0x98] sm:$0xf] %v2654_v25  ;;  %4194 = vmatprep.subr.msk.mxu1 %vm623_vm0, %v2654_v25  ;;  %v2585_v4 = vmul.f32 %v4600_v32, %v7266_v15  ;;  %4627 = vtanh.f32 %v6580_v1 }
 0x233   : > { %v4604_v26 = vpop.eup %4603  ;;  %2704 = vst [vmem:[%s6363_s16 + $0x80] sm:$0xf] %v2648_v14  ;;  %4192 = vmatpush1.msk.msra.mxu0 %vm623_vm0, %v2648_v14  ;;  %v2652_v29 = vrot.slane %v2594_v10, 4  ;;  %v2587_v11 = vmul.f32 %v4602_v27, %v7267_v22  ;;  %4629 = vtanh.f32 %v6588_v58 }
 0x234   : > { %v4606_v44 = vpop.eup %4605  ;;  %v2628_v63 = vrot.slane %v2585_v4, 4  ;;  %v2584_v42 = vmul.f32 %v4604_v26, %v7268_v59  ;;  %4631 = vtanh.f32 %v6574_v24  ;;  %v7272_v4 = vmov 0.0  }
 0x235   : > { %v4608_v20 = vpop.eup %4607  ;;  %2706 = vst [vmem:[%s6363_s16 + $0x90] sm:$0xf] %v2652_v29  ;;  %4195 = vmatpush1.msk.msra.mxu1 %vm623_vm0, %v2652_v29  ;;  %v2634_v1 = vrot.slane %v2587_v11, 4  ;;  %v2586_v55 = vmul.f32 %v4606_v44, %v7269_v53  ;;  %4633 = vtanh.f32 %v6593_v36 }
 0x236   : > { %v4610_v47 = vpop.eup %4609  ;;  %v2651_v58 = vsel %vm623_vm0, %v2628_v63, %v2650_v0  ;;  %v2625_v17 = vrot.slane %v2584_v42, 4  ;;  %4635 = vtanh.f32 %v6558_v46 }
 0x237   : > { %v4612_v52 = vpop.eup %4611  ;;  %2697 = vst [vmem:[%s6363_s16 + $0x48] sm:$0xff] %v2651_v58  ;;  %3191 = vmatprep.subr.mxu0 %v2651_v58  ;;  %v2655_v24 = vsel %vm623_vm0, %v2634_v1, %v2654_v25  ;;  %v2631_v40 = vrot.slane %v2586_v55, 4  ;;  %v2577_v21 = vmul.f32 %v4610_v47, %v7270_v28  ;;  %4637 = vtanh.f32 %v6564_v37 }
 0x238   : > { %v4614_v60 = vpop.eup %4613  ;;  %2699 = vst [vmem:[%s6363_s16 + $0x58] sm:$0xff] %v2655_v24  ;;  %3262 = vmatprep.subr.mxu1 %v2655_v24  ;;  %v2649_v36 = vsel %vm623_vm0, %v2625_v17, %v2648_v14  ;;  %v2579_v62 = vmul.f32 %v4612_v52, %v7271_v50  ;;  %4639 = vtanh.f32 %v6538_v13 }
 0x239   : > { %v4616_v46 = vpop.eup %4615  ;;  %2696 = vst [vmem:[%s6363_s16 + $0x40] sm:$0xff] %v2649_v36  ;;  %3192 = vmatpush1.msra.mxu0 %v2649_v36  ;;  %v2653_v7 = vsel %vm623_vm0, %v2631_v40, %v2652_v29  ;;  %v2627_v38 = vrot.slane %v2577_v21, 4  ;;  %4641 = vtanh.f32 %v6548_v31  ;;  %v6702_v31 = vld [vmem:[%s6990_s8] sm:$0x3] }
 0x23a   : > { %v4618_v37 = vpop.eup %4617  ;;  %2698 = vst [vmem:[%s6363_s16 + $0x50] sm:$0xff] %v2653_v7  ;;  %3263 = vmatpush1.msra.mxu1 %v2653_v7  ;;  %v2633_v8 = vrot.slane %v2579_v62, 4  ;;  %v2576_v57 = vmul.f32 %v4616_v46, %v4614_v60 }
 0x23b   : > { %v4620_v6 = vpop.eup %4619  ;;  %v2629_v56 = vsel %vm623_vm0, %v2627_v38, %v2628_v63  ;;  %v2582_v63 = vmul.f32 %v6628_v16, %v6568_v23 }
 0x23c   : > { %v4622_v61 = vpop.eup %4621  ;;  %2689 = vst [vmem:[%s6363_s16 + $0x8] sm:$0xff] %v2629_v56  ;;  %3193 = vmatprep.subr.mxu0 %v2629_v56  ;;  %v2635_v13 = vsel %vm623_vm0, %v2633_v8, %v2634_v1  ;;  %v2624_v33 = vrot.slane %v2576_v57, 4  ;;  %v3451_v57 = vpop.permute.xlu0 %3450 }
 0x23d   : > { %v4624_v18 = vpop.eup %4623  ;;  %2691 = vst [vmem:[%s6363_s16 + $0x18] sm:$0xff] %v2635_v13  ;;  %3264 = vmatprep.subr.mxu1 %v2635_v13  ;;  %v2578_v0 = vmul.f32 %v4622_v61, %v4620_v6  ;;  %v2642_v58 = vrot.slane %v2582_v63, 4 }
 0x23e   : > { %v4626_v51 = vpop.eup %4625  ;;  %v2626_v45 = vsel %vm623_vm0, %v2624_v33, %v2625_v17  ;;  %v2597_v54 = vmul.f32 %v4624_v18, %v4608_v20 }
 0x23f   : > { %v4628_v35 = vpop.eup %4627  ;;  %2688 = vst [vmem:[%s6363_s16] sm:$0xff] %v2626_v45  ;;  %3194 = vmatpush1.msra.mxu0 %v2626_v45  ;;  %v2630_v3 = vrot.slane %v2578_v0, 4  ;;  %v2599_v34 = vmul.f32 %v4626_v51, %v4618_v37 }
 0x240   : > { %v4630_v25 = vpop.eup %4629  ;;  %4193 = vmatmul.mubr.msk.f32.vlgmr.msra.gmra.mxu0 %vm592_vm1, %v6702_v31  ;;  %v2658_v32 = vrot.slane %v2597_v54, 4  ;;  %v2596_v14 = vmul.f32 %v4628_v35, %v6653_v41  ;;  %v2580_v41 = vmul.f32 %v6620_v2, %v6536_v49 }
 0x241   : > { %v4632_v43 = vpop.eup %4631  ;;  %v2632_v10 = vsel %vm623_vm0, %v2630_v3, %v2631_v40  ;;  %v2662_v27 = vrot.slane %v2599_v34, 4  ;;  %v2598_v15 = vmul.f32 %v4630_v25, %v6658_v39  ;;  %3369 = vmatprep.mubr.f32.mxu0 %v7272_v4 }
 0x242   : > { %v4634_v26 = vpop.eup %4633  ;;  %2690 = vst [vmem:[%s6363_s16 + $0x10] sm:$0xff] %v2632_v10  ;;  %3265 = vmatpush1.msra.mxu1 %v2632_v10  ;;  %2709 = vst [vmem:[%s6363_s16 + $0xa8] sm:$0xf] %v2658_v32  ;;  %4197 = vmatprep.subr.msk.mxu0 %vm623_vm0, %v2658_v32  ;;  %v2656_v29 = vrot.slane %v2596_v14, 4  ;;  %v2589_v22 = vmul.f32 %v4632_v43, %v6646_v48  ;;  %v2636_v53 = vrot.slane %v2580_v41, 4 }
 0x243   : > { %v4636_v11 = vpop.eup %4635  ;;  %4196 = vmatmul.mubr.msk.f32.vlgmr.msra.gmra.mxu1 %vm592_vm1, %v6702_v31  ;;  %2711 = vst [vmem:[%s6363_s16 + $0xb8] sm:$0xf] %v2662_v27  ;;  %4200 = vmatprep.subr.msk.mxu1 %vm623_vm0, %v2662_v27  ;;  %v2660_v39 = vrot.slane %v2598_v15, 4  ;;  %v2591_v44 = vmul.f32 %v4634_v26, %v6648_v19 }
 0x244   : > { %v4638_v59 = vpop.eup %4637  ;;  %2708 = vst [vmem:[%s6363_s16 + $0xa0] sm:$0xf] %v2656_v29  ;;  %4198 = vmatpush1.msk.msra.mxu0 %vm623_vm0, %v2656_v29  ;;  %v2640_v48 = vrot.slane %v2589_v22, 4  ;;  %v2588_v49 = vmul.f32 %v4636_v11, %v6639_v5  ;;  %3440 = vmatprep.mubr.f32.mxu1 %v7272_v4 }
 0x245   : > { %v4640_v2 = vpop.eup %4639  ;;  %2710 = vst [vmem:[%s6363_s16 + $0xb0] sm:$0xf] %v2660_v39  ;;  %4201 = vmatpush1.msk.msra.mxu1 %vm623_vm0, %v2660_v39  ;;  %v2646_v42 = vrot.slane %v2591_v44, 4  ;;  %v2590_v19 = vmul.f32 %v4638_v59, %v6642_v12 }
 0x246   : > { %v4642_v20 = vpop.eup %4641  ;;  %v2659_v23 = vsel %vm623_vm0, %v2640_v48, %v2658_v32  ;;  %v2637_v16 = vrot.slane %v2588_v49, 4  ;;  %v2581_v1 = vmul.f32 %v4640_v2, %v6632_v30 }
 0x247   : > { %2701 = vst [vmem:[%s6363_s16 + $0x68] sm:$0xff] %v2659_v23  ;;  %3333 = vmatprep.subr.mxu0 %v2659_v23  ;;  %v2663_v5 = vsel %vm623_vm0, %v2646_v42, %v2662_v27  ;;  %v2643_v55 = vrot.slane %v2590_v19, 4  ;;  %v2583_v47 = vmul.f32 %v4642_v20, %v6635_v9 }
 0x248   : > { %2703 = vst [vmem:[%s6363_s16 + $0x78] sm:$0xff] %v2663_v5  ;;  %3404 = vmatprep.subr.mxu1 %v2663_v5  ;;  %v2657_v12 = vsel %vm623_vm0, %v2637_v16, %v2656_v29  ;;  %v2639_v17 = vrot.slane %v2581_v1, 4  ;;  %v2638_v30 = vsel %vm623_vm0, %v2636_v53, %v2637_v16  ;;  %v7273_v16 = vld [vmem:[#allocation17_spill] sm:$0xff] }
 0x249   : > { %2700 = vst [vmem:[%s6363_s16 + $0x60] sm:$0xff] %v2657_v12  ;;  %3334 = vmatpush1.msra.mxu0 %v2657_v12  ;;  %v2661_v52 = vsel %vm623_vm0, %v2643_v55, %v2660_v39  ;;  %v2645_v24 = vrot.slane %v2583_v47, 4  ;;  %2692 = vst [vmem:[%s6363_s16 + $0x20] sm:$0xff] %v2638_v30  ;;  %v2644_v40 = vsel %vm623_vm0, %v2642_v58, %v2643_v55  ;;  %v3561_v1 = vsub.s32 0, %v7273_v16  ;;  %v6783_v53 = vld [vmem:[%s542_s26] sm:$0xff] }
 0x24a   : > { %2702 = vst [vmem:[%s6363_s16 + $0x70] sm:$0xff] %v2661_v52  ;;  %3405 = vmatpush1.msra.mxu1 %v2661_v52  ;;  %v2641_v9 = vsel %vm623_vm0, %v2639_v17, %v2640_v48  ;;  %2694 = vst [vmem:[%s6363_s16 + $0x30] sm:$0xff] %v2644_v40  ;;  %v6786_v5 = vsub.s32 2, %v7273_v16  ;;  %v3565_v55 = vsub.s32 1, %v7273_v16  ;;  %v6790_v58 = vsub.s32 6, %v7273_v16 }
 0x24b   : > { %2693 = vst [vmem:[%s6363_s16 + $0x28] sm:$0xff] %v2641_v9  ;;  %3335 = vmatprep.subr.mxu0 %v2641_v9  ;;  %v2647_v28 = vsel %vm623_vm0, %v2645_v24, %v2646_v42  ;;  %v3562_v12 = vrot.slane %v6783_v53, %v3561_v1 }
 0x24c   : > { %2695 = vst [vmem:[%s6363_s16 + $0x38] sm:$0xff] %v2647_v28  ;;  %3406 = vmatprep.subr.mxu1 %v2647_v28  ;;  %3336 = vmatpush1.msra.mxu0 %v2638_v30  ;;  %v3573_v30 = vsub.s32 3, %v7273_v16  ;;  %v3566_v28 = vrot.slane %v6783_v53, %v3565_v55 }
 0x24d   : > { %3407 = vmatpush1.msra.mxu1 %v2644_v40  ;;  %4199 = vmatmul.mubr.msk.f32.vlgmr.msra.gmra.mxu0 %vm592_vm1, %v6702_v31  ;;  %v4675_v40 = vld [vmem:[%s6159_s13] sm:$0x77] }
 0x24e   : > { %4202 = vmatmul.mubr.msk.f32.vlgmr.msra.gmra.mxu1 %vm592_vm1, %v6702_v31  ;;  %v3512_v9 = vrot.slane %v4675_v40, %v6786_v5 }
 0x29e   : > { %v2926_v21 = vpop.f32.mrf.mxu0  ;;  %v2997_v60 = vpop.f32.mrf.mxu1 }
 0x2a0   : > { %v2928_v36 = vpop.f32.mrf.mxu0  ;;  %v2999_v50 = vpop.f32.mrf.mxu1 }
 0x2a6   : > { %v3068_v62 = vpop.f32.mrf.mxu0 }
 0x2a7   : > { %v3139_v46 = vpop.f32.mrf.mxu1 }
 0x2a8   : > { %v3070_v7 = vpop.f32.mrf.mxu0 }
 0x2a9   : > { %v3141_v38 = vpop.f32.mrf.mxu1 }
 0x300   : > { %v3229_v37 = vpop.f32.mrf.mxu0 }
 0x301   : > { %v3230_v8 = vadd.f32 %v3229_v37, %v2926_v21  ;;  %v4676_v37 = vld [vmem:[%s6159_s13 + $0x8] sm:$0x77] }
 0x302   : > { %v3231_v6 = vpop.f32.mrf.mxu0 }
 0x303   : > { %v6754_v56 = vadd.f32 %v3451_v57, %v3230_v8  ;;  %v3300_v61 = vpop.f32.mrf.mxu1  ;;  %v3232_v13 = vadd.f32 %v3231_v6, %v2928_v36  ;;  %v3570_v36 = vrot.slane %v6783_v53, %v6786_v5  ;;  %v3520_v8 = vrot.slane %v4676_v37, %v6786_v5 }
 0x304   : > { %v3301_v33 = vadd.f32 %v3300_v61, %v2997_v60 }
 0x305   : > { %v4203_v18 = vmul.f32 -1.442695, %v6754_v56  ;;  %v6757_v0 = vadd.f32 %v3451_v57, %v3232_v13  ;;  %v3302_v31 = vpop.f32.mrf.mxu1 }
 0x306   : > { %v6759_v51 = vadd.f32 %v3451_v57, %v3301_v33  ;;  %v3303_v45 = vadd.f32 %v3302_v31, %v2999_v50  ;;  %v3524_v31 = vrot.slane %v4676_v37, %v6790_v58 }
 0x307   : > { %4643 = vpow2.f32 %v4203_v18  ;;  %v4204_v54 = vmul.f32 -1.442695, %v6757_v0 }
 0x308   : > { %v4205_v35 = vmul.f32 -1.442695, %v6759_v51  ;;  %v6763_v3 = vadd.f32 %v3451_v57, %v3303_v45 }
 0x309   : > { %4645 = vpow2.f32 %v4204_v54 }
 0x30a   : > { %4647 = vpow2.f32 %v4205_v35  ;;  %v4206_v34 = vmul.f32 -1.442695, %v6763_v3 }
 0x30c   : > { %4649 = vpow2.f32 %v4206_v34 }
 0x30d   : > { %v3371_v25 = vpop.f32.mrf.mxu0 }
 0x30e   : > { %v3372_v32 = vadd.f32 %v3371_v25, %v3068_v62  ;;  %v3442_v14 = vpop.f32.mrf.mxu1 }
 0x30f   : > { %v3443_v43 = vadd.f32 %v3442_v14, %v3139_v46  ;;  %v3373_v10 = vpop.f32.mrf.mxu0  ;;  %v3516_v46 = vrot.slane %v4675_v40, %v6790_v58 }
 0x310   : > { %v6766_v27 = vadd.f32 %v3451_v57, %v3372_v32  ;;  %v3374_v15 = vadd.f32 %v3373_v10, %v3070_v7  ;;  %v3444_v4 = vpop.f32.mrf.mxu1  ;;  %v3577_v10 = vsub.s32 4, %v7273_v16 }
 0x311   : > { %v6768_v26 = vadd.f32 %v3451_v57, %v3443_v43  ;;  %v3445_v29 = vadd.f32 %v3444_v4, %v3141_v38 }
 0x312   : > { %v4207_v22 = vmul.f32 -1.442695, %v6766_v27  ;;  %v6771_v41 = vadd.f32 %v3451_v57, %v3374_v15 }
 0x313   : > { %v4209_v11 = vmul.f32 -1.442695, %v6768_v26  ;;  %v6774_v39 = vadd.f32 %v3451_v57, %v3445_v29  ;;  %v3574_v57 = vrot.slane %v6783_v53, %v3573_v30 }
 0x314   : > { %v4644_v44 = vpop.eup %4643  ;;  %4651 = vpow2.f32 %v4207_v22  ;;  %v4208_v63 = vmul.f32 -1.442695, %v6771_v41 }
 0x315   : > { %v3485_v59 = vadd.f32 1.0, %v4644_v44  ;;  %4653 = vpow2.f32 %v4209_v11  ;;  %v4210_v48 = vmul.f32 -1.442695, %v6774_v39  ;;  %v3581_v44 = vsub.s32 5, %v7273_v16 }
 0x316   : > { %v4646_v49 = vpop.eup %4645  ;;  %4655 = vpow2.f32 %v4208_v63 }
 0x317   : > { %v4648_v2 = vpop.eup %4647  ;;  %4657 = vrcp.f32 %v3485_v59  ;;  %v3486_v42 = vadd.f32 1.0, %v4646_v49  ;;  %v3578_v49 = vrot.slane %v6783_v53, %v3577_v10  ;;  %v3730_v10 = vld [vmem:[%s6363_s16 + $0x30] sm:$0xff] (%p7274_p1) }
 0x318   : > { %v3487_v19 = vadd.f32 1.0, %v4648_v2  ;;  %4659 = vpow2.f32 %v4210_v48  ;;  %v3589_v2 = vsub.s32 7, %v7273_v16  ;;  %v4678_v16 = vld [vmem:[%s6159_s13 + $0x18] sm:$0x77] }
 0x319   : > { %v4650_v20 = vpop.eup %4649  ;;  %4661 = vrcp.f32 %v3486_v42 }
 0x31a   : > { %4663 = vrcp.f32 %v3487_v19  ;;  %v3488_v23 = vadd.f32 1.0, %v4650_v20  ;;  %v3586_v20 = vrot.slane %v6783_v53, %v6790_v58 }
 0x31c   : > { %4665 = vrcp.f32 %v3488_v23  ;;  %v4677_v23 = vld [vmem:[%s6159_s13 + $0x10] sm:$0x77]  ;;  %s7275_s13 = sld [smem:[#allocation87_spill]] (%p7274_p1) }
 0x31d   : > { %v3528_v1 = vrot.slane %v4677_v23, %v6786_v5  ;;  %v3532_v30 = vrot.slane %v4677_v23, %v6790_v58  ;;  %v3760_v23 = vld [vmem:[%s6363_s16 + $0xa8] sm:$0xff] (%p7274_p1) }
 0x321   : > { %v4652_v47 = vpop.eup %4651 }
 0x322   : > { %v4654_v17 = vpop.eup %4653  ;;  %v3489_v52 = vadd.f32 1.0, %v4652_v47  ;;  %s6851_s28 = scalar_lea.vmem (%p7274_p1), %s7275_s13, %s4220_s18 }
 0x323   : > { %v4656_v24 = vpop.eup %4655  ;;  %v3491_v21 = vadd.f32 1.0, %v4654_v17  ;;  %3731 = vst [vmem:[%s6851_s28 + $0x30] sm:$0xff] (%p7274_p1), %v3730_v10  ;;  %3761 = vst [vmem:[%s6851_s28 + $0x1a8] sm:$0xff] (%p7274_p1), %v3760_v23 }
 0x324   : > { %v4658_v60 = vpop.eup %4657  ;;  %4667 = vrcp.f32 %v3489_v52  ;;  %v3490_v50 = vadd.f32 1.0, %v4656_v24  ;;  %v3536_v52 = vrot.slane %v4678_v16, %v6786_v5  ;;  %v3540_v5 = vrot.slane %v4678_v16, %v6790_v58  ;;  %v3774_v16 = vld [vmem:[%s6363_s16 + $0xe0] sm:$0xff] (%p7274_p1) }
 0x325   : > { %v4660_v62 = vpop.eup %4659  ;;  %v3599_v7 = vmul.f32 %v4658_v60, %v3562_v12  ;;  %4669 = vrcp.f32 %v3491_v21  ;;  %v3549_v13 = vmul.f32 %v4658_v60, %v3512_v9  ;;  %v3582_v12 = vrot.slane %v6783_v53, %v3581_v44  ;;  %v3742_v44 = vld [vmem:[%s6363_s16 + $0x60] sm:$0xff] (%p7274_p1)  ;;  %3775 = vst [vmem:[%s6851_s28 + $0x260] sm:$0xff] (%p7274_p1), %v3774_v16 }
 0x326   : > { %v4662_v38 = vpop.eup %4661  ;;  %4671 = vrcp.f32 %v3490_v50  ;;  %v3492_v6 = vadd.f32 1.0, %v4660_v62  ;;  %v3590_v9 = vrot.slane %v6783_v53, %v3589_v2  ;;  %3743 = vst [vmem:[%s6851_s28 + $0xe0] sm:$0xff] (%p7274_p1), %v3742_v44  ;;  %v3752_v2 = vld [vmem:[%s6363_s16 + $0x88] sm:$0xff] (%p7274_p1) }
 0x327   : > { %v4664_v61 = vpop.eup %4663  ;;  %v3615_v33 = vrot.slane %v3599_v7, 1  ;;  %v3600_v18 = vmul.f32 %v4662_v38, %v3566_v28  ;;  %v3550_v34 = vmul.f32 %v4662_v38, %v3516_v46  ;;  %3753 = vst [vmem:[%s6851_s28 + $0x188] sm:$0xff] (%p7274_p1), %v3752_v2 }
 0x328   : > { %v3601_v45 = vmul.f32 %v4664_v61, %v3570_v36  ;;  %4673 = vrcp.f32 %v3492_v6  ;;  %v3551_v32 = vmul.f32 %v4664_v61, %v3520_v8 }
 0x329   : > { %v4666_v54 = vpop.eup %4665  ;;  %v3631_v35 = vsub.f32 %v3549_v13, %v3615_v33  ;;  %v3616_v25 = vrot.slane %v3600_v18, 1 }
 0x32a   : > { %v3617_v14 = vrot.slane %v3601_v45, 1  ;;  %v3602_v43 = vmul.f32 %v4666_v54, %v3574_v57  ;;  %v3552_v22 = vmul.f32 %v4666_v54, %v3524_v31 }
 0x32b   : > { %v3647_v15 = vrot.slane %v3631_v35, 6  ;;  %v3632_v4 = vsub.f32 %v3550_v34, %v3616_v25 }
 0x32c   : > { %v3633_v29 = vsub.f32 %v3551_v32, %v3617_v14  ;;  %v3618_v11 = vrot.slane %v3602_v43, 1  ;;  %v3726_v14 = vld [vmem:[%s6363_s16 + $0x20] sm:$0xff] (%p7274_p1)  ;;  %v3728_v43 = vld [vmem:[%s6363_s16 + $0x28] sm:$0xff] (%p7274_p1) }
 0x32d   : > { %v3648_v63 = vrot.slane %v3632_v4, 6  ;;  %v3663_v42 = vsel %vm1215_vm2, %v6754_v56, %v3647_v15  ;;  %3727 = vst [vmem:[%s6851_s28 + $0x20] sm:$0xff] (%p7274_p1), %v3726_v14  ;;  %3729 = vst [vmem:[%s6851_s28 + $0x28] sm:$0xff] (%p7274_p1), %v3728_v43  ;;  %v3732_v15 = vld [vmem:[%s6363_s16 + $0x38] sm:$0xff] (%p7274_p1)  ;;  %v3734_v4 = vld [vmem:[%s6363_s16 + $0x40] sm:$0xff] (%p7274_p1) }
 0x32e   : > { %v3649_v59 = vrot.slane %v3633_v29, 6  ;;  %v3634_v48 = vsub.f32 %v3552_v22, %v3618_v11  ;;  %3733 = vst [vmem:[%s6851_s28 + $0x38] sm:$0xff] (%p7274_p1), %v3732_v15  ;;  %3735 = vst [vmem:[%s6851_s28 + $0xc0] sm:$0xff] (%p7274_p1), %v3734_v4  ;;  %v3736_v29 = vld [vmem:[%s6363_s16 + $0x48] sm:$0xff] (%p7274_p1)  ;;  %v3738_v22 = vld [vmem:[%s6363_s16 + $0x50] sm:$0xff] (%p7274_p1) }
 0x32f   : > { %v3664_v19 = vsel %vm1215_vm2, %v6757_v0, %v3648_v63  ;;  %v3740_v11 = vld [vmem:[%s6363_s16 + $0x58] sm:$0xff] (%p7274_p1)  ;;  %3737 = vst [vmem:[%s6851_s28 + $0xc8] sm:$0xff] (%p7274_p1), %v3736_v29  ;;  %3739 = vst [vmem:[%s6851_s28 + $0xd0] sm:$0xff] (%p7274_p1), %v3738_v22  ;;  %v3744_v63 = vld [vmem:[%s6363_s16 + $0x68] sm:$0xff] (%p7274_p1) }
 0x330   : > { %v3679_v55 = vcombine.low %v3663_v42, %v3664_v19  ;;  %v3650_v47 = vrot.slane %v3634_v48, 6  ;;  %v3665_v0 = vsel %vm1215_vm2, %v6759_v51, %v3649_v59  ;;  %3741 = vst [vmem:[%s6851_s28 + $0xd8] sm:$0xff] (%p7274_p1), %v3740_v11  ;;  %v3746_v59 = vld [vmem:[%s6363_s16 + $0x70] sm:$0xff] (%p7274_p1)  ;;  %3745 = vst [vmem:[%s6851_s28 + $0xe8] sm:$0xff] (%p7274_p1), %v3744_v63  ;;  %v3748_v48 = vld [vmem:[%s6363_s16 + $0x78] sm:$0xff] (%p7274_p1) }
 0x331   : > { %v4668_v17 = vpop.eup %4667  ;;  %3747 = vst [vmem:[%s6851_s28 + $0xf0] sm:$0xff] (%p7274_p1), %v3746_v59  ;;  %3749 = vst [vmem:[%s6851_s28 + $0xf8] sm:$0xff] (%p7274_p1), %v3748_v48  ;;  %v3754_v42 = vld [vmem:[%s6363_s16 + $0x90] sm:$0xff] (%p7274_p1)  ;;  %v3756_v19 = vld [vmem:[%s6363_s16 + $0x98] sm:$0xff] (%p7274_p1) }
 0x332   : > { %v4670_v56 = vpop.eup %4669  ;;  %3687 = vst [vmem:[%s6823_s21] sm:$0x77] %v3679_v55  ;;  %v3666_v24 = vsel %vm1215_vm2, %v6763_v3, %v3650_v47  ;;  %v3603_v40 = vmul.f32 %v4668_v17, %v3578_v49  ;;  %v3553_v36 = vmul.f32 %v4668_v17, %v3528_v1  ;;  %v3750_v49 = vld [vmem:[%s6363_s16 + $0x80] sm:$0xff] (%p7274_p1)  ;;  %3755 = vst [vmem:[%s6851_s28 + $0x190] sm:$0xff] (%p7274_p1), %v3754_v42  ;;  %v3762_v1 = vld [vmem:[%s6363_s16 + $0xb0] sm:$0xff] (%p7274_p1) }
 0x333   : > { %v4672_v28 = vpop.eup %4671  ;;  %v3680_v21 = vcombine.low %v3665_v0, %v3666_v24  ;;  %v3605_v60 = vmul.f32 %v4670_v56, %v3586_v20  ;;  %v3555_v46 = vmul.f32 %v4670_v56, %v3536_v52  ;;  %3751 = vst [vmem:[%s6851_s28 + $0x180] sm:$0xff] (%p7274_p1), %v3750_v49  ;;  %v3758_v20 = vld [vmem:[%s6363_s16 + $0xa0] sm:$0xff] (%p7274_p1)  ;;  %3757 = vst [vmem:[%s6851_s28 + $0x198] sm:$0xff] (%p7274_p1), %v3756_v19  ;;  %v3764_v55 = vld [vmem:[%s6363_s16 + $0xb8] sm:$0xff] (%p7274_p1) }
 0x334   : > { %v3619_v50 = vrot.slane %v3603_v40, 1  ;;  %v3604_v62 = vmul.f32 %v4672_v28, %v3582_v12  ;;  %v3554_v37 = vmul.f32 %v4672_v28, %v3532_v30  ;;  %3759 = vst [vmem:[%s6851_s28 + $0x1a0] sm:$0xff] (%p7274_p1), %v3758_v20  ;;  %3763 = vst [vmem:[%s6851_s28 + $0x1b0] sm:$0xff] (%p7274_p1), %v3762_v1  ;;  %v3766_v47 = vld [vmem:[%s6363_s16 + $0xc0] sm:$0xff] (%p7274_p1)  ;;  %v3768_v12 = vld [vmem:[%s6363_s16 + $0xc8] sm:$0xff] (%p7274_p1) }
 0x335   : > { %v4674_v51 = vpop.eup %4673  ;;  %3688 = vst [vmem:[%s6823_s21 + $0x8] sm:$0x77] %v3680_v21  ;;  %v3621_v7 = vrot.slane %v3605_v60, 1  ;;  %3765 = vst [vmem:[%s6851_s28 + $0x1b8] sm:$0xff] (%p7274_p1), %v3764_v55  ;;  %v3770_v17 = vld [vmem:[%s6363_s16 + $0xd0] sm:$0xff] (%p7274_p1)  ;;  %v3772_v30 = vld [vmem:[%s6363_s16 + $0xd8] sm:$0xff] (%p7274_p1) }
 0x336   : > { %v3635_v38 = vsub.f32 %v3553_v36, %v3619_v50  ;;  %v3620_v8 = vrot.slane %v3604_v62, 1  ;;  %v3606_v3 = vmul.f32 %v4674_v51, %v3590_v9  ;;  %v3556_v61 = vmul.f32 %v4674_v51, %v3540_v5  ;;  %3767 = vst [vmem:[%s6851_s28 + $0x240] sm:$0xff] (%p7274_p1), %v3766_v47  ;;  %3769 = vst [vmem:[%s6851_s28 + $0x248] sm:$0xff] (%p7274_p1), %v3768_v12  ;;  %v3776_v52 = vld [vmem:[%s6363_s16 + $0xe8] sm:$0xff] (%p7274_p1)  ;;  %v3778_v56 = vld [vmem:[%s6363_s16 + $0xf0] sm:$0xff] (%p7274_p1) }
 0x337   : > { %v3637_v57 = vsub.f32 %v3555_v46, %v3621_v7  ;;  %3771 = vst [vmem:[%s6851_s28 + $0x250] sm:$0xff] (%p7274_p1), %v3770_v17  ;;  %3773 = vst [vmem:[%s6851_s28 + $0x258] sm:$0xff] (%p7274_p1), %v3772_v30  ;;  %v3780_v0 = vld [vmem:[%s6363_s16 + $0xf8] sm:$0xff] (%p7274_p1)  ;;  %v3782_v24 = vld [vmem:[%s6363_s16 + $0x100] sm:$0xff] (%p7274_p1) }
 0x338   : > { %v3651_v53 = vrot.slane %v3635_v38, 6  ;;  %v3636_v6 = vsub.f32 %v3554_v37, %v3620_v8  ;;  %v3622_v13 = vrot.slane %v3606_v3, 1  ;;  %3777 = vst [vmem:[%s6851_s28 + $0x268] sm:$0xff] (%p7274_p1), %v3776_v52  ;;  %3779 = vst [vmem:[%s6851_s28 + $0x270] sm:$0xff] (%p7274_p1), %v3778_v56  ;;  %v3784_v40 = vld [vmem:[%s6363_s16 + $0x108] sm:$0xff] (%p7274_p1)  ;;  %v3786_v9 = vld [vmem:[%s6363_s16 + $0x110] sm:$0xff] (%p7274_p1) }
 0x339   : > { %v3653_v58 = vrot.slane %v3637_v57, 6  ;;  %3781 = vst [vmem:[%s6851_s28 + $0x278] sm:$0xff] (%p7274_p1), %v3780_v0  ;;  %3783 = vst [vmem:[%s6851_s28 + $0x300] sm:$0xff] (%p7274_p1), %v3782_v24  ;;  %v3788_v28 = vld [vmem:[%s6363_s16 + $0x118] sm:$0xff] (%p7274_p1)  ;;  %v3790_v21 = vld [vmem:[%s6363_s16 + $0x120] sm:$0xff] (%p7274_p1) }
 0x33a   : > { %v3652_v33 = vrot.slane %v3636_v6, 6  ;;  %v3638_v18 = vsub.f32 %v3556_v61, %v3622_v13  ;;  %v3667_v31 = vsel %vm1215_vm2, %v6766_v27, %v3651_v53  ;;  %v3718_v27 = vld [vmem:[%s6363_s16] sm:$0xff] (%p7274_p1)  ;;  %3785 = vst [vmem:[%s6851_s28 + $0x308] sm:$0xff] (%p7274_p1), %v3784_v40  ;;  %3787 = vst [vmem:[%s6851_s28 + $0x310] sm:$0xff] (%p7274_p1), %v3786_v9  ;;  %v3792_v60 = vld [vmem:[%s6363_s16 + $0x128] sm:$0xff] (%p7274_p1) }
 0x33b   : > { %v3669_v34 = vsel %vm1215_vm2, %v6768_v26, %v3653_v58  ;;  %v3720_v26 = vld [vmem:[%s6363_s16 + $0x8] sm:$0xff] (%p7274_p1)  ;;  %3719 = vst [vmem:[%s6851_s28] sm:$0xff] (%p7274_p1), %v3718_v27  ;;  %3789 = vst [vmem:[%s6851_s28 + $0x318] sm:$0xff] (%p7274_p1), %v3788_v28  ;;  %v3794_v5 = vld [vmem:[%s6363_s16 + $0x130] sm:$0xff] (%p7274_p1) }
 0x33c   : > { %v3668_v45 = vsel %vm1215_vm2, %v6771_v41, %v3652_v33  ;;  %v3654_v54 = vrot.slane %v3638_v18, 6  ;;  %v3722_v41 = vld [vmem:[%s6363_s16 + $0x10] sm:$0xff] (%p7274_p1)  ;;  %3721 = vst [vmem:[%s6851_s28 + $0x8] sm:$0xff] (%p7274_p1), %v3720_v26  ;;  %3791 = vst [vmem:[%s6851_s28 + $0x320] sm:$0xff] (%p7274_p1), %v3790_v21  ;;  %v3796_v36 = vld [vmem:[%s6363_s16 + $0x138] sm:$0xff] (%p7274_p1) }
 0x33d   : > { %v3681_v35 = vcombine.low %v3667_v31, %v3668_v45  ;;  %3702 = sbr.rel (!%p7274_p1) target bundleno = 837 (0x345), region = 76  ;;  %3723 = vst [vmem:[%s6851_s28 + $0x10] sm:$0xff] (%p7274_p1), %v3722_v41  ;;  %3793 = vst [vmem:[%s6851_s28 + $0x328] sm:$0xff] (%p7274_p1), %v3792_v60  ;;  %v3798_v50 = vld [vmem:[%s6363_s16 + $0x140] sm:$0xff] (%p7274_p1)  ;;  %v3800_v62 = vld [vmem:[%s6363_s16 + $0x148] sm:$0xff] (%p7274_p1) }
 0x33e   : > { %v3670_v25 = vsel %vm1215_vm2, %v6774_v39, %v3654_v54  ;;  %v3724_v39 = vld [vmem:[%s6363_s16 + $0x18] sm:$0xff] (%p7274_p1)  ;;  %3795 = vst [vmem:[%s6851_s28 + $0x330] sm:$0xff] (%p7274_p1), %v3794_v5  ;;  %3797 = vst [vmem:[%s6851_s28 + $0x338] sm:$0xff] (%p7274_p1), %v3796_v36  ;;  %v3802_v51 = vld [vmem:[%s6363_s16 + $0x150] sm:$0xff] (%p7274_p1) }
 0x33f   : > { %3689 = vst [vmem:[%s6823_s21 + $0x10] sm:$0x77] %v3681_v35  ;;  %v3682_v32 = vcombine.low %v3669_v34, %v3670_v25  ;;  %3725 = vst [vmem:[%s6851_s28 + $0x18] sm:$0xff] (%p7274_p1), %v3724_v39  ;;  %v3804_v46 = vld [vmem:[%s6363_s16 + $0x158] sm:$0xff] (%p7274_p1)  ;;  %v3806_v7 = vld [vmem:[%s6363_s16 + $0x160] sm:$0xff] (%p7274_p1) }
 0x340   : > { %3799 = vst [vmem:[%s6851_s28 + $0x3c0] sm:$0xff] (%p7274_p1), %v3798_v50  ;;  %3801 = vst [vmem:[%s6851_s28 + $0x3c8] sm:$0xff] (%p7274_p1), %v3800_v62  ;;  %v3808_v38 = vld [vmem:[%s6363_s16 + $0x168] sm:$0xff] (%p7274_p1)  ;;  %v3810_v37 = vld [vmem:[%s6363_s16 + $0x170] sm:$0xff] (%p7274_p1) }
 0x341   : > { %3690 = vst [vmem:[%s6823_s21 + $0x18] sm:$0x77] %v3682_v32  ;;  %3803 = vst [vmem:[%s6851_s28 + $0x3d0] sm:$0xff] (%p7274_p1), %v3802_v51  ;;  %v3812_v8 = vld [vmem:[%s6363_s16 + $0x178] sm:$0xff] (%p7274_p1) }
 0x342   : > { %3805 = vst [vmem:[%s6851_s28 + $0x3d8] sm:$0xff] %v3804_v46  ;;  %3807 = vst [vmem:[%s6851_s28 + $0x3e0] sm:$0xff] %v3806_v7 }
 0x343   : > { %3809 = vst [vmem:[%s6851_s28 + $0x3e8] sm:$0xff] %v3808_v38  ;;  %3811 = vst [vmem:[%s6851_s28 + $0x3f0] sm:$0xff] %v3810_v37 }
 0x344   : > { %3813 = vst [vmem:[%s6851_s28 + $0x3f8] sm:$0xff] %v3812_v8 }
 0x345 PF: > { %s4221_s15 = sshll.u32 %s4900_s25, 9  ;;  %s3827_s19 = sshll.u32 %s6823_s21, 4  ;;  %s3828_s19 = int_to_ptr.vmem [resolvable:$true] %s3827_s19 }
 0x346   : > { %s7276_s1 = sld [smem:[#allocation88_spill]]  ;;  %s4735_s26 = scalar_lea.vmem %s3828_s19, 512 }
 0x347   : > { %p4736_p13 = scmp.ne.s32.totalorder %s3828_s19, %s4735_s26  ;;  %p7277_p7 = scmp.ne.s32.totalorder %s7053_s14, 0 }
 0x348   : > { %s4813_s16 = smov [#allocation8]  }
 0x349   : > { %p4737_p9 = pnand %p4736_p13, %p7277_p7  ;;  %s4739_s27 = sshll.u32 %s4813_s16, 4  ;;  %s4740_s27 = int_to_ptr.vmem [resolvable:$false] %s4739_s27 }
 0x34a   : > { %s4741_s18 = scalar_lea.vmem %s4740_s27, 1024  ;;  %p4742_p2 = scmp.lt.s32.totalorder %s3828_s19, %s4740_s27 }
 0x34b   : > { %p4738_p0 = pneg %p4737_p9  ;;  %p4743_p4 = scmp.lt.s32.totalorder %s4741_s18, %s4735_s26 }
 0x34c   : > { %s3825_s12 = scalar_lea.hbm %s7276_s1, %s4221_s15 }
 0x34d   : > { %p4744_p10 = por %p4743_p4, %p4742_p2 }
 0x34f   : > { %p4745_p11 = pnand %p4744_p10, %p4738_p0 }
 0x351   : > { %4748 = shalt.err (!%p4745_p11)
}
 0x352   : > { %s4749_s25 = scalar_lea.hbm %s3825_s12, 512  ;;  %s4753_s11 = scalar_lea.hbm %s7276_s1, 1536 }
 0x353   : > { %p4750_p3 = scmp.ne.s32.totalorder %s3825_s12, %s4749_s25  ;;  %p4754_p6 = scmp.lt.s32.totalorder %s3825_s12, %s7276_s1 }
 0x354   : > { %p4755_p12 = scmp.lt.s32.totalorder %s4753_s11, %s4749_s25 }
 0x355   : > { %p4751_p5 = pnand %p4750_p3, %p7277_p7 }
 0x356   : > { %p4756_p1 = por %p4755_p12, %p4754_p6 }
 0x357   : > { %p4752_p8 = pneg %p4751_p5 }
 0x359   : > { %p4757_p13 = pnand %p4756_p1, %p4752_p8 }
 0x35b   : > { %4760 = shalt.err (!%p4757_p13)
}
 0x35c   : > { %4230 = dma.vmem_to_hbm [thread:$0]  (%p7277_p7), %s3828_s19, 512, %s3825_s12, %s3696_s17  }
 0x35d PF: > { %s7278_s15 = sld [smem:[#allocation12_spill]]  ;;  %p4244_p9 = scmp.ge.s32.totalorder %s4803_s24, 2 }
 0x35e   : > { %s7279_s20 = sld [smem:[#allocation16_spill]] }
 0x363   : > { %s3846_s23 = sand.u32 1, %s7278_s15  }
 0x364   : > { %p7280_p0 = scmp.ne.s32.totalorder %s7279_s20, 0  ;;  %s3847_s26 = scalar_lea.sflag [#allocation4], %s3846_s23 }
 0x366   : > { %p4240_p2 = pnand %p4244_p9, %p7280_p0 }
 0x368   : > { %p4241_p4 = pneg %p4240_p2 }
 0x36a   : > { %4786 = dma.done.wait (%p4241_p4), %s3847_s26, 512  }
 0x36b   : > { %4788 = vsyncadd (%p4241_p4), %s3847_s26, 4294966784  ;;  %s7281_s24 = sld [smem:[#allocation14_spill]]  ;;  %s7284_s21 = smov %s4795_s22 }
 0x36c   : > { %s7282_s16 = sld [smem:[#allocation13_spill]] }
 0x36d   : > { %s7283_s23 = sld [smem:[#allocation15_spill]] }
 0x371   : > { %p29_p10 = scmp.ge.s32.totalorder %s7281_s24, 5  }
 0x372   : > { %s7285_s22 = smov %s7282_s16 }
 0x373   :  { %31 = sbr.rel (!%p29_p10) target bundleno = 11 (0xb), region = 167 }
 0x378   :  { %3852 = vsyncpa [#allocation3], 1 }
 0x379   :  { %3854 = vsyncpa [#allocation3 + $0x1], 1 }
 0x37a   :  { %3855 = vsyncpa [#allocation6], 1 }
 0x37b   :  { %3857 = vsyncpa [#allocation6 + $0x1], 1 }
 0x37c   :  { %3858 = vsyncpa [#allocation4], 1 }
 0x37d   :  { %3860 = vsyncpa [#allocation4 + $0x1], 1 }

</bundles_post_ra>
